<compile_context>
chip_gen: v7x
topology: tpu7x:2x2x1
jax: 0.10.0
libtpu: 0.0.40
codegen_flags: <defaults>
</compile_context>

<pallas_src>
import functools

import jax
import jax.numpy as jnp
from jax.experimental import pallas as pl
from jax.experimental.pallas import tpu as pltpu

HIDDEN = 512
LEAKY_SLOPE = 0.2  # args.leaky_relu


def _leaky_relu(v, slope):
    return jnp.where(v > 0, v, slope * v)


def _discriminator_kernel(xt_ref, yt_ref, w1x_ref, w1y_ref, b1_ref,
                          w2_ref, b2_ref, w3_ref, b3_ref, out_ref, *, slope):
    # ---- Layer 1: Linear(x_dim + y_dim -> 512), concat folded into split-K ----
    # h1^T = W1x @ x^T + W1y @ y^T + b1   (bf16 MXU, f32 accumulate)
    h1 = jnp.dot(w1x_ref[...], xt_ref[...], preferred_element_type=jnp.float32)
    h1 = h1 + jnp.dot(w1y_ref[...], yt_ref[...],
                      preferred_element_type=jnp.float32)
    h1 = h1 + b1_ref[...]                      # (512, tb) + (512, 1) lane bcast
    h1 = _leaky_relu(h1, slope)

    # ---- Layer 2: Linear(512 -> 512) ----
    h2 = jnp.dot(w2_ref[...], h1.astype(jnp.bfloat16),
                 preferred_element_type=jnp.float32)
    h2 = h2 + b2_ref[...]
    h2 = _leaky_relu(h2, slope)

    # ---- Layer 3: Linear(512 -> 1) as a sublane reduction (VPU/XLU) ----------
    # Result is (1, tb): lane-dense, unmasked store; no N=1 MXU matmul and no
    # in-kernel transpose needed.
    w3 = w3_ref[...]                           # (512, 1) f32, lane-broadcast
    out = jnp.sum(h2 * w3, axis=0, keepdims=True) + b3_ref[...]
    out_ref[...] = out.astype(out_ref.dtype)


def _choose_tb(batch):
    """Pick a lane-axis batch tile: large (amortize per-step overhead),
    128/256-aligned, and leaving >= 2 grid steps when possible (megacore)."""
    if batch <= 128:
        return batch
    tb = min(1024, max(128, batch // 2))
    tb = (tb // 128) * 128
    if tb >= 512:
        tb -= tb % 256
    return tb


def discriminator_forward(x, y, params, *, slope=LEAKY_SLOPE, tb=None):
    """x: (B, x_dim), y: (B, y_dim) -> (B, 1) float32."""
    B, x_dim = x.shape
    y_dim = y.shape[1]
    d_in = x_dim + y_dim

    # Stream activations as bf16 and in (features, batch) orientation; the
    # transpose fuses with the cast (layout plumbing, not an extra HBM pass
    # over the concat like before).
    xt = x.T.astype(jnp.bfloat16)              # (x_dim, B)
    yt = y.T.astype(jnp.bfloat16)              # (y_dim, B)

    if tb is None:
        tb = _choose_tb(B)
    else:
        tb = min(tb, B)
        if tb != B and tb % 128 != 0:
            tb = _choose_tb(B)
    grid = (pl.cdiv(B, tb),)

    kernel = functools.partial(_discriminator_kernel, slope=slope)

    # Streaming batch tiles along the lane axis; weights/biases pinned to a
    # constant block so they are fetched once and stay VMEM-resident.
    xt_spec = pl.BlockSpec((x_dim, tb), lambda i: (0, i))
    yt_spec = pl.BlockSpec((y_dim, tb), lambda i: (0, i))
    w1x_spec = pl.BlockSpec((HIDDEN, x_dim), lambda i: (0, 0))
    w1y_spec = pl.BlockSpec((HIDDEN, y_dim), lambda i: (0, 0))
    b1_spec = pl.BlockSpec((HIDDEN, 1), lambda i: (0, 0))
    w2_spec = pl.BlockSpec((HIDDEN, HIDDEN), lambda i: (0, 0))
    b2_spec = pl.BlockSpec((HIDDEN, 1), lambda i: (0, 0))
    w3_spec = pl.BlockSpec((HIDDEN, 1), lambda i: (0, 0))
    b3_spec = pl.BlockSpec((1, 1), lambda i: (0, 0))
    out_spec = pl.BlockSpec((1, tb), lambda i: (0, i))   # lane-dense output

    flops = 2 * B * (d_in * HIDDEN + HIDDEN * HIDDEN + HIDDEN)
    weight_bytes = (2 * (d_in * HIDDEN + HIDDEN * HIDDEN)       # bf16 W1, W2
                    + 4 * (HIDDEN + 1)                          # f32 w3, b3
                    + 4 * 2 * HIDDEN)                           # f32 b1, b2
    io_bytes = 2 * B * d_in + 4 * B                             # bf16 in, f32 out
    cost = pl.CostEstimate(flops=flops, transcendentals=0,
                           bytes_accessed=weight_bytes + io_bytes)

    out_row = pl.pallas_call(
        kernel,
        out_shape=jax.ShapeDtypeStruct((1, B), jnp.float32),
        grid=grid,
        in_specs=[xt_spec, yt_spec, w1x_spec, w1y_spec, b1_spec,
                  w2_spec, b2_spec, w3_spec, b3_spec],
        out_specs=out_spec,
        compiler_params=pltpu.CompilerParams(
            dimension_semantics=("parallel",)),
        cost_estimate=cost,
    )(xt, yt,
      params["w1x"], params["w1y"], params["b1"],
      params["w2"], params["b2"],
      params["w3"], params["b3"])

    # (1, B) -> (B, 1): pure re-interpretation of the row-major buffer.
    return out_row.reshape(B, 1)


def init_params(key, x_dim, y_dim):
    """PyTorch-Linear-style init: U(-1/sqrt(fan_in), 1/sqrt(fan_in)).

    Weights are stored in the PyTorch (out, in) orientation; W1 is pre-split
    into its x / y column blocks (the concat is folded into split-K).  MXU
    weights (W1, W2) are bf16; biases and the final 512->1 row stay f32.
    """
    d_in = x_dim + y_dim
    k1, k2, k3, k4, k5, k6, k7 = jax.random.split(key, 7)

    def unif(k, shape, fan_in):
        bound = float(fan_in) ** -0.5
        return jax.random.uniform(k, shape, jnp.float32, -bound, bound)

    w1x = unif(k1, (HIDDEN, x_dim), d_in)
    w1y = unif(k2, (HIDDEN, y_dim), d_in)
    b1 = unif(k3, (HIDDEN, 1), d_in)
    w2 = unif(k4, (HIDDEN, HIDDEN), HIDDEN)
    b2 = unif(k5, (HIDDEN, 1), HIDDEN)
    w3 = unif(k6, (HIDDEN, 1), HIDDEN)          # W3^T stored as a column
    b3 = unif(k7, (1, 1), HIDDEN)
    return {
        "w1x": w1x.astype(jnp.bfloat16),
        "w1y": w1y.astype(jnp.bfloat16),
        "b1": b1,
        "w2": w2.astype(jnp.bfloat16),
        "b2": b2,
        "w3": w3,                               # f32 (VPU path)
        "b3": b3,
    }


def reference_forward(x, y, params, *, slope=LEAKY_SLOPE):
    """Plain-JAX reference (same bf16-matmul / f32-accumulate recipe)."""
    xt = x.T.astype(jnp.bfloat16)
    yt = y.T.astype(jnp.bfloat16)
    h1 = (jnp.dot(params["w1x"], xt, preferred_element_type=jnp.float32)
          + jnp.dot(params["w1y"], yt, preferred_element_type=jnp.float32)
          + params["b1"])
    h1 = jnp.where(h1 > 0, h1, slope * h1)
    h2 = jnp.dot(params["w2"], h1.astype(jnp.bfloat16),
                 preferred_element_type=jnp.float32) + params["b2"]
    h2 = jnp.where(h2 > 0, h2, slope * h2)
    out = jnp.sum(h2 * params["w3"], axis=0, keepdims=True) + params["b3"]
    return out.reshape(-1, 1)


if __name__ == "__main__":
    # Small but meaningful shapes: B=512 splits into two 256-column batch
    # tiles, so the weight-resident streaming pipeline (and the megacore
    # "parallel" batch axis) is actually exercised.
    B, X_DIM, Y_DIM = 512, 16, 16

    key = jax.random.PRNGKey(0)
    kx, ky, kp = jax.random.split(key, 3)
    x = jax.random.normal(kx, (B, X_DIM), jnp.float32)
    y = jax.random.normal(ky, (B, Y_DIM), jnp.float32)
    params = init_params(kp, X_DIM, Y_DIM)

    out = discriminator_forward(x, y, params)
    out = jax.block_until_ready(out)

    ref = reference_forward(x, y, params)
    assert out.shape == (B, 1)
    assert jnp.allclose(out, ref, atol=1e-2, rtol=1e-2), "mismatch vs reference"

    print("KERNEL_OK")
</pallas_src>

<mosaic_0001>
module attributes {stable_mosaic.version = 11 : i64} {
  func.func @_discriminator_kernel(%arg0: i32, %arg1: memref<16x256xbf16, #tpu.memory_space<vmem>>, %arg2: memref<16x256xbf16, #tpu.memory_space<vmem>>, %arg3: memref<512x16xbf16, #tpu.memory_space<vmem>>, %arg4: memref<512x16xbf16, #tpu.memory_space<vmem>>, %arg5: memref<512x1xf32, #tpu.memory_space<vmem>>, %arg6: memref<512x512xbf16, #tpu.memory_space<vmem>>, %arg7: memref<512x1xf32, #tpu.memory_space<vmem>>, %arg8: memref<512x1xf32, #tpu.memory_space<vmem>>, %arg9: memref<1x1xf32, #tpu.memory_space<vmem>>, %arg10: memref<1x256xf32, #tpu.memory_space<vmem>>) attributes {dimension_semantics = [#tpu.dimension_semantics<parallel>], iteration_bounds = array<i64: 2>, scalar_prefetch = 0 : i64, scratch_operands = 0 : i64, tpu.core_type = #tpu.core_type<tc>, window_params = [{transform_indices = @transform_0, window_bounds = array<i64: 16, 256>}, {transform_indices = @transform_1, window_bounds = array<i64: 16, 256>}, {pipeline_mode = #tpu.pipeline_mode<synchronous>, transform_indices = @transform_2, window_bounds = array<i64: 512, 16>}, {pipeline_mode = #tpu.pipeline_mode<synchronous>, transform_indices = @transform_3, window_bounds = array<i64: 512, 16>}, {pipeline_mode = #tpu.pipeline_mode<synchronous>, transform_indices = @transform_4, window_bounds = array<i64: 512, 1>}, {pipeline_mode = #tpu.pipeline_mode<synchronous>, transform_indices = @transform_5, window_bounds = array<i64: 512, 512>}, {pipeline_mode = #tpu.pipeline_mode<synchronous>, transform_indices = @transform_6, window_bounds = array<i64: 512, 1>}, {pipeline_mode = #tpu.pipeline_mode<synchronous>, transform_indices = @transform_7, window_bounds = array<i64: 512, 1>}, {pipeline_mode = #tpu.pipeline_mode<synchronous>, transform_indices = @transform_8, window_bounds = array<i64: 1, 1>}, {transform_indices = @transform_9, window_bounds = array<i64: 1, 256>}]} {
    %c0 = arith.constant 0 : index
    %c0_0 = arith.constant 0 : index
    %0 = vector.load %arg3[%c0, %c0_0] : memref<512x16xbf16, #tpu.memory_space<vmem>>, vector<512x16xbf16>
    %c0_1 = arith.constant 0 : index
    %c0_2 = arith.constant 0 : index
    %1 = vector.load %arg1[%c0_1, %c0_2] : memref<16x256xbf16, #tpu.memory_space<vmem>>, vector<16x256xbf16>
    %cst = arith.constant dense<0.000000e+00> : vector<512x256xf32>
    %2 = tpu.matmul %0, %1, %cst {dimension_numbers = #tpu.dot_dimension_numbers<[1], [0], [0], [1], [0, 0, 1, 1], [], []>} : vector<512x16xbf16>, vector<16x256xbf16>, vector<512x256xf32> -> vector<512x256xf32>
    %c0_3 = arith.constant 0 : index
    %c0_4 = arith.constant 0 : index
    %3 = vector.load %arg4[%c0_3, %c0_4] : memref<512x16xbf16, #tpu.memory_space<vmem>>, vector<512x16xbf16>
    %c0_5 = arith.constant 0 : index
    %c0_6 = arith.constant 0 : index
    %4 = vector.load %arg2[%c0_5, %c0_6] : memref<16x256xbf16, #tpu.memory_space<vmem>>, vector<16x256xbf16>
    %cst_7 = arith.constant dense<0.000000e+00> : vector<512x256xf32>
    %5 = tpu.matmul %3, %4, %cst_7 {dimension_numbers = #tpu.dot_dimension_numbers<[1], [0], [0], [1], [0, 0, 1, 1], [], []>} : vector<512x16xbf16>, vector<16x256xbf16>, vector<512x256xf32> -> vector<512x256xf32>
    %6 = arith.addf %2, %5 : vector<512x256xf32>
    %c0_8 = arith.constant 0 : index
    %c0_9 = arith.constant 0 : index
    %7 = vector.load %arg5[%c0_8, %c0_9] : memref<512x1xf32, #tpu.memory_space<vmem>>, vector<512x1xf32>
    %8 = vector.broadcast %7 : vector<512x1xf32> to vector<512x256xf32>
    %9 = arith.addf %6, %8 : vector<512x256xf32>
    %cst_10 = arith.constant 0.000000e+00 : f32
    %10 = vector.broadcast %cst_10 : f32 to vector<512x256xf32>
    %11 = arith.cmpf ogt, %9, %10 : vector<512x256xf32>
    %cst_11 = arith.constant 2.000000e-01 : f32
    %12 = vector.broadcast %cst_11 : f32 to vector<512x256xf32>
    %13 = arith.mulf %12, %9 : vector<512x256xf32>
    %14 = arith.select %11, %9, %13 : vector<512x256xi1>, vector<512x256xf32>
    %c0_12 = arith.constant 0 : index
    %c0_13 = arith.constant 0 : index
    %15 = vector.load %arg6[%c0_12, %c0_13] : memref<512x512xbf16, #tpu.memory_space<vmem>>, vector<512x512xbf16>
    %16 = arith.truncf %14 : vector<512x256xf32> to vector<512x256xbf16>
    %cst_14 = arith.constant dense<0.000000e+00> : vector<512x256xf32>
    %17 = tpu.matmul %15, %16, %cst_14 {dimension_numbers = #tpu.dot_dimension_numbers<[1], [0], [0], [1], [0, 0, 1, 1], [], []>} : vector<512x512xbf16>, vector<512x256xbf16>, vector<512x256xf32> -> vector<512x256xf32>
    %c0_15 = arith.constant 0 : index
    %c0_16 = arith.constant 0 : index
    %18 = vector.load %arg7[%c0_15, %c0_16] : memref<512x1xf32, #tpu.memory_space<vmem>>, vector<512x1xf32>
    %19 = vector.broadcast %18 : vector<512x1xf32> to vector<512x256xf32>
    %20 = arith.addf %17, %19 : vector<512x256xf32>
    %cst_17 = arith.constant 0.000000e+00 : f32
    %21 = vector.broadcast %cst_17 : f32 to vector<512x256xf32>
    %22 = arith.cmpf ogt, %20, %21 : vector<512x256xf32>
    %cst_18 = arith.constant 2.000000e-01 : f32
    %23 = vector.broadcast %cst_18 : f32 to vector<512x256xf32>
    %24 = arith.mulf %23, %20 : vector<512x256xf32>
    %25 = arith.select %22, %20, %24 : vector<512x256xi1>, vector<512x256xf32>
    %c0_19 = arith.constant 0 : index
    %c0_20 = arith.constant 0 : index
    %26 = vector.load %arg8[%c0_19, %c0_20] : memref<512x1xf32, #tpu.memory_space<vmem>>, vector<512x1xf32>
    %27 = vector.broadcast %26 : vector<512x1xf32> to vector<512x256xf32>
    %28 = arith.mulf %25, %27 : vector<512x256xf32>
    %cst_21 = arith.constant dense<0.000000e+00> : vector<256xf32>
    %29 = vector.multi_reduction <add>, %28, %cst_21 [0] : vector<512x256xf32> to vector<256xf32>
    %30 = vector.shape_cast %29 : vector<256xf32> to vector<1x256xf32>
    %c0_22 = arith.constant 0 : index
    %c0_23 = arith.constant 0 : index
    %31 = vector.load %arg9[%c0_22, %c0_23] : memref<1x1xf32, #tpu.memory_space<vmem>>, vector<1x1xf32>
    %32 = vector.broadcast %31 : vector<1x1xf32> to vector<1x256xf32>
    %33 = arith.addf %30, %32 : vector<1x256xf32>
    %c0_24 = arith.constant 0 : index
    %c0_25 = arith.constant 0 : index
    %34 = vector.load %arg10[%c0_24, %c0_25] : memref<1x256xf32, #tpu.memory_space<vmem>>, vector<1x256xf32>
    tpu.vector_store %arg10[%c0_24, %c0_25], %33 {strides = array<i32>} : memref<1x256xf32, #tpu.memory_space<vmem>>, vector<1x256xf32>,
    return
  }
  func.func @transform_0(%arg0: i32) -> (i32, i32) {
    %c0_i32 = arith.constant 0 : i32
    %c0_i32_0 = arith.constant 0 : i32
    return %c0_i32, %arg0 : i32, i32
  }
  func.func @transform_1(%arg0: i32) -> (i32, i32) {
    %c0_i32 = arith.constant 0 : i32
    %c0_i32_0 = arith.constant 0 : i32
    return %c0_i32, %arg0 : i32, i32
  }
  func.func @transform_2(%arg0: i32) -> (i32, i32) {
    %c0_i32 = arith.constant 0 : i32
    %c0_i32_0 = arith.constant 0 : i32
    %c0_i32_1 = arith.constant 0 : i32
    return %c0_i32, %c0_i32_0 : i32, i32
  }
  func.func @transform_3(%arg0: i32) -> (i32, i32) {
    %c0_i32 = arith.constant 0 : i32
    %c0_i32_0 = arith.constant 0 : i32
    %c0_i32_1 = arith.constant 0 : i32
    return %c0_i32, %c0_i32_0 : i32, i32
  }
  func.func @transform_4(%arg0: i32) -> (i32, i32) {
    %c0_i32 = arith.constant 0 : i32
    %c0_i32_0 = arith.constant 0 : i32
    %c0_i32_1 = arith.constant 0 : i32
    return %c0_i32, %c0_i32_0 : i32, i32
  }
  func.func @transform_5(%arg0: i32) -> (i32, i32) {
    %c0_i32 = arith.constant 0 : i32
    %c0_i32_0 = arith.constant 0 : i32
    %c0_i32_1 = arith.constant 0 : i32
    return %c0_i32, %c0_i32_0 : i32, i32
  }
  func.func @transform_6(%arg0: i32) -> (i32, i32) {
    %c0_i32 = arith.constant 0 : i32
    %c0_i32_0 = arith.constant 0 : i32
    %c0_i32_1 = arith.constant 0 : i32
    return %c0_i32, %c0_i32_0 : i32, i32
  }
  func.func @transform_7(%arg0: i32) -> (i32, i32) {
    %c0_i32 = arith.constant 0 : i32
    %c0_i32_0 = arith.constant 0 : i32
    %c0_i32_1 = arith.constant 0 : i32
    return %c0_i32, %c0_i32_0 : i32, i32
  }
  func.func @transform_8(%arg0: i32) -> (i32, i32) {
    %c0_i32 = arith.constant 0 : i32
    %c0_i32_0 = arith.constant 0 : i32
    %c0_i32_1 = arith.constant 0 : i32
    return %c0_i32, %c0_i32_0 : i32, i32
  }
  func.func @transform_9(%arg0: i32) -> (i32, i32) {
    %c0_i32 = arith.constant 0 : i32
    %c0_i32_0 = arith.constant 0 : i32
    return %c0_i32, %arg0 : i32, i32
  }
}

</mosaic_0001>

<bundles_post_ra>
// kernel: tpu_custom_call.1
= control target key start
LH: loop header
LB: loop body
LE: loop exit
PB: predicated region body
PF: predicated region fallthrough
CT: control target
= control target key end

     0   :  { %s8866_s0 = inlined_call_operand.vmem [shape: bf16[16,512], index: 0, kind: input, shape index: {}]   ;;  %s8867_s1 = inlined_call_operand.vmem [shape: bf16[16,512], index: 1, kind: input, shape index: {}]   ;;  %s8868_s2 = inlined_call_operand.vmem [shape: bf16[512,16], index: 2, kind: input, shape index: {}]   ;;  %s8869_s3 = inlined_call_operand.vmem [shape: bf16[512,16], index: 3, kind: input, shape index: {}]   ;;  %s8870_s4 = inlined_call_operand.vmem [shape: f32[512,1], index: 4, kind: input, shape index: {}]   ;;  %s8871_s5 = inlined_call_operand.vmem [shape: bf16[512,512], index: 5, kind: input, shape index: {}]   ;;  %s8872_s6 = inlined_call_operand.vmem [shape: f32[512,1], index: 6, kind: input, shape index: {}]   ;;  %s8873_s7 = inlined_call_operand.vmem [shape: f32[512,1], index: 7, kind: input, shape index: {}]   ;;  %s8874_s8 = inlined_call_operand.<no memory space> [shape: f32[1,1], index: 8, kind: input, shape index: {}]   ;;  %s8875_s9 = inlined_call_operand.hbm [shape: f32[1,512], index: 9, kind: output, shape index: {}]  }
   0x1   :  { %v14_v0 = vstv %s8874_s8 }
   0x2   :  { %15 = vst [vmem:[#allocation2] sm:$0x1] %v14_v0 }
   0x3   :  { %16 = vsyncpa [#allocation6], 0 }
   0x4   :  { %18 = vsyncpa [#allocation6 + $0x1], 0  ;;  %s6913_s11 = smov 0   ;;  %s6915_s12 = smov 0  }
   0x5   :  { %s6917_s13 = smov 0   ;;  %s6919_s14 = smov 0  }
   0x6 LB: > { %s5790_s8 = sadd.s32 4294967295, %s6855_s14   ;;  %s5791_s15 = sadd.s32 4294967294, %s6855_s14   ;;  %s6855_s14 = sphi %s6919_s14, %s9035_s14   ;;  %s6851_s13 = sphi %s6917_s13, %s9034_s13   ;;  %s6847_s12 = sphi %s6915_s12, %s9033_s12   ;;  %s6843_s11 = sphi %s6913_s11, %s9032_s11  }
   0x7   : > { %s6936_s16 = sadd.s32 1, %s6855_s14   ;;  %s31_s17 = sadd.s32 1, %s6851_s13 }
   0x8   : > { %s28_s18 = ssub.s32 %s6855_s14, %s6936_s16  ;;  %p38_p0 = scmp.ne.s32.totalorder %s6851_s13, %s6847_s12 }
   0x9   : > { %p29_p1 = scmp.eq.s32.totalorder %s28_s18, 0  ;;  %p39_p2 = scmp.eq.s32.totalorder %s6855_s14, 0 }
   0xa   : > { %p241_p3 = scmp.eq.s32.totalorder %s5790_s8, 1  ;;  %p246_p4 = scmp.ne.s32.totalorder %s6847_s12, %s6843_s11 }
   0xb   : > { %s6949_s19 = scalar_select %p29_p1, %s6851_s13, %s31_s17  }
   0xc   : > { %p6951_p5 = por %p39_p2, %p38_p0  ;;  %p6955_p6 = por %p241_p3, %p38_p0 }
   0xd   : > { %p247_p7 = scmp.eq.s32.totalorder %s5791_s15, 1  ;;  %p5793_p9 = scmp.ge.s32.totalorder %s6855_s14, 2 }
   0xf   : > { %p6959_p8 = por %p247_p7, %p246_p4  ;;  %284 = sbr.rel (%p5793_p9) target bundleno = 36 (0x24), region = 44 }
  0x16   : > { %287 = sbr.rel (!%p6951_p5) target bundleno = 29 (0x1d), region = 48  ;;  %s289_s23 = sand.u32 (%p6951_p5), 1, %s6851_s13  }
  0x17   : > { %s6069_s24 = sshll.u32 (%p6951_p5), %s6855_s14, 3  ;;  %s5794_s25 = sshll.u32 (%p6951_p5), %s289_s23, 4 }
  0x18   : > { %s294_s28 = scalar_lea.vmem (%p6951_p5), %s8866_s0, %s6069_s24  ;;  %s291_s29 = scalar_lea.vmem (%p6951_p5), [#allocation3], %s5794_s25 }
  0x19   : > { %v324_v1 = vld [vmem:[%s294_s28] sm:$0xff] (%p6951_p5)  ;;  %v326_v2 = vld [vmem:[%s294_s28 + $0x10] sm:$0xff] (%p6951_p5) }
  0x1a   : > { %325 = vst [vmem:[%s291_s29] sm:$0xff] (%p6951_p5), %v324_v1  ;;  %327 = vst [vmem:[%s291_s29 + $0x8] sm:$0xff] (%p6951_p5), %v326_v2 }
  0x1d PF: > { %333 = sbr.rel (!%p6951_p5) target bundleno = 36 (0x24), region = 86  ;;  %s335_s30 = sand.u32 (%p6951_p5), 1, %s6851_s13  }
  0x1e   : > { %s6070_s10 = sshll.u32 (%p6951_p5), %s6855_s14, 3  ;;  %s5797_s15 = sshll.u32 (%p6951_p5), %s335_s30, 4 }
  0x1f   : > { %s340_s23 = scalar_lea.vmem (%p6951_p5), %s8867_s1, %s6070_s10  ;;  %s337_s24 = scalar_lea.vmem (%p6951_p5), [#allocation4], %s5797_s15 }
  0x20   : > { %v370_v3 = vld [vmem:[%s340_s23] sm:$0xff] (%p6951_p5)  ;;  %v372_v4 = vld [vmem:[%s340_s23 + $0x10] sm:$0xff] (%p6951_p5) }
  0x21   : > { %371 = vst [vmem:[%s337_s24] sm:$0xff] (%p6951_p5), %v370_v3  ;;  %373 = vst [vmem:[%s337_s24 + $0x8] sm:$0xff] (%p6951_p5), %v372_v4 }
  0x24 PF: > { %p5800_p10 = scmp.ge.s32.totalorder %s6855_s14, 1  ;;  %p378_p11 = scmp.lt.s32.totalorder %s6855_s14, 3 }
  0x26   : > { %p379_p12 = pnand %p5800_p10, %p378_p11 }
  0x28   : > { %382 = sbr.rel (%p379_p12) target bundleno = 1395 (0x573), region = 124 }
  0x2f   : > { %s6983_s20 = sand.u32 1, %s6847_s12   ;;  %v8878_v5 = vmov 0   ;;  %v6534_v8 = vld [vmem:[%s8869_s3] sm:$0xff]   ;;  %vm737_vm0 = vcmask 130048   ;;  %v1807_v12 = vld [vmem:[%s8870_s4 + $0x8] sm:$0xff]  ;;  %v1808_v13 = vld [vmem:[%s8870_s4 + $0x10] sm:$0xff] }
  0x30   : > { %s5801_s25 = sshll.u32 %s6983_s20, 4  ;;  %866 = vmatprep.mubr.bf16.mxu0 %v8878_v5  ;;  %6529 = vset.pattern.permute.xlu0 %v8878_v5  ;;  %v1806_v11 = vld [vmem:[%s8870_s4] sm:$0xff]  ;;  %v1809_v14 = vld [vmem:[%s8870_s4 + $0x18] sm:$0xff]  ;;  %v6538_v16 = vld [vmem:[%s8869_s3 + $0x8] sm:$0xff]   ;;  %s5803_s28 = sshll.u32 %s6983_s20, 1 }
  0x31   : > { %6530 = vset.pattern.permute.xlu1 %v8878_v5  ;;  %s394_s26 = scalar_lea.vmem [#allocation4], %s5801_s25  ;;  %s387_s27 = scalar_lea.vmem [#allocation3], %s5801_s25  ;;  %1872 = vperm.xlu0 %6529, %v1806_v11   ;;  %v1810_v15 = vld [vmem:[%s8870_s4 + $0x20] sm:$0xff]  ;;  %v1811_v17 = vld [vmem:[%s8870_s4 + $0x28] sm:$0xff]  ;;  %v1812_v18 = vld [vmem:[%s8870_s4 + $0x30] sm:$0xff] }
  0x32   : > { %v6531_v6 = vld [vmem:[%s394_s26 + $0x4] ss:$8 sps:$4 sm:$0xff]   ;;  %v6533_v7 = vld [vmem:[%s394_s26] ss:$8 sps:$4 sm:$0xff]   ;;  %1882 = vperm.xlu1 %6530, %v1808_v13   ;;  %s6071_s29 = sshll.u32 %s5790_s8, 5  ;;  %s430_s30 = scalar_lea.vmem [#allocation5], %s5803_s28 }
  0x33   : > { %834 = vmatprep.subr.bf16.mxu0 %v6531_v6  ;;  %v6537_v9 = vld [vmem:[%s387_s27 + $0x4] ss:$8 sps:$4 sm:$0xff]   ;;  %v6535_v10 = vld [vmem:[%s387_s27] ss:$8 sps:$4 sm:$0xff]   ;;  %s5708_s10 = sshll.u32 %s430_s30, 4  ;;  %s8822_s18 = scalar_lea.hbm %s8875_s9, %s6071_s29  ;;  %s8824_s10 = int_to_ptr.vmem [resolvable:$true] %s5708_s10 }
  0x34   : > { %835 = vmatpush1.bf16.msra.mxu0 %v6533_v7  ;;  %v1813_v19 = vld [vmem:[%s8870_s4 + $0x38] sm:$0xff]  ;;  %v1814_v20 = vld [vmem:[%s8870_s4 + $0x40] sm:$0xff]  ;;  %v6539_v21 = vld [vmem:[%s8869_s3 + $0x10] sm:$0xff]   ;;  %s5694_s23 = scalar_lea.sflag [#allocation6], %s6983_s20  ;;  %s6793_s24 = scalar_lea.vmem %s8824_s10, 32 }
  0x35   : > { %1453 = vmatprep.subr.bf16.mxu0 %v6537_v9  ;;  %1877 = vperm.xlu0 %6529, %v1807_v12   ;;  %v1815_v22 = vld [vmem:[%s8870_s4 + $0x48] sm:$0xff]  ;;  %v1816_v23 = vld [vmem:[%s8870_s4 + $0x50] sm:$0xff]  ;;  %v1817_v24 = vld [vmem:[%s8870_s4 + $0x58] sm:$0xff]  ;;  %p6794_p13 = scmp.ne.s32.totalorder %s8824_s10, %s6793_s24  ;;  %s6859_s8 = smov [#allocation5]  }
  0x36   : > { %1887 = vperm.xlu1 %6530, %v1809_v14   ;;  %v1818_v25 = vld [vmem:[%s8870_s4 + $0x60] sm:$0xff]  ;;  %v6540_v26 = vld [vmem:[%s8869_s3 + $0x18] sm:$0xff]   ;;  %v1819_v27 = vld [vmem:[%s8870_s4 + $0x68] sm:$0xff]  ;;  %s6797_s25 = sshll.u32 %s6859_s8, 4  ;;  %s6798_s25 = int_to_ptr.vmem [resolvable:$false] %s6797_s25 }
  0x37   : > { %5838 = vmatmul.mubr.msk.bf16.vlgmr.msra.gmra.mrb[0].mxu0 %vm737_vm0, %v6534_v8  ;;  %v1820_v28 = vld [vmem:[%s8870_s4 + $0x70] sm:$0xff]  ;;  %v1821_v29 = vld [vmem:[%s8870_s4 + $0x78] sm:$0xff]  ;;  %v1822_v30 = vld [vmem:[%s8870_s4 + $0x80] sm:$0xff]  ;;  %p6795_p0 = pnand %p6794_p13, %p6955_p6  ;;  %s6799_s26 = scalar_lea.vmem %s6798_s25, 64 }
  0x38   : > { %1454 = vmatpush1.bf16.msra.mxu0 %v6535_v10  ;;  %876 = vmatprep.mubr.bf16.mxu0 %v8878_v5  ;;  %v6541_v31 = vld [vmem:[%s8869_s3 + $0x20] sm:$0xff]   ;;  %v1823_v32 = vld [vmem:[%s8870_s4 + $0x88] sm:$0xff]  ;;  %v1824_v33 = vld [vmem:[%s8870_s4 + $0x90] sm:$0xff]  ;;  %p6800_p2 = scmp.lt.s32.totalorder %s8824_s10, %s6798_s25  ;;  %p6801_p3 = scmp.lt.s32.totalorder %s6799_s26, %s6793_s24 }
  0x39   : > { %1892 = vperm.xlu0 %6529, %v1810_v15   ;;  %v1825_v34 = vld [vmem:[%s8870_s4 + $0x98] sm:$0xff]  ;;  %v1826_v35 = vld [vmem:[%s8870_s4 + $0xa0] sm:$0xff]  ;;  %v6542_v36 = vld [vmem:[%s8869_s3 + $0x28] sm:$0xff]   ;;  %p6796_p1 = pneg %p6795_p0 }
  0x3a   : > { %1897 = vperm.xlu1 %6530, %v1811_v17   ;;  %v1827_v37 = vld [vmem:[%s8870_s4 + $0xa8] sm:$0xff]  ;;  %v1828_v38 = vld [vmem:[%s8870_s4 + $0xb0] sm:$0xff]  ;;  %v1829_v39 = vld [vmem:[%s8870_s4 + $0xb8] sm:$0xff]  ;;  %p6802_p4 = por %p6801_p3, %p6800_p2 }
  0x3b   : > { %v6543_v40 = vld [vmem:[%s8869_s3 + $0x30] sm:$0xff]   ;;  %v1830_v41 = vld [vmem:[%s8870_s4 + $0xc0] sm:$0xff]  ;;  %v1831_v42 = vld [vmem:[%s8870_s4 + $0xc8] sm:$0xff] }
  0x3c   : > { %v1832_v43 = vld [vmem:[%s8870_s4 + $0xd0] sm:$0xff]  ;;  %v1834_v44 = vld [vmem:[%s8870_s4 + $0xe0] sm:$0xff]  ;;  %v1833_v45 = vld [vmem:[%s8870_s4 + $0xd8] sm:$0xff]  ;;  %p6803_p5 = pnand %p6802_p4, %p6796_p1 }
  0x3d   : > { %1902 = vperm.xlu0 %6529, %v1812_v18   ;;  %v6544_v46 = vld [vmem:[%s8869_s3 + $0x38] sm:$0xff]   ;;  %v1835_v47 = vld [vmem:[%s8870_s4 + $0xe8] sm:$0xff]  ;;  %v1836_v48 = vld [vmem:[%s8870_s4 + $0xf0] sm:$0xff] }
  0x3e   : > { %1907 = vperm.xlu1 %6530, %v1813_v19   ;;  %v1838_v49 = vld [vmem:[%s8870_s4 + $0x100] sm:$0xff]  ;;  %v1837_v50 = vld [vmem:[%s8870_s4 + $0xf8] sm:$0xff]  ;;  %v1839_v52 = vld [vmem:[%s8870_s4 + $0x108] sm:$0xff] }
  0x3f   : > { %5839 = vmatmul.mubr.msk.bf16.gmra.mrb[4].mxu0 %vm737_vm0, %v6538_v16  ;;  %v6545_v51 = vld [vmem:[%s8869_s3 + $0x40] sm:$0xff]   ;;  %v1840_v53 = vld [vmem:[%s8870_s4 + $0x110] sm:$0xff]  ;;  %v1841_v55 = vld [vmem:[%s8870_s4 + $0x118] sm:$0xff] }
  0x40   : > { %886 = vmatprep.mubr.bf16.mxu0 %v8878_v5  ;;  %v1842_v54 = vld [vmem:[%s8870_s4 + $0x120] sm:$0xff]  ;;  %v6546_v56 = vld [vmem:[%s8869_s3 + $0x48] sm:$0xff]   ;;  %v1844_v58 = vld [vmem:[%s8870_s4 + $0x130] sm:$0xff] }
  0x41   : > { %1912 = vperm.xlu0 %6529, %v1814_v20   ;;  %v1843_v57 = vld [vmem:[%s8870_s4 + $0x128] sm:$0xff]  ;;  %v1846_v59 = vld [vmem:[%s8870_s4 + $0x140] sm:$0xff]  ;;  %v1845_v60 = vld [vmem:[%s8870_s4 + $0x138] sm:$0xff] }
  0x42   : > { %1917 = vperm.xlu1 %6530, %v1815_v22   ;;  %v6547_v61 = vld [vmem:[%s8869_s3 + $0x50] sm:$0xff]   ;;  %v1847_v62 = vld [vmem:[%s8870_s4 + $0x148] sm:$0xff]  ;;  %v1850_v0 = vld [vmem:[%s8870_s4 + $0x160] sm:$0xff] }
  0x43   : > { %v1848_v63 = vld [vmem:[%s8870_s4 + $0x150] sm:$0xff]  ;;  %v1849_v1 = vld [vmem:[%s8870_s4 + $0x158] sm:$0xff]  ;;  %v1851_v3 = vld [vmem:[%s8870_s4 + $0x168] sm:$0xff] }
  0x44   : > { %v6548_v2 = vld [vmem:[%s8869_s3 + $0x58] sm:$0xff]   ;;  %v1852_v4 = vld [vmem:[%s8870_s4 + $0x170] sm:$0xff]  ;;  %v1854_v6 = vld [vmem:[%s8870_s4 + $0x180] sm:$0xff] }
  0x45   : > { %1922 = vperm.xlu0 %6529, %v1816_v23   ;;  %v1853_v7 = vld [vmem:[%s8870_s4 + $0x178] sm:$0xff]  ;;  %v6549_v8 = vld [vmem:[%s8869_s3 + $0x60] sm:$0xff]   ;;  %v1855_v9 = vld [vmem:[%s8870_s4 + $0x188] sm:$0xff] }
  0x46   : > { %1927 = vperm.xlu1 %6530, %v1817_v24   ;;  %v1856_v10 = vld [vmem:[%s8870_s4 + $0x190] sm:$0xff]  ;;  %v1858_v11 = vld [vmem:[%s8870_s4 + $0x1a0] sm:$0xff]  ;;  %v1857_v12 = vld [vmem:[%s8870_s4 + $0x198] sm:$0xff] }
  0x47   : > { %5840 = vmatmul.mubr.msk.bf16.gmra.mrb[8].mxu0 %vm737_vm0, %v6539_v21  ;;  %v6550_v13 = vld [vmem:[%s8869_s3 + $0x68] sm:$0xff]   ;;  %v1860_v15 = vld [vmem:[%s8870_s4 + $0x1b0] sm:$0xff]  ;;  %v1862_v16 = vld [vmem:[%s8870_s4 + $0x1c0] sm:$0xff] }
  0x48   : > { %896 = vmatprep.mubr.bf16.mxu0 %v8878_v5  ;;  %v1859_v14 = vld [vmem:[%s8870_s4 + $0x1a8] sm:$0xff]  ;;  %v1861_v17 = vld [vmem:[%s8870_s4 + $0x1b8] sm:$0xff]  ;;  %v6551_v18 = vld [vmem:[%s8869_s3 + $0x70] sm:$0xff]  }
  0x49   : > { %1932 = vperm.xlu0 %6529, %v1818_v25   ;;  %v1863_v19 = vld [vmem:[%s8870_s4 + $0x1c8] sm:$0xff]  ;;  %v1864_v20 = vld [vmem:[%s8870_s4 + $0x1d0] sm:$0xff]  ;;  %v1866_v21 = vld [vmem:[%s8870_s4 + $0x1e0] sm:$0xff] }
  0x4a   : > { %1937 = vperm.xlu1 %6530, %v1819_v27   ;;  %v1865_v22 = vld [vmem:[%s8870_s4 + $0x1d8] sm:$0xff]  ;;  %v1867_v24 = vld [vmem:[%s8870_s4 + $0x1e8] sm:$0xff]  ;;  %v1868_v25 = vld [vmem:[%s8870_s4 + $0x1f0] sm:$0xff] }
  0x4b   : > { %v6552_v23 = vld [vmem:[%s8869_s3 + $0x78] sm:$0xff]  }
  0x4c   : > { %v1869_v27 = vld [vmem:[%s8870_s4 + $0x1f8] sm:$0xff] }
  0x4d   : > { %1942 = vperm.xlu0 %6529, %v1820_v28   ;;  %v6553_v28 = vld [vmem:[%s8869_s3 + $0x80] sm:$0xff]  }
  0x4e   : > { %1947 = vperm.xlu1 %6530, %v1821_v29   ;;  %v2895_v29 = vld [vmem:[%s8872_s6 + $0x8] sm:$0xff] }
  0x4f   : > { %5841 = vmatmul.mubr.msk.bf16.gmra.mrb[12].mxu0 %vm737_vm0, %v6540_v26  ;;  %v2894_v26 = vld [vmem:[%s8872_s6] sm:$0xff] }
  0x50   : > { %906 = vmatprep.mubr.bf16.mxu0 %v8878_v5 }
  0x51   : > { %1952 = vperm.xlu0 %6529, %v1822_v30  }
  0x52   : > { %1957 = vperm.xlu1 %6530, %v1823_v32  }
  0x55   : > { %1962 = vperm.xlu0 %6529, %v1824_v33  }
  0x56   : > { %1967 = vperm.xlu1 %6530, %v1825_v34   ;;  %v2897_v34 = vld [vmem:[%s8872_s6 + $0x18] sm:$0xff] }
  0x57   : > { %5842 = vmatmul.mubr.msk.bf16.gmra.mrb[16].mxu0 %vm737_vm0, %v6541_v31  ;;  %v2896_v31 = vld [vmem:[%s8872_s6 + $0x10] sm:$0xff] }
  0x58   : > { %916 = vmatprep.mubr.bf16.mxu0 %v8878_v5 }
  0x59   : > { %1972 = vperm.xlu0 %6529, %v1826_v35   ;;  %v2898_v35 = vld [vmem:[%s8872_s6 + $0x20] sm:$0xff] }
  0x5a   : > { %1977 = vperm.xlu1 %6530, %v1827_v37   ;;  %v6554_v37 = vld [vmem:[%s8869_s3 + $0x88] sm:$0xff]  }
  0x5d   : > { %1982 = vperm.xlu0 %6529, %v1828_v38  }
  0x5e   : > { %1987 = vperm.xlu1 %6530, %v1829_v39   ;;  %v2899_v39 = vld [vmem:[%s8872_s6 + $0x28] sm:$0xff] }
  0x5f   : > { %5843 = vmatmul.mubr.msk.bf16.gmra.mrb[20].mxu0 %vm737_vm0, %v6542_v36 }
  0x60   : > { %926 = vmatprep.mubr.bf16.mxu0 %v8878_v5 }
  0x61   : > { %1992 = vperm.xlu0 %6529, %v1830_v41  }
  0x62   : > { %1997 = vperm.xlu1 %6530, %v1831_v42  }
  0x65   : > { %2002 = vperm.xlu0 %6529, %v1832_v43   ;;  %v2901_v43 = vld [vmem:[%s8872_s6 + $0x38] sm:$0xff] }
  0x66   : > { %2007 = vperm.xlu1 %6530, %v1833_v45  }
  0x67   : > { %5844 = vmatmul.mubr.msk.bf16.gmra.mrb[24].mxu0 %vm737_vm0, %v6543_v40  ;;  %v2900_v40 = vld [vmem:[%s8872_s6 + $0x30] sm:$0xff] }
  0x68   : > { %936 = vmatprep.mubr.bf16.mxu0 %v8878_v5 }
  0x69   : > { %2012 = vperm.xlu0 %6529, %v1834_v44   ;;  %v2902_v44 = vld [vmem:[%s8872_s6 + $0x40] sm:$0xff] }
  0x6a   : > { %2017 = vperm.xlu1 %6530, %v1835_v47  }
  0x6d   : > { %2022 = vperm.xlu0 %6529, %v1836_v48   ;;  %v2903_v48 = vld [vmem:[%s8872_s6 + $0x48] sm:$0xff] }
  0x6e   : > { %2027 = vperm.xlu1 %6530, %v1837_v50  }
  0x6f   : > { %5845 = vmatmul.mubr.msk.bf16.gmra.mrb[28].mxu0 %vm737_vm0, %v6544_v46  ;;  %v6555_v46 = vld [vmem:[%s8869_s3 + $0x90] sm:$0xff]  }
  0x70   : > { %946 = vmatprep.mubr.bf16.mxu0 %v8878_v5 }
  0x71   : > { %2032 = vperm.xlu0 %6529, %v1838_v49   ;;  %v2904_v49 = vld [vmem:[%s8872_s6 + $0x50] sm:$0xff] }
  0x72   : > { %2037 = vperm.xlu1 %6530, %v1839_v52   ;;  %v2905_v52 = vld [vmem:[%s8872_s6 + $0x58] sm:$0xff] }
  0x75   : > { %2042 = vperm.xlu0 %6529, %v1840_v53   ;;  %v2906_v53 = vld [vmem:[%s8872_s6 + $0x60] sm:$0xff] }
  0x76   : > { %2047 = vperm.xlu1 %6530, %v1841_v55   ;;  %v6556_v55 = vld [vmem:[%s8869_s3 + $0x98] sm:$0xff]  }
  0x77   : > { %5846 = vmatmul.mubr.msk.bf16.gmra.mrb[32].mxu0 %vm737_vm0, %v6545_v51 }
  0x78   : > { %956 = vmatprep.mubr.bf16.mxu0 %v8878_v5 }
  0x79   : > { %2052 = vperm.xlu0 %6529, %v1842_v54  }
  0x7a   : > { %2057 = vperm.xlu1 %6530, %v1843_v57   ;;  %v2907_v57 = vld [vmem:[%s8872_s6 + $0x68] sm:$0xff] }
  0x7d   : > { %2062 = vperm.xlu0 %6529, %v1844_v58   ;;  %v2908_v58 = vld [vmem:[%s8872_s6 + $0x70] sm:$0xff] }
  0x7e   : > { %2067 = vperm.xlu1 %6530, %v1845_v60  }
  0x7f   : > { %5847 = vmatmul.mubr.msk.bf16.gmra.mrb[36].mxu0 %vm737_vm0, %v6546_v56 }
  0x80   : > { %966 = vmatprep.mubr.bf16.mxu0 %v8878_v5 }
  0x81   : > { %2072 = vperm.xlu0 %6529, %v1846_v59  }
  0x82   : > { %2077 = vperm.xlu1 %6530, %v1847_v62   ;;  %v2910_v62 = vld [vmem:[%s8872_s6 + $0x80] sm:$0xff] }
  0x85   : > { %2082 = vperm.xlu0 %6529, %v1848_v63  }
  0x86   : > { %2087 = vperm.xlu1 %6530, %v1849_v1  }
  0x87   : > { %5848 = vmatmul.mubr.msk.bf16.gmra.mrb[40].mxu0 %vm737_vm0, %v6547_v61  ;;  %v2909_v61 = vld [vmem:[%s8872_s6 + $0x78] sm:$0xff] }
  0x88   : > { %976 = vmatprep.mubr.bf16.mxu0 %v8878_v5 }
  0x89   : > { %2092 = vperm.xlu0 %6529, %v1850_v0   ;;  %v6557_v0 = vld [vmem:[%s8869_s3 + $0xa0] sm:$0xff]  }
  0x8a   : > { %2097 = vperm.xlu1 %6530, %v1851_v3   ;;  %v2912_v3 = vld [vmem:[%s8872_s6 + $0x90] sm:$0xff] }
  0x8d   : > { %2102 = vperm.xlu0 %6529, %v1852_v4  }
  0x8e   : > { %2107 = vperm.xlu1 %6530, %v1853_v7   ;;  %v2913_v7 = vld [vmem:[%s8872_s6 + $0x98] sm:$0xff] }
  0x8f   : > { %5849 = vmatmul.mubr.msk.bf16.gmra.mrb[44].mxu0 %vm737_vm0, %v6548_v2  ;;  %v2911_v2 = vld [vmem:[%s8872_s6 + $0x88] sm:$0xff] }
  0x90   : > { %986 = vmatprep.mubr.bf16.mxu0 %v8878_v5 }
  0x91   : > { %2112 = vperm.xlu0 %6529, %v1854_v6  }
  0x92   : > { %2117 = vperm.xlu1 %6530, %v1855_v9  }
  0x95   : > { %2122 = vperm.xlu0 %6529, %v1856_v10   ;;  %v6558_v10 = vld [vmem:[%s8869_s3 + $0xa8] sm:$0xff]  }
  0x96   : > { %2127 = vperm.xlu1 %6530, %v1857_v12   ;;  %v2915_v12 = vld [vmem:[%s8872_s6 + $0xa8] sm:$0xff] }
  0x97   : > { %5850 = vmatmul.mubr.msk.bf16.gmra.mrb[48].mxu0 %vm737_vm0, %v6549_v8  ;;  %v2914_v8 = vld [vmem:[%s8872_s6 + $0xa0] sm:$0xff] }
  0x98   : > { %996 = vmatprep.mubr.bf16.mxu0 %v8878_v5 }
  0x99   : > { %2132 = vperm.xlu0 %6529, %v1858_v11  }
  0x9a   : > { %2137 = vperm.xlu1 %6530, %v1859_v14  }
  0x9d   : > { %2142 = vperm.xlu0 %6529, %v1860_v15  }
  0x9e   : > { %2147 = vperm.xlu1 %6530, %v1861_v17   ;;  %v2918_v17 = vld [vmem:[%s8872_s6 + $0xc0] sm:$0xff] }
  0x9f   : > { %5851 = vmatmul.mubr.msk.bf16.gmra.mrb[52].mxu0 %vm737_vm0, %v6550_v13  ;;  %v2916_v13 = vld [vmem:[%s8872_s6 + $0xb0] sm:$0xff] }
  0xa0   : > { %1006 = vmatprep.mubr.bf16.mxu0 %v8878_v5 }
  0xa1   : > { %2152 = vperm.xlu0 %6529, %v1862_v16   ;;  %v2917_v16 = vld [vmem:[%s8872_s6 + $0xb8] sm:$0xff] }
  0xa2   : > { %2157 = vperm.xlu1 %6530, %v1863_v19   ;;  %v6559_v19 = vld [vmem:[%s8869_s3 + $0xb0] sm:$0xff]  }
  0xa5   : > { %2162 = vperm.xlu0 %6529, %v1864_v20  }
  0xa6   : > { %2167 = vperm.xlu1 %6530, %v1865_v22   ;;  %v2920_v22 = vld [vmem:[%s8872_s6 + $0xd0] sm:$0xff] }
  0xa7   : > { %5852 = vmatmul.mubr.msk.bf16.gmra.mrb[56].mxu0 %vm737_vm0, %v6551_v18 }
  0xa8   : > { %1016 = vmatprep.mubr.bf16.mxu0 %v8878_v5 }
  0xa9   : > { %2172 = vperm.xlu0 %6529, %v1866_v21   ;;  %v2919_v21 = vld [vmem:[%s8872_s6 + $0xc8] sm:$0xff] }
  0xaa   : > { %2177 = vperm.xlu1 %6530, %v1867_v24   ;;  %v2921_v24 = vld [vmem:[%s8872_s6 + $0xd8] sm:$0xff] }
  0xad   : > { %2182 = vperm.xlu0 %6529, %v1868_v25  }
  0xae   : > { %2187 = vperm.xlu1 %6530, %v1869_v27   ;;  %v6560_v27 = vld [vmem:[%s8869_s3 + $0xb8] sm:$0xff]  }
  0xaf   : > { %5853 = vmatmul.mubr.msk.bf16.gmra.mrb[60].mxu0 %vm737_vm0, %v6552_v23 }
  0xb0   : > { %1026 = vmatprep.mubr.bf16.mxu0 %v8878_v5  ;;  %v7270_v30 = vpop.permute.xlu0 %1872 }
  0xb1   : > { %2960 = vperm.xlu0 %6529, %v2894_v26   ;;  %v7275_v32 = vpop.permute.xlu1 %1882  ;;  %v2922_v26 = vld [vmem:[%s8872_s6 + $0xe0] sm:$0xff] }
  0xb2   : > { %2965 = vperm.xlu1 %6530, %v2895_v29  }
  0xb4   : > { %v7279_v33 = vpop.permute.xlu0 %1877 }
  0xb5   : > { %2970 = vperm.xlu0 %6529, %v2896_v31   ;;  %v7287_v36 = vpop.permute.xlu1 %1887  ;;  %v2924_v31 = vld [vmem:[%s8872_s6 + $0xf0] sm:$0xff] }
  0xb6   : > { %2975 = vperm.xlu1 %6530, %v2897_v34  }
  0xb7   : > { %5854 = vmatmul.mubr.msk.bf16.gmra.mrb[64].mxu0 %vm737_vm0, %v6553_v28  ;;  %v2923_v28 = vld [vmem:[%s8872_s6 + $0xe8] sm:$0xff] }
  0xb8   : > { %1036 = vmatprep.mubr.bf16.mxu0 %v8878_v5  ;;  %v7292_v38 = vpop.permute.xlu0 %1892 }
  0xb9   : > { %2980 = vperm.xlu0 %6529, %v2898_v35   ;;  %v7300_v41 = vpop.permute.xlu1 %1897  ;;  %v2925_v35 = vld [vmem:[%s8872_s6 + $0xf8] sm:$0xff] }
  0xba   : > { %2985 = vperm.xlu1 %6530, %v2899_v39   ;;  %v6561_v39 = vld [vmem:[%s8869_s3 + $0xc0] sm:$0xff]  }
  0xbc   : > { %v7304_v42 = vpop.permute.xlu0 %1902 }
  0xbd   : > { %2990 = vperm.xlu0 %6529, %v2900_v40   ;;  %v7312_v45 = vpop.permute.xlu1 %1907 }
  0xbe   : > { %2995 = vperm.xlu1 %6530, %v2901_v43   ;;  %v2927_v43 = vld [vmem:[%s8872_s6 + $0x108] sm:$0xff] }
  0xbf   : > { %5855 = vmatmul.mubr.msk.bf16.gmra.mrb[68].mxu0 %vm737_vm0, %v6554_v37  ;;  %v2926_v37 = vld [vmem:[%s8872_s6 + $0x100] sm:$0xff] }
  0xc0   : > { %1046 = vmatprep.mubr.bf16.mxu0 %v8878_v5  ;;  %v7317_v47 = vpop.permute.xlu0 %1912 }
  0xc1   : > { %3000 = vperm.xlu0 %6529, %v2902_v44   ;;  %v7325_v50 = vpop.permute.xlu1 %1917 }
  0xc2   : > { %3005 = vperm.xlu1 %6530, %v2903_v48   ;;  %v2929_v48 = vld [vmem:[%s8872_s6 + $0x118] sm:$0xff] }
  0xc4   : > { %v7329_v51 = vpop.permute.xlu0 %1922 }
  0xc5   : > { %3010 = vperm.xlu0 %6529, %v2904_v49   ;;  %v7337_v54 = vpop.permute.xlu1 %1927 }
  0xc6   : > { %3015 = vperm.xlu1 %6530, %v2905_v52   ;;  %v2930_v52 = vld [vmem:[%s8872_s6 + $0x120] sm:$0xff] }
  0xc7   : > { %5856 = vmatmul.mubr.msk.bf16.gmra.mrb[72].mxu0 %vm737_vm0, %v6555_v46  ;;  %v2928_v46 = vld [vmem:[%s8872_s6 + $0x110] sm:$0xff] }
  0xc8   : > { %1056 = vmatprep.mubr.bf16.mxu0 %v8878_v5  ;;  %v7342_v56 = vpop.permute.xlu0 %1932 }
  0xc9   : > { %3020 = vperm.xlu0 %6529, %v2906_v53   ;;  %v7350_v59 = vpop.permute.xlu1 %1937  ;;  %v6562_v53 = vld [vmem:[%s8869_s3 + $0xc8] sm:$0xff]  }
  0xca   : > { %3025 = vperm.xlu1 %6530, %v2907_v57   ;;  %v2931_v57 = vld [vmem:[%s8872_s6 + $0x128] sm:$0xff] }
  0xcc   : > { %v7354_v60 = vpop.permute.xlu0 %1942 }
  0xcd   : > { %3030 = vperm.xlu0 %6529, %v2908_v58   ;;  %v7362_v63 = vpop.permute.xlu1 %1947  ;;  %v2932_v58 = vld [vmem:[%s8872_s6 + $0x130] sm:$0xff] }
  0xce   : > { %3035 = vperm.xlu1 %6530, %v2909_v61  }
  0xcf   : > { %5857 = vmatmul.mubr.msk.bf16.gmra.mrb[76].mxu0 %vm737_vm0, %v6556_v55 }
  0xd0   : > { %1066 = vmatprep.mubr.bf16.mxu0 %v8878_v5  ;;  %v7367_v1 = vpop.permute.xlu0 %1952 }
  0xd1   : > { %3040 = vperm.xlu0 %6529, %v2910_v62   ;;  %v7375_v4 = vpop.permute.xlu1 %1957  ;;  %v2933_v62 = vld [vmem:[%s8872_s6 + $0x138] sm:$0xff] }
  0xd2   : > { %3045 = vperm.xlu1 %6530, %v2911_v2   ;;  %v2934_v2 = vld [vmem:[%s8872_s6 + $0x140] sm:$0xff] }
  0xd4   : > { %v7379_v6 = vpop.permute.xlu0 %1962 }
  0xd5   : > { %3050 = vperm.xlu0 %6529, %v2912_v3   ;;  %v7387_v9 = vpop.permute.xlu1 %1967  ;;  %v6563_v3 = vld [vmem:[%s8869_s3 + $0xd0] sm:$0xff]  }
  0xd6   : > { %3055 = vperm.xlu1 %6530, %v2913_v7   ;;  %v2935_v7 = vld [vmem:[%s8872_s6 + $0x148] sm:$0xff] }
  0xd7   : > { %5858 = vmatmul.mubr.msk.bf16.gmra.mrb[80].mxu0 %vm737_vm0, %v6557_v0 }
  0xd8   : > { %1076 = vmatprep.mubr.bf16.mxu0 %v8878_v5  ;;  %v7392_v11 = vpop.permute.xlu0 %1972 }
  0xd9   : > { %3060 = vperm.xlu0 %6529, %v2914_v8   ;;  %v7400_v14 = vpop.permute.xlu1 %1977 }
  0xda   : > { %3065 = vperm.xlu1 %6530, %v2915_v12  }
  0xdc   : > { %v7404_v15 = vpop.permute.xlu0 %1982 }
  0xdd   : > { %3070 = vperm.xlu0 %6529, %v2916_v13   ;;  %v7412_v18 = vpop.permute.xlu1 %1987  ;;  %v2937_v13 = vld [vmem:[%s8872_s6 + $0x158] sm:$0xff] }
  0xde   : > { %3075 = vperm.xlu1 %6530, %v2917_v16   ;;  %v2938_v16 = vld [vmem:[%s8872_s6 + $0x160] sm:$0xff] }
  0xdf   : > { %5859 = vmatmul.mubr.msk.bf16.gmra.mrb[84].mxu0 %vm737_vm0, %v6558_v10  ;;  %v2936_v10 = vld [vmem:[%s8872_s6 + $0x150] sm:$0xff] }
  0xe0   : > { %1086 = vmatprep.mubr.bf16.mxu0 %v8878_v5  ;;  %v7417_v20 = vpop.permute.xlu0 %1992 }
  0xe1   : > { %3080 = vperm.xlu0 %6529, %v2918_v17   ;;  %v7426_v23 = vpop.permute.xlu1 %1997  ;;  %v6564_v17 = vld [vmem:[%s8869_s3 + $0xd8] sm:$0xff]  }
  0xe2   : > { %3085 = vperm.xlu1 %6530, %v2919_v21   ;;  %v2939_v21 = vld [vmem:[%s8872_s6 + $0x168] sm:$0xff] }
  0xe4   : > { %v7432_v25 = vpop.permute.xlu0 %2002 }
  0xe5   : > { %3090 = vperm.xlu0 %6529, %v2920_v22   ;;  %v7443_v29 = vpop.permute.xlu1 %2007 }
  0xe6   : > { %3095 = vperm.xlu1 %6530, %v2921_v24   ;;  %v2940_v24 = vld [vmem:[%s8872_s6 + $0x170] sm:$0xff] }
  0xe7   : > { %5860 = vmatmul.mubr.msk.bf16.gmra.mrb[88].mxu0 %vm737_vm0, %v6559_v19 }
  0xe8   : > { %1096 = vmatprep.mubr.bf16.mxu0 %v8878_v5  ;;  %v7449_v34 = vpop.permute.xlu0 %2012 }
  0xe9   : > { %3100 = vperm.xlu0 %6529, %v2922_v26   ;;  %v7461_v40 = vpop.permute.xlu1 %2017  ;;  %v2941_v26 = vld [vmem:[%s8872_s6 + $0x178] sm:$0xff] }
  0xea   : > { %3105 = vperm.xlu1 %6530, %v2923_v28   ;;  %v2942_v28 = vld [vmem:[%s8872_s6 + $0x180] sm:$0xff] }
  0xec   : > { %v7466_v44 = vpop.permute.xlu0 %2022 }
  0xed   : > { %3110 = vperm.xlu0 %6529, %v2924_v31   ;;  %v7476_v49 = vpop.permute.xlu1 %2027  ;;  %v6565_v31 = vld [vmem:[%s8869_s3 + $0xe0] sm:$0xff]  }
  0xee   : > { %3115 = vperm.xlu1 %6530, %v2925_v35  }
  0xef   : > { %5861 = vmatmul.mubr.msk.bf16.gmra.mrb[92].mxu0 %vm737_vm0, %v6560_v27 }
  0xf0   : > { %1106 = vmatprep.mubr.bf16.mxu0 %v8878_v5  ;;  %v7484_v55 = vpop.permute.xlu0 %2032 }
  0xf1   : > { %3120 = vperm.xlu0 %6529, %v2926_v37   ;;  %v7493_v61 = vpop.permute.xlu1 %2037  ;;  %v2943_v37 = vld [vmem:[%s8872_s6 + $0x188] sm:$0xff] }
  0xf2   : > { %3125 = vperm.xlu1 %6530, %v2927_v43  }
  0xf4   : > { %v7499_v0 = vpop.permute.xlu0 %2042 }
  0xf5   : > { %3130 = vperm.xlu0 %6529, %v2928_v46   ;;  %v7510_v8 = vpop.permute.xlu1 %2047  ;;  %v2945_v46 = vld [vmem:[%s8872_s6 + $0x198] sm:$0xff] }
  0xf6   : > { %3135 = vperm.xlu1 %6530, %v2929_v48  }
  0xf7   : > { %5862 = vmatmul.mubr.msk.bf16.gmra.mrb[96].mxu0 %vm737_vm0, %v6561_v39  ;;  %v2944_v39 = vld [vmem:[%s8872_s6 + $0x190] sm:$0xff] }
  0xf8   : > { %1116 = vmatprep.mubr.bf16.mxu0 %v8878_v5  ;;  %v7516_v12 = vpop.permute.xlu0 %2052 }
  0xf9   : > { %3140 = vperm.xlu0 %6529, %v2930_v52   ;;  %v7528_v19 = vpop.permute.xlu1 %2057  ;;  %v2946_v52 = vld [vmem:[%s8872_s6 + $0x1a0] sm:$0xff] }
  0xfa   : > { %3145 = vperm.xlu1 %6530, %v2931_v57   ;;  %v2947_v57 = vld [vmem:[%s8872_s6 + $0x1a8] sm:$0xff] }
  0xfc   : > { %v7533_v22 = vpop.permute.xlu0 %2062 }
  0xfd   : > { %3150 = vperm.xlu0 %6529, %v2932_v58   ;;  %v7543_v27 = vpop.permute.xlu1 %2067 }
  0xfe   : > { %3155 = vperm.xlu1 %6530, %v2933_v62   ;;  %v2948_v62 = vld [vmem:[%s8872_s6 + $0x1b0] sm:$0xff] }
  0xff   : > { %5863 = vmatmul.mubr.msk.bf16.gmra.mrb[100].mxu0 %vm737_vm0, %v6562_v53  ;;  %v6566_v53 = vld [vmem:[%s8869_s3 + $0xe8] sm:$0xff]  }
 0x100   : > { %1126 = vmatprep.mubr.bf16.mxu0 %v8878_v5  ;;  %v7551_v35 = vpop.permute.xlu0 %2072 }
 0x101   : > { %3160 = vperm.xlu0 %6529, %v2934_v2   ;;  %v7560_v43 = vpop.permute.xlu1 %2077 }
 0x102   : > { %3165 = vperm.xlu1 %6530, %v2935_v7   ;;  %v2950_v7 = vld [vmem:[%s8872_s6 + $0x1c0] sm:$0xff] }
 0x104   : > { %v7566_v48 = vpop.permute.xlu0 %2082 }
 0x105   : > { %3170 = vperm.xlu0 %6529, %v2936_v10   ;;  %v7577_v58 = vpop.permute.xlu1 %2087  ;;  %v6567_v10 = vld [vmem:[%s8869_s3 + $0xf0] sm:$0xff]  }
 0x106   : > { %3175 = vperm.xlu1 %6530, %v2937_v13  }
 0x107   : > { %5864 = vmatmul.mubr.msk.bf16.gmra.mrb[104].mxu0 %vm737_vm0, %v6563_v3  ;;  %v2949_v3 = vld [vmem:[%s8872_s6 + $0x1b8] sm:$0xff] }
 0x108   : > { %1136 = vmatprep.mubr.bf16.mxu0 %v8878_v5  ;;  %v7583_v2 = vpop.permute.xlu0 %2092 }
 0x109   : > { %3180 = vperm.xlu0 %6529, %v2938_v16   ;;  %v7595_v13 = vpop.permute.xlu1 %2097  ;;  %v2951_v16 = vld [vmem:[%s8872_s6 + $0x1c8] sm:$0xff] }
 0x10a   : > { %3185 = vperm.xlu1 %6530, %v2939_v21   ;;  %8931 = vst [vmem:[#allocation8_spill] sm:$0xff] %v7595_v13  ;;  %v2952_v21 = vld [vmem:[%s8872_s6 + $0x1d0] sm:$0xff] }
 0x10d   : > { %3190 = vperm.xlu0 %6529, %v2940_v24   ;;  %v2953_v24 = vld [vmem:[%s8872_s6 + $0x1d8] sm:$0xff] }
 0x10e   : > { %3195 = vperm.xlu1 %6530, %v2941_v26   ;;  %v7610_v26 = vpop.permute.xlu1 %2107 }
 0x10f   : > { %5865 = vmatmul.mubr.msk.bf16.gmra.mrb[108].mxu0 %vm737_vm0, %v6564_v17  ;;  %v7600_v17 = vpop.permute.xlu0 %2102  ;;  %8933 = vst [vmem:[#allocation10_spill] sm:$0xff] %v7610_v26 }
 0x110   : > { %1146 = vmatprep.mubr.bf16.mxu0 %v8878_v5  ;;  %8932 = vst [vmem:[#allocation9_spill] sm:$0xff] %v7600_v17 }
 0x111   : > { %3200 = vperm.xlu0 %6529, %v2942_v28   ;;  %v2954_v28 = vld [vmem:[%s8872_s6 + $0x1e0] sm:$0xff] }
 0x112   : > { %3205 = vperm.xlu1 %6530, %v2943_v37   ;;  %v6568_v37 = vld [vmem:[%s8869_s3 + $0xf8] sm:$0xff]  }
 0x115   : > { %3210 = vperm.xlu0 %6529, %v2944_v39   ;;  %v2955_v39 = vld [vmem:[%s8872_s6 + $0x1e8] sm:$0xff] }
 0x116   : > { %3215 = vperm.xlu1 %6530, %v2945_v46   ;;  %v2956_v46 = vld [vmem:[%s8872_s6 + $0x1f0] sm:$0xff] }
 0x117   : > { %5866 = vmatmul.mubr.msk.bf16.gmra.mrb[112].mxu0 %vm737_vm0, %v6565_v31  ;;  %v7615_v31 = vpop.permute.xlu0 %2112 }
 0x118   : > { %1156 = vmatprep.mubr.bf16.mxu0 %v8878_v5  ;;  %8934 = vst [vmem:[#allocation11_spill] sm:$0xff] %v7615_v31 }
 0x119   : > { %3220 = vperm.xlu0 %6529, %v2946_v52   ;;  %v7627_v52 = vpop.permute.xlu1 %2117 }
 0x11a   : > { %3225 = vperm.xlu1 %6530, %v2947_v57   ;;  %8935 = vst [vmem:[#allocation12_spill] sm:$0xff] %v7627_v52 }
 0x11b   : > { %v7633_v57 = vpop.permute.xlu0 %2122 }
 0x11c   : > { %8936 = vst [vmem:[#allocation13_spill] sm:$0xff] %v7633_v57 }
 0x11d   : > { %3230 = vperm.xlu0 %6529, %v2948_v62   ;;  %v5008_v62 = vld [vmem:[%s8873_s7] sm:$0xff] }
 0x11e   : > { %3235 = vperm.xlu1 %6530, %v2949_v3   ;;  %v6569_v3 = vld [vmem:[%s8868_s2] sm:$0xff]  }
 0x11f   : > { %5867 = vmatmul.mubr.msk.bf16.gmra.mrb[116].mxu0 %vm737_vm0, %v6566_v53  ;;  %v2957_v53 = vld [vmem:[%s8872_s6 + $0x1f8] sm:$0xff] }
 0x120   : > { %1166 = vmatprep.mubr.bf16.mxu0 %v8878_v5 }
 0x121   : > { %3240 = vperm.xlu0 %6529, %v2950_v7   ;;  %v5009_v7 = vld [vmem:[%s8873_s7 + $0x8] sm:$0xff] }
 0x122   : > { %3245 = vperm.xlu1 %6530, %v2951_v16   ;;  %v5010_v16 = vld [vmem:[%s8873_s7 + $0x10] sm:$0xff] }
 0x125   : > { %3250 = vperm.xlu0 %6529, %v2952_v21   ;;  %v7649_v21 = vpop.permute.xlu0 %2132 }
 0x126   : > { %3255 = vperm.xlu1 %6530, %v2953_v24   ;;  %8938 = vst [vmem:[#allocation15_spill] sm:$0xff] %v7649_v21  ;;  %v5011_v24 = vld [vmem:[%s8873_s7 + $0x18] sm:$0xff] }
 0x127   : > { %5868 = vmatmul.mubr.msk.bf16.gmra.mrb[120].mxu0 %vm737_vm0, %v6567_v10  ;;  %v7644_v10 = vpop.permute.xlu1 %2127 }
 0x128   : > { %1176 = vmatprep.mubr.bf16.mxu0 %v8878_v5  ;;  %8937 = vst [vmem:[#allocation14_spill] sm:$0xff] %v7644_v10 }
 0x129   : > { %3260 = vperm.xlu0 %6529, %v2954_v28   ;;  %v5012_v28 = vld [vmem:[%s8873_s7 + $0x20] sm:$0xff] }
 0x12a   : > { %3265 = vperm.xlu1 %6530, %v2955_v39   ;;  %v6570_v39 = vld [vmem:[%s8868_s2 + $0x8] sm:$0xff]  }
 0x12d   : > { %3270 = vperm.xlu0 %6529, %v2956_v46   ;;  %v5013_v46 = vld [vmem:[%s8873_s7 + $0x28] sm:$0xff] }
 0x12e   : > { %3275 = vperm.xlu1 %6530, %v2957_v53   ;;  %v7667_v53 = vpop.permute.xlu0 %2142 }
 0x12f   : > { %5869 = vmatmul.mubr.msk.bf16.gmra.mrb[124].mxu0 %vm737_vm0, %v6568_v37  ;;  %v7659_v37 = vpop.permute.xlu1 %2137  ;;  %8940 = vst [vmem:[#allocation17_spill] sm:$0xff] %v7667_v53 }
 0x130   : > { %1485 = vmatprep.mubr.bf16.mxu0 %v8878_v5  ;;  %8939 = vst [vmem:[#allocation16_spill] sm:$0xff] %v7659_v37 }
 0x131   : > { %5074 = vperm.xlu0 %6529, %v5008_v62   ;;  %v5014_v62 = vld [vmem:[%s8873_s7 + $0x30] sm:$0xff] }
 0x132   : > { %5079 = vperm.xlu1 %6530, %v5009_v7  }
 0x133   : > { %v7677_v7 = vpop.permute.xlu1 %2147 }
 0x134   : > { %8941 = vst [vmem:[#allocation18_spill] sm:$0xff] %v7677_v7  ;;  %v5658_v7 = vld [vmem:[#allocation2] sm:$0x1] }
 0x135   : > { %5084 = vperm.xlu0 %6529, %v5010_v16   ;;  %v5016_v16 = vld [vmem:[%s8873_s7 + $0x40] sm:$0xff] }
 0x136   : > { %5089 = vperm.xlu1 %6530, %v5011_v24   ;;  %v7682_v24 = vpop.permute.xlu0 %2152 }
 0x137   : > { %5904 = vmatmul.mubr.msk.bf16.vlgmr.msra.gmra.mrb[0].mxu0 %vm737_vm0, %v6569_v3  ;;  %v5015_v3 = vld [vmem:[%s8873_s7 + $0x38] sm:$0xff]  ;;  %8942 = vst [vmem:[#allocation19_spill] sm:$0xff] %v7682_v24 }
 0x138   : > { %1495 = vmatprep.mubr.bf16.mxu0 %v8878_v5 }
 0x139   : > { %5094 = vperm.xlu0 %6529, %v5012_v28   ;;  %v6571_v28 = vld [vmem:[%s8868_s2 + $0x10] sm:$0xff]  }
 0x13a   : > { %5099 = vperm.xlu1 %6530, %v5013_v46   ;;  %v5018_v46 = vld [vmem:[%s8873_s7 + $0x50] sm:$0xff]  ;;  %v7700_v24 = vpop.permute.xlu0 %2162 }
 0x13b   : > { %8944 = vst [vmem:[#allocation21_spill] sm:$0xff] %v7700_v24  ;;  %v8947_v24 = vmov 0  }
 0x13d   : > { %5104 = vperm.xlu0 %6529, %v5014_v62   ;;  %v7693_v62 = vpop.permute.xlu1 %2157 }
 0x13e   : > { %5109 = vperm.xlu1 %6530, %v5015_v3   ;;  %8943 = vst [vmem:[#allocation20_spill] sm:$0xff] %v7693_v62  ;;  %v5019_v3 = vld [vmem:[%s8873_s7 + $0x58] sm:$0xff] }
 0x13f   : > { %5905 = vmatmul.mubr.msk.bf16.gmra.mrb[4].mxu0 %vm737_vm0, %v6570_v39  ;;  %v5017_v39 = vld [vmem:[%s8873_s7 + $0x48] sm:$0xff]  ;;  %v6572_v62 = vld [vmem:[%s8868_s2 + $0x18] sm:$0xff]  }
 0x140   : > { %1505 = vmatprep.mubr.bf16.mxu0 %v8878_v5 }
 0x141   : > { %5114 = vperm.xlu0 %6529, %v5016_v16   ;;  %v5020_v16 = vld [vmem:[%s8873_s7 + $0x60] sm:$0xff] }
 0x142   : > { %5119 = vperm.xlu1 %6530, %v5017_v39   ;;  %v7711_v39 = vpop.permute.xlu1 %2167 }
 0x143   : > { %8945 = vst [vmem:[#allocation22_spill] sm:$0xff] %v7711_v39 }
 0x145   : > { %5124 = vperm.xlu0 %6529, %v5018_v46   ;;  %v5022_v46 = vld [vmem:[%s8873_s7 + $0x70] sm:$0xff] }
 0x146   : > { %5129 = vperm.xlu1 %6530, %v5019_v3   ;;  %v5023_v3 = vld [vmem:[%s8873_s7 + $0x78] sm:$0xff]  ;;  %v7726_v39 = vpop.permute.xlu1 %2177 }
 0x147   : > { %5906 = vmatmul.mubr.msk.bf16.gmra.mrb[8].mxu0 %vm737_vm0, %v6571_v28  ;;  %v5021_v28 = vld [vmem:[%s8873_s7 + $0x68] sm:$0xff]  ;;  %8948 = vst [vmem:[#allocation24_spill] sm:$0xff] %v7726_v39 }
 0x148   : > { %1515 = vmatprep.mubr.bf16.mxu0 %v8878_v5  ;;  %v7716_v5 = vpop.permute.xlu0 %2172 }
 0x149   : > { %5134 = vperm.xlu0 %6529, %v5020_v16   ;;  %8946 = vst [vmem:[#allocation23_spill] sm:$0xff] %v7716_v5  ;;  %v5024_v16 = vld [vmem:[%s8873_s7 + $0x80] sm:$0xff] }
 0x14a   : > { %5139 = vperm.xlu1 %6530, %v5021_v28   ;;  %v6573_v5 = vld [vmem:[%s8868_s2 + $0x20] sm:$0xff]   ;;  %v7744_v39 = vpop.permute.xlu1 %2187 }
 0x14b   : > { %8950 = vst [vmem:[#allocation26_spill] sm:$0xff] %v7744_v39 }
 0x14c   : > { %v7734_v28 = vpop.permute.xlu0 %2182 }
 0x14d   : > { %5144 = vperm.xlu0 %6529, %v5022_v46   ;;  %8949 = vst [vmem:[#allocation25_spill] sm:$0xff] %v7734_v28  ;;  %v5026_v46 = vld [vmem:[%s8873_s7 + $0x90] sm:$0xff] }
 0x14e   : > { %5149 = vperm.xlu1 %6530, %v5023_v3   ;;  %v5027_v3 = vld [vmem:[%s8873_s7 + $0x98] sm:$0xff]  ;;  %v7760_v39 = vpop.permute.xlu1 %2965 }
 0x14f   : > { %5907 = vmatmul.mubr.msk.bf16.gmra.mrb[12].mxu0 %vm737_vm0, %v6572_v62  ;;  %v5025_v62 = vld [vmem:[%s8873_s7 + $0x88] sm:$0xff]  ;;  %8952 = vst [vmem:[#allocation28_spill] sm:$0xff] %v7760_v39  ;;  %v6575_v39 = vld [vmem:[%s8868_s2 + $0x30] sm:$0xff]  }
 0x150   : > { %1525 = vmatprep.mubr.bf16.mxu0 %v8947_v24  ;;  %v7749_v28 = vpop.permute.xlu0 %2960 }
 0x151   : > { %5154 = vperm.xlu0 %6529, %v5024_v16   ;;  %v5028_v16 = vld [vmem:[%s8873_s7 + $0xa0] sm:$0xff]  ;;  %8951 = vst [vmem:[#allocation27_spill] sm:$0xff] %v7749_v28 }
 0x152   : > { %5159 = vperm.xlu1 %6530, %v5025_v62   ;;  %v5029_v62 = vld [vmem:[%s8873_s7 + $0xa8] sm:$0xff] }
 0x154   : > { %v7767_v28 = vpop.permute.xlu0 %2970 }
 0x155   : > { %5164 = vperm.xlu0 %6529, %v5026_v46   ;;  %v5030_v46 = vld [vmem:[%s8873_s7 + $0xb0] sm:$0xff]  ;;  %8953 = vst [vmem:[#allocation29_spill] sm:$0xff] %v7767_v28 }
 0x156   : > { %5169 = vperm.xlu1 %6530, %v5027_v3   ;;  %v5031_v3 = vld [vmem:[%s8873_s7 + $0xb8] sm:$0xff] }
 0x157   : > { %5908 = vmatmul.mubr.msk.bf16.gmra.mrb[16].mxu0 %vm737_vm0, %v6573_v5  ;;  %v6574_v5 = vld [vmem:[%s8868_s2 + $0x28] sm:$0xff]  }
 0x158   : > { %1535 = vmatprep.mubr.bf16.mxu0 %v8947_v24  ;;  %v7783_v28 = vpop.permute.xlu0 %2980 }
 0x159   : > { %5174 = vperm.xlu0 %6529, %v5028_v16   ;;  %v5032_v16 = vld [vmem:[%s8873_s7 + $0xc0] sm:$0xff]  ;;  %8955 = vst [vmem:[#allocation31_spill] sm:$0xff] %v7783_v28  ;;  %v6576_v28 = vld [vmem:[%s8868_s2 + $0x38] sm:$0xff]  }
 0x15a   : > { %5179 = vperm.xlu1 %6530, %v5029_v62   ;;  %v7778_v62 = vpop.permute.xlu1 %2975 }
 0x15b   : > { %8954 = vst [vmem:[#allocation30_spill] sm:$0xff] %v7778_v62 }
 0x15d   : > { %5184 = vperm.xlu0 %6529, %v5030_v46   ;;  %v5034_v46 = vld [vmem:[%s8873_s7 + $0xd0] sm:$0xff] }
 0x15e   : > { %5189 = vperm.xlu1 %6530, %v5031_v3   ;;  %v5035_v3 = vld [vmem:[%s8873_s7 + $0xd8] sm:$0xff]  ;;  %v7793_v62 = vpop.permute.xlu1 %2985 }
 0x15f   : > { %5909 = vmatmul.mubr.msk.bf16.gmra.mrb[20].mxu0 %vm737_vm0, %v6574_v5  ;;  %v5033_v5 = vld [vmem:[%s8873_s7 + $0xc8] sm:$0xff]  ;;  %8956 = vst [vmem:[#allocation32_spill] sm:$0xff] %v7793_v62 }
 0x160   : > { %1545 = vmatprep.mubr.bf16.mxu0 %v8947_v24 }
 0x161   : > { %5194 = vperm.xlu0 %6529, %v5032_v16   ;;  %v5036_v16 = vld [vmem:[%s8873_s7 + $0xe0] sm:$0xff] }
 0x162   : > { %5199 = vperm.xlu1 %6530, %v5033_v5   ;;  %v7801_v5 = vpop.permute.xlu0 %2990  ;;  %v7811_v62 = vpop.permute.xlu1 %2995 }
 0x163   : > { %8957 = vst [vmem:[#allocation33_spill] sm:$0xff] %v7801_v5  ;;  %8958 = vst [vmem:[#allocation34_spill] sm:$0xff] %v7811_v62 }
 0x165   : > { %5204 = vperm.xlu0 %6529, %v5034_v46   ;;  %v5038_v46 = vld [vmem:[%s8873_s7 + $0xf0] sm:$0xff] }
 0x166   : > { %5209 = vperm.xlu1 %6530, %v5035_v3   ;;  %v5039_v3 = vld [vmem:[%s8873_s7 + $0xf8] sm:$0xff]  ;;  %v7816_v5 = vpop.permute.xlu0 %3000  ;;  %v7827_v62 = vpop.permute.xlu1 %3005 }
 0x167   : > { %5910 = vmatmul.mubr.msk.bf16.gmra.mrb[24].mxu0 %vm737_vm0, %v6575_v39  ;;  %v5037_v39 = vld [vmem:[%s8873_s7 + $0xe8] sm:$0xff]  ;;  %8959 = vst [vmem:[#allocation35_spill] sm:$0xff] %v7816_v5  ;;  %8960 = vst [vmem:[#allocation36_spill] sm:$0xff] %v7827_v62 }
 0x168   : > { %1555 = vmatprep.mubr.bf16.mxu0 %v8947_v24  ;;  %v6578_v62 = vld [vmem:[%s8868_s2 + $0x48] sm:$0xff]  }
 0x169   : > { %5214 = vperm.xlu0 %6529, %v5036_v16   ;;  %v5040_v16 = vld [vmem:[%s8873_s7 + $0x100] sm:$0xff] }
 0x16a   : > { %5219 = vperm.xlu1 %6530, %v5037_v39   ;;  %v5041_v39 = vld [vmem:[%s8873_s7 + $0x108] sm:$0xff]  ;;  %v7834_v5 = vpop.permute.xlu0 %3010 }
 0x16b   : > { %8961 = vst [vmem:[#allocation37_spill] sm:$0xff] %v7834_v5 }
 0x16d   : > { %5224 = vperm.xlu0 %6529, %v5038_v46   ;;  %v5042_v46 = vld [vmem:[%s8873_s7 + $0x110] sm:$0xff] }
 0x16e   : > { %5229 = vperm.xlu1 %6530, %v5039_v3   ;;  %v5043_v3 = vld [vmem:[%s8873_s7 + $0x118] sm:$0xff]  ;;  %v7850_v5 = vpop.permute.xlu0 %3020 }
 0x16f   : > { %5911 = vmatmul.mubr.msk.bf16.gmra.mrb[28].mxu0 %vm737_vm0, %v6576_v28  ;;  %v6577_v28 = vld [vmem:[%s8868_s2 + $0x40] sm:$0xff]   ;;  %8963 = vst [vmem:[#allocation39_spill] sm:$0xff] %v7850_v5  ;;  %v6579_v5 = vld [vmem:[%s8868_s2 + $0x50] sm:$0xff]  }
 0x170   : > { %1565 = vmatprep.mubr.bf16.mxu0 %v8947_v24 }
 0x171   : > { %5234 = vperm.xlu0 %6529, %v5040_v16   ;;  %v5044_v16 = vld [vmem:[%s8873_s7 + $0x120] sm:$0xff] }
 0x172   : > { %5239 = vperm.xlu1 %6530, %v5041_v39   ;;  %v7845_v39 = vpop.permute.xlu1 %3015 }
 0x173   : > { %8962 = vst [vmem:[#allocation38_spill] sm:$0xff] %v7845_v39 }
 0x175   : > { %5244 = vperm.xlu0 %6529, %v5042_v46   ;;  %v5046_v46 = vld [vmem:[%s8873_s7 + $0x130] sm:$0xff] }
 0x176   : > { %5249 = vperm.xlu1 %6530, %v5043_v3   ;;  %v5047_v3 = vld [vmem:[%s8873_s7 + $0x138] sm:$0xff]  ;;  %v7860_v39 = vpop.permute.xlu1 %3025 }
 0x177   : > { %5912 = vmatmul.mubr.msk.bf16.gmra.mrb[32].mxu0 %vm737_vm0, %v6577_v28  ;;  %v5045_v28 = vld [vmem:[%s8873_s7 + $0x128] sm:$0xff]  ;;  %8964 = vst [vmem:[#allocation40_spill] sm:$0xff] %v7860_v39 }
 0x178   : > { %1575 = vmatprep.mubr.bf16.mxu0 %v8947_v24 }
 0x179   : > { %5254 = vperm.xlu0 %6529, %v5044_v16   ;;  %v5048_v16 = vld [vmem:[%s8873_s7 + $0x140] sm:$0xff] }
 0x17a   : > { %5259 = vperm.xlu1 %6530, %v5045_v28   ;;  %v7868_v28 = vpop.permute.xlu0 %3030  ;;  %v7878_v39 = vpop.permute.xlu1 %3035 }
 0x17b   : > { %8965 = vst [vmem:[#allocation41_spill] sm:$0xff] %v7868_v28  ;;  %8966 = vst [vmem:[#allocation42_spill] sm:$0xff] %v7878_v39 }
 0x17d   : > { %5264 = vperm.xlu0 %6529, %v5046_v46   ;;  %v5050_v46 = vld [vmem:[%s8873_s7 + $0x150] sm:$0xff] }
 0x17e   : > { %5269 = vperm.xlu1 %6530, %v5047_v3   ;;  %v5051_v3 = vld [vmem:[%s8873_s7 + $0x158] sm:$0xff]  ;;  %v7883_v28 = vpop.permute.xlu0 %3040  ;;  %v7894_v39 = vpop.permute.xlu1 %3045 }
 0x17f   : > { %5913 = vmatmul.mubr.msk.bf16.gmra.mrb[36].mxu0 %vm737_vm0, %v6578_v62  ;;  %v5049_v62 = vld [vmem:[%s8873_s7 + $0x148] sm:$0xff]  ;;  %8967 = vst [vmem:[#allocation43_spill] sm:$0xff] %v7883_v28  ;;  %8968 = vst [vmem:[#allocation44_spill] sm:$0xff] %v7894_v39  ;;  %v6581_v39 = vld [vmem:[%s8868_s2 + $0x60] sm:$0xff]  }
 0x180   : > { %1585 = vmatprep.mubr.bf16.mxu0 %v8947_v24 }
 0x181   : > { %5274 = vperm.xlu0 %6529, %v5048_v16   ;;  %v5052_v16 = vld [vmem:[%s8873_s7 + $0x160] sm:$0xff] }
 0x182   : > { %5279 = vperm.xlu1 %6530, %v5049_v62   ;;  %v5053_v62 = vld [vmem:[%s8873_s7 + $0x168] sm:$0xff]  ;;  %v7901_v28 = vpop.permute.xlu0 %3050 }
 0x183   : > { %8969 = vst [vmem:[#allocation45_spill] sm:$0xff] %v7901_v28 }
 0x185   : > { %5284 = vperm.xlu0 %6529, %v5050_v46   ;;  %v5054_v46 = vld [vmem:[%s8873_s7 + $0x170] sm:$0xff] }
 0x186   : > { %5289 = vperm.xlu1 %6530, %v5051_v3   ;;  %v5055_v3 = vld [vmem:[%s8873_s7 + $0x178] sm:$0xff]  ;;  %v7917_v28 = vpop.permute.xlu0 %3060 }
 0x187   : > { %5914 = vmatmul.mubr.msk.bf16.gmra.mrb[40].mxu0 %vm737_vm0, %v6579_v5  ;;  %v6580_v5 = vld [vmem:[%s8868_s2 + $0x58] sm:$0xff]   ;;  %8971 = vst [vmem:[#allocation47_spill] sm:$0xff] %v7917_v28  ;;  %v6582_v28 = vld [vmem:[%s8868_s2 + $0x68] sm:$0xff]  }
 0x188   : > { %1595 = vmatprep.mubr.bf16.mxu0 %v8947_v24 }
 0x189   : > { %5294 = vperm.xlu0 %6529, %v5052_v16   ;;  %v5056_v16 = vld [vmem:[%s8873_s7 + $0x180] sm:$0xff] }
 0x18a   : > { %5299 = vperm.xlu1 %6530, %v5053_v62   ;;  %v7912_v62 = vpop.permute.xlu1 %3055 }
 0x18b   : > { %8970 = vst [vmem:[#allocation46_spill] sm:$0xff] %v7912_v62 }
 0x18d   : > { %5304 = vperm.xlu0 %6529, %v5054_v46   ;;  %v5058_v46 = vld [vmem:[%s8873_s7 + $0x190] sm:$0xff] }
 0x18e   : > { %5309 = vperm.xlu1 %6530, %v5055_v3   ;;  %v5059_v3 = vld [vmem:[%s8873_s7 + $0x198] sm:$0xff]  ;;  %v7927_v62 = vpop.permute.xlu1 %3065 }
 0x18f   : > { %5915 = vmatmul.mubr.msk.bf16.gmra.mrb[44].mxu0 %vm737_vm0, %v6580_v5  ;;  %v5057_v5 = vld [vmem:[%s8873_s7 + $0x188] sm:$0xff]  ;;  %8972 = vst [vmem:[#allocation48_spill] sm:$0xff] %v7927_v62 }
 0x190   : > { %1605 = vmatprep.mubr.bf16.mxu0 %v8947_v24 }
 0x191   : > { %5314 = vperm.xlu0 %6529, %v5056_v16   ;;  %v5060_v16 = vld [vmem:[%s8873_s7 + $0x1a0] sm:$0xff] }
 0x192   : > { %5319 = vperm.xlu1 %6530, %v5057_v5   ;;  %v7935_v5 = vpop.permute.xlu0 %3070  ;;  %v7945_v62 = vpop.permute.xlu1 %3075 }
 0x193   : > { %8973 = vst [vmem:[#allocation49_spill] sm:$0xff] %v7935_v5  ;;  %8974 = vst [vmem:[#allocation50_spill] sm:$0xff] %v7945_v62 }
 0x195   : > { %5324 = vperm.xlu0 %6529, %v5058_v46   ;;  %v5062_v46 = vld [vmem:[%s8873_s7 + $0x1b0] sm:$0xff] }
 0x196   : > { %5329 = vperm.xlu1 %6530, %v5059_v3   ;;  %v5063_v3 = vld [vmem:[%s8873_s7 + $0x1b8] sm:$0xff]  ;;  %v7950_v5 = vpop.permute.xlu0 %3080  ;;  %v7961_v62 = vpop.permute.xlu1 %3085 }
 0x197   : > { %5916 = vmatmul.mubr.msk.bf16.gmra.mrb[48].mxu0 %vm737_vm0, %v6581_v39  ;;  %v5061_v39 = vld [vmem:[%s8873_s7 + $0x1a8] sm:$0xff]  ;;  %8975 = vst [vmem:[#allocation51_spill] sm:$0xff] %v7950_v5  ;;  %8976 = vst [vmem:[#allocation52_spill] sm:$0xff] %v7961_v62  ;;  %v6584_v62 = vld [vmem:[%s8868_s2 + $0x78] sm:$0xff]  }
 0x198   : > { %1615 = vmatprep.mubr.bf16.mxu0 %v8947_v24 }
 0x199   : > { %5334 = vperm.xlu0 %6529, %v5060_v16   ;;  %v5064_v16 = vld [vmem:[%s8873_s7 + $0x1c0] sm:$0xff] }
 0x19a   : > { %5339 = vperm.xlu1 %6530, %v5061_v39   ;;  %v5065_v39 = vld [vmem:[%s8873_s7 + $0x1c8] sm:$0xff]  ;;  %v7968_v5 = vpop.permute.xlu0 %3090 }
 0x19b   : > { %8977 = vst [vmem:[#allocation53_spill] sm:$0xff] %v7968_v5 }
 0x19d   : > { %5344 = vperm.xlu0 %6529, %v5062_v46   ;;  %v5066_v46 = vld [vmem:[%s8873_s7 + $0x1d0] sm:$0xff] }
 0x19e   : > { %5349 = vperm.xlu1 %6530, %v5063_v3   ;;  %v5067_v3 = vld [vmem:[%s8873_s7 + $0x1d8] sm:$0xff]  ;;  %v7984_v5 = vpop.permute.xlu0 %3100 }
 0x19f   : > { %5917 = vmatmul.mubr.msk.bf16.gmra.mrb[52].mxu0 %vm737_vm0, %v6582_v28  ;;  %v6583_v28 = vld [vmem:[%s8868_s2 + $0x70] sm:$0xff]   ;;  %8979 = vst [vmem:[#allocation55_spill] sm:$0xff] %v7984_v5 }
 0x1a0   : > { %1625 = vmatprep.mubr.bf16.mxu0 %v8947_v24 }
 0x1a1   : > { %5354 = vperm.xlu0 %6529, %v5064_v16   ;;  %v5068_v16 = vld [vmem:[%s8873_s7 + $0x1e0] sm:$0xff] }
 0x1a2   : > { %5359 = vperm.xlu1 %6530, %v5065_v39   ;;  %v7979_v39 = vpop.permute.xlu1 %3095 }
 0x1a3   : > { %8978 = vst [vmem:[#allocation54_spill] sm:$0xff] %v7979_v39  ;;  %v7996_v39 = vpop.permute.xlu0 %3110 }
 0x1a4   : > { %8981 = vst [vmem:[#allocation57_spill] sm:$0xff] %v7996_v39 }
 0x1a5   : > { %5364 = vperm.xlu0 %6529, %v5066_v46   ;;  %v5070_v46 = vld [vmem:[%s8873_s7 + $0x1f0] sm:$0xff] }
 0x1a6   : > { %5369 = vperm.xlu1 %6530, %v5067_v3   ;;  %v5071_v3 = vld [vmem:[%s8873_s7 + $0x1f8] sm:$0xff]  ;;  %v7991_v53 = vpop.permute.xlu1 %3105 }
 0x1a7   : > { %5918 = vmatmul.mubr.msk.bf16.gmra.mrb[56].mxu0 %vm737_vm0, %v6583_v28  ;;  %v5069_v28 = vld [vmem:[%s8873_s7 + $0x1e8] sm:$0xff]  ;;  %8980 = vst [vmem:[#allocation56_spill] sm:$0xff] %v7991_v53 }
 0x1a8   : > { %1635 = vmatprep.mubr.bf16.mxu0 %v8947_v24 }
 0x1a9   : > { %5374 = vperm.xlu0 %6529, %v5068_v16   ;;  %v6585_v16 = vld [vmem:[%s8868_s2 + $0x80] sm:$0xff]  }
 0x1aa   : > { %5379 = vperm.xlu1 %6530, %v5069_v28   ;;  %v6587_v28 = vld [vmem:[%s8868_s2 + $0x90] sm:$0xff]  }
 0x1ad   : > { %5384 = vperm.xlu0 %6529, %v5070_v46   ;;  %v6589_v46 = vld [vmem:[%s8868_s2 + $0xa0] sm:$0xff]  }
 0x1ae   : > { %5389 = vperm.xlu1 %6530, %v5071_v3   ;;  %v6590_v3 = vld [vmem:[%s8868_s2 + $0xa8] sm:$0xff]  }
 0x1af   : > { %5919 = vmatmul.mubr.msk.bf16.gmra.mrb[60].mxu0 %vm737_vm0, %v6584_v62  ;;  %v6586_v62 = vld [vmem:[%s8868_s2 + $0x88] sm:$0xff]  }
 0x1b0   : > { %1645 = vmatprep.mubr.bf16.mxu0 %v8947_v24 }
 0x1b1   : > { %5661 = vperm.xlu0 %6529, %v5658_v7   ;;  %v6588_v7 = vld [vmem:[%s8868_s2 + $0x98] sm:$0xff]  }
 0x1b7   : > { %5920 = vmatmul.mubr.msk.bf16.gmra.mrb[64].mxu0 %vm737_vm0, %v6585_v16  ;;  %v6591_v16 = vld [vmem:[%s8868_s2 + $0xb0] sm:$0xff]  }
 0x1b8   : > { %1655 = vmatprep.mubr.bf16.mxu0 %v8947_v24 }
 0x1bf   : > { %5921 = vmatmul.mubr.msk.bf16.gmra.mrb[68].mxu0 %vm737_vm0, %v6586_v62  ;;  %v6592_v62 = vld [vmem:[%s8868_s2 + $0xb8] sm:$0xff]  }
 0x1c0   : > { %1665 = vmatprep.mubr.bf16.mxu0 %v8947_v24 }
 0x1c7   : > { %5922 = vmatmul.mubr.msk.bf16.gmra.mrb[72].mxu0 %vm737_vm0, %v6587_v28  ;;  %v6593_v28 = vld [vmem:[%s8868_s2 + $0xc0] sm:$0xff]  }
 0x1c8   : > { %1675 = vmatprep.mubr.bf16.mxu0 %v8947_v24 }
 0x1cf   : > { %5923 = vmatmul.mubr.msk.bf16.gmra.mrb[76].mxu0 %vm737_vm0, %v6588_v7  ;;  %v6594_v7 = vld [vmem:[%s8868_s2 + $0xc8] sm:$0xff]  }
 0x1d0   : > { %1685 = vmatprep.mubr.bf16.mxu0 %v8947_v24 }
 0x1d7   : > { %5924 = vmatmul.mubr.msk.bf16.gmra.mrb[80].mxu0 %vm737_vm0, %v6589_v46  ;;  %v6595_v46 = vld [vmem:[%s8868_s2 + $0xd0] sm:$0xff]  }
 0x1d8   : > { %1695 = vmatprep.mubr.bf16.mxu0 %v8947_v24 }
 0x1df   : > { %5925 = vmatmul.mubr.msk.bf16.gmra.mrb[84].mxu0 %vm737_vm0, %v6590_v3 }
 0x1e0   : > { %1705 = vmatprep.mubr.bf16.mxu0 %v8947_v24 }
 0x1e7   : > { %5926 = vmatmul.mubr.msk.bf16.gmra.mrb[88].mxu0 %vm737_vm0, %v6591_v16 }
 0x1e8   : > { %1715 = vmatprep.mubr.bf16.mxu0 %v8947_v24 }
 0x1ef   : > { %5927 = vmatmul.mubr.msk.bf16.gmra.mrb[92].mxu0 %vm737_vm0, %v6592_v62 }
 0x1f0   : > { %1725 = vmatprep.mubr.bf16.mxu0 %v8947_v24 }
 0x1f7   : > { %5928 = vmatmul.mubr.msk.bf16.gmra.mrb[96].mxu0 %vm737_vm0, %v6593_v28  ;;  %v6596_v28 = vld [vmem:[%s8868_s2 + $0xd8] sm:$0xff]  }
 0x1f8   : > { %1735 = vmatprep.mubr.bf16.mxu0 %v8947_v24 }
 0x1ff   : > { %5929 = vmatmul.mubr.msk.bf16.gmra.mrb[100].mxu0 %vm737_vm0, %v6594_v7 }
 0x200   : > { %1745 = vmatprep.mubr.bf16.mxu0 %v8947_v24 }
 0x207   : > { %5930 = vmatmul.mubr.msk.bf16.gmra.mrb[104].mxu0 %vm737_vm0, %v6595_v46 }
 0x208   : > { %1755 = vmatprep.mubr.bf16.mxu0 %v8947_v24 }
 0x20a   : > { %v1487_v3 = vpop.f32.mrb[0].mxu0 }
 0x20b   : > { %v2190_v16 = vadd.f32 %v7270_v30, %v1487_v3  ;;  %v1489_v62 = vpop.f32.mrb[1].mxu0 }
 0x20c   : > { %v2191_v7 = vadd.f32 %v7270_v30, %v1489_v62  ;;  %v1491_v39 = vpop.f32.mrb[2].mxu0 }
 0x20d   : > { %v2446_v53 = vmul.f32 0.2, %v2190_v16  ;;  %v2192_v5 = vadd.f32 %v7279_v33, %v1491_v39  ;;  %v1493_v37 = vpop.f32.mrb[3].mxu0  ;;  %vm2318_vm1 = vcmp.gt.f32.partialorder %v2190_v16, 0.0  ;;  %v6606_v39 = vld [vmem:[%s8871_s5 + $0x64] ss:$16 sps:$4 sm:$0xff]  }
 0x20e   : > { %v2447_v21 = vmul.f32 0.2, %v2191_v7  ;;  %v2193_v46 = vadd.f32 %v7279_v33, %v1493_v37  ;;  %vm2319_vm2 = vcmp.gt.f32.partialorder %v2191_v7, 0.0  ;;  %3980 = vmatprep.mubr.bf16.mxu1 %v6606_v39  ;;  %v6598_v39 = vld [vmem:[%s8868_s2 + $0xe8] sm:$0xff]  }
 0x20f   : > { %vm2320_vm3 = vcmp.gt.f32.partialorder %v2192_v5, 0.0  ;;  %v2448_v10 = vmul.f32 0.2, %v2192_v5  ;;  %5931 = vmatmul.mubr.msk.bf16.gmra.mrb[108].mxu0 %vm737_vm0, %v6596_v28  ;;  %v2574_v57 = vsel %vm2318_vm1, %v2190_v16, %v2446_v53  ;;  %v6597_v28 = vld [vmem:[%s8868_s2 + $0xe0] sm:$0xff]  }
 0x210   : > { %vm2321_vm4 = vcmp.gt.f32.partialorder %v2193_v46, 0.0  ;;  %v2449_v3 = vmul.f32 0.2, %v2193_v46  ;;  %1765 = vmatprep.mubr.bf16.mxu0 %v8947_v24  ;;  %v2575_v31 = vsel %vm2319_vm2, %v2191_v7, %v2447_v21 }
 0x211   : > { %v2576_v30 = vsel %vm2320_vm3, %v2192_v5, %v2448_v10 }
 0x212   : > { %v2830_v62 = vpack.c.bf16 %v2576_v30, %v2574_v57  ;;  %v1497_v52 = vpop.f32.mrb[4].mxu0  ;;  %v2577_v26 = vsel %vm2321_vm4, %v2193_v46, %v2449_v3 }
 0x213   : > { %v2194_v33 = vadd.f32 %v7275_v32, %v1497_v52  ;;  %v1499_v37 = vpop.f32.mrb[5].mxu0  ;;  %v2831_v17 = vpack.c.bf16 %v2577_v26, %v2575_v31 }
 0x214   : > { %v2195_v53 = vadd.f32 %v7275_v32, %v1499_v37  ;;  %v1501_v10 = vpop.f32.mrb[6].mxu0 }
 0x215   : > { %v2450_v5 = vmul.f32 0.2, %v2194_v33  ;;  %v2196_v16 = vadd.f32 %v7287_v36, %v1501_v10  ;;  %v1503_v13 = vpop.f32.mrb[7].mxu0  ;;  %3918 = vmatprep.subr.bf16.mxu0 %v2831_v17  ;;  %6072 = vmatprep.subr.bf16.mxu1 %v2831_v17  ;;  %vm2322_vm5 = vcmp.gt.f32.partialorder %v2194_v33, 0.0 }
 0x216   : > { %v2451_v57 = vmul.f32 0.2, %v2195_v53  ;;  %v2197_v52 = vadd.f32 %v7287_v36, %v1503_v13  ;;  %3919 = vmatpush1.bf16.msra.mxu0 %v2830_v62  ;;  %6088 = vmatpush1.bf16.msra.mxu1 %v2830_v62  ;;  %vm2323_vm6 = vcmp.gt.f32.partialorder %v2195_v53, 0.0 }
 0x217   : > { %vm2324_vm7 = vcmp.gt.f32.partialorder %v2196_v16, 0.0  ;;  %v2452_v26 = vmul.f32 0.2, %v2196_v16  ;;  %5932 = vmatmul.mubr.msk.bf16.gmra.mrb[112].mxu0 %vm737_vm0, %v6597_v28  ;;  %v2578_v31 = vsel %vm2322_vm5, %v2194_v33, %v2450_v5 }
 0x218   : > { %vm2325_vm8 = vcmp.gt.f32.partialorder %v2197_v52, 0.0  ;;  %v2453_v32 = vmul.f32 0.2, %v2197_v52  ;;  %1775 = vmatprep.mubr.bf16.mxu0 %v8947_v24  ;;  %v2579_v17 = vsel %vm2323_vm6, %v2195_v53, %v2451_v57 }
 0x219   : > { %v2580_v21 = vsel %vm2324_vm7, %v2196_v16, %v2452_v26 }
 0x21a   : > { %v2832_v7 = vpack.c.bf16 %v2580_v21, %v2578_v31  ;;  %v1507_v46 = vpop.f32.mrb[8].mxu0  ;;  %v2581_v3 = vsel %vm2325_vm8, %v2197_v52, %v2453_v32 }
 0x21b   : > { %v2198_v30 = vadd.f32 %v7292_v38, %v1507_v46  ;;  %v1509_v36 = vpop.f32.mrb[9].mxu0  ;;  %v2833_v13 = vpack.c.bf16 %v2581_v3, %v2579_v17 }
 0x21c   : > { %v2199_v62 = vadd.f32 %v7292_v38, %v1509_v36  ;;  %v1511_v37 = vpop.f32.mrb[10].mxu0 }
 0x21d   : > { %v2454_v28 = vmul.f32 0.2, %v2198_v30  ;;  %v2200_v10 = vadd.f32 %v7300_v41, %v1511_v37  ;;  %v1513_v33 = vpop.f32.mrb[11].mxu0  ;;  %3920 = vmatprep.subr.bf16.mxu0 %v2833_v13  ;;  %6073 = vmatprep.subr.bf16.mxu1 %v2833_v13  ;;  %vm2326_vm9 = vcmp.gt.f32.partialorder %v2198_v30, 0.0 }
 0x21e   : > { %v2455_v53 = vmul.f32 0.2, %v2199_v62  ;;  %v2201_v5 = vadd.f32 %v7300_v41, %v1513_v33  ;;  %3921 = vmatpush1.bf16.msra.mxu0 %v2832_v7  ;;  %6089 = vmatpush1.bf16.msra.mxu1 %v2832_v7  ;;  %vm2327_vm10 = vcmp.gt.f32.partialorder %v2199_v62, 0.0  ;;  %v6599_v7 = vld [vmem:[%s8868_s2 + $0xf0] sm:$0xff]  }
 0x21f   : > { %vm2328_vm11 = vcmp.gt.f32.partialorder %v2200_v10, 0.0  ;;  %v2456_v16 = vmul.f32 0.2, %v2200_v10  ;;  %5933 = vmatmul.mubr.msk.bf16.gmra.mrb[116].mxu0 %vm737_vm0, %v6598_v39  ;;  %v2582_v57 = vsel %vm2326_vm9, %v2198_v30, %v2454_v28 }
 0x220   : > { %vm2329_vm12 = vcmp.gt.f32.partialorder %v2201_v5, 0.0  ;;  %v2457_v38 = vmul.f32 0.2, %v2201_v5  ;;  %1785 = vmatprep.mubr.bf16.mxu0 %v8947_v24  ;;  %v2583_v31 = vsel %vm2327_vm10, %v2199_v62, %v2455_v53 }
 0x221   : > { %v2584_v52 = vsel %vm2328_vm11, %v2200_v10, %v2456_v16 }
 0x222   : > { %v2834_v26 = vpack.c.bf16 %v2584_v52, %v2582_v57  ;;  %v1517_v32 = vpop.f32.mrb[12].mxu0  ;;  %v2585_v21 = vsel %vm2329_vm12, %v2201_v5, %v2457_v38 }
 0x223   : > { %v2202_v46 = vadd.f32 %v7304_v42, %v1517_v32  ;;  %v1519_v41 = vpop.f32.mrb[13].mxu0  ;;  %v2835_v17 = vpack.c.bf16 %v2585_v21, %v2583_v31 }
 0x224   : > { %v2203_v3 = vadd.f32 %v7304_v42, %v1519_v41  ;;  %v1521_v36 = vpop.f32.mrb[14].mxu0 }
 0x225   : > { %v2458_v13 = vmul.f32 0.2, %v2202_v46  ;;  %v2204_v39 = vadd.f32 %v7312_v45, %v1521_v36  ;;  %v1523_v30 = vpop.f32.mrb[15].mxu0  ;;  %3922 = vmatprep.subr.bf16.mxu0 %v2835_v17  ;;  %6074 = vmatprep.subr.bf16.mxu1 %v2835_v17  ;;  %vm2330_vm13 = vcmp.gt.f32.partialorder %v2202_v46, 0.0 }
 0x226   : > { %v2459_v62 = vmul.f32 0.2, %v2203_v3  ;;  %v2205_v37 = vadd.f32 %v7312_v45, %v1523_v30  ;;  %3923 = vmatpush1.bf16.msra.mxu0 %v2834_v26  ;;  %6090 = vmatpush1.bf16.msra.mxu1 %v2834_v26  ;;  %vm2331_vm14 = vcmp.gt.f32.partialorder %v2203_v3, 0.0  ;;  %v6600_v26 = vld [vmem:[%s8868_s2 + $0xf8] sm:$0xff]  }
 0x227   : > { %vm2332_vm15 = vcmp.gt.f32.partialorder %v2204_v39, 0.0  ;;  %v2460_v28 = vmul.f32 0.2, %v2204_v39  ;;  %5934 = vmatmul.mubr.msk.bf16.gmra.mrb[120].mxu0 %vm737_vm0, %v6599_v7  ;;  %v2586_v10 = vsel %vm2330_vm13, %v2202_v46, %v2458_v13 }
 0x228   : > { %vm2333_vm1 = vcmp.gt.f32.partialorder %v2205_v37, 0.0  ;;  %v2461_v42 = vmul.f32 0.2, %v2205_v37  ;;  %1795 = vmatprep.mubr.bf16.mxu0 %v8947_v24  ;;  %v2587_v16 = vsel %vm2331_vm14, %v2203_v3, %v2459_v62  ;;  %v6603_v24 = vld [vmem:[%s8871_s5 + $0x4] ss:$16 sps:$4 sm:$0xff]  }
 0x229   : > { %v2588_v33 = vsel %vm2332_vm15, %v2204_v39, %v2460_v28 }
 0x22a   : > { %v2836_v53 = vpack.c.bf16 %v2588_v33, %v2586_v10  ;;  %v1527_v5 = vpop.f32.mrb[16].mxu0  ;;  %v2589_v38 = vsel %vm2333_vm1, %v2205_v37, %v2461_v42 }
 0x22b   : > { %v2206_v57 = vadd.f32 %v7317_v47, %v1527_v5  ;;  %v1529_v45 = vpop.f32.mrb[17].mxu0  ;;  %v2837_v52 = vpack.c.bf16 %v2589_v38, %v2587_v16 }
 0x22c   : > { %v2207_v32 = vadd.f32 %v7317_v47, %v1529_v45  ;;  %v1531_v31 = vpop.f32.mrb[18].mxu0 }
 0x22d   : > { %v2462_v21 = vmul.f32 0.2, %v2206_v57  ;;  %v2208_v46 = vadd.f32 %v7325_v50, %v1531_v31  ;;  %v1533_v41 = vpop.f32.mrb[19].mxu0  ;;  %3924 = vmatprep.subr.bf16.mxu0 %v2837_v52  ;;  %6075 = vmatprep.subr.bf16.mxu1 %v2837_v52  ;;  %vm2334_vm2 = vcmp.gt.f32.partialorder %v2206_v57, 0.0 }
 0x22e   : > { %v2463_v17 = vmul.f32 0.2, %v2207_v32  ;;  %v2209_v7 = vadd.f32 %v7325_v50, %v1533_v41  ;;  %3925 = vmatpush1.bf16.msra.mxu0 %v2836_v53  ;;  %6091 = vmatpush1.bf16.msra.mxu1 %v2836_v53  ;;  %vm2335_vm3 = vcmp.gt.f32.partialorder %v2207_v32, 0.0 }
 0x22f   : > { %vm2336_vm4 = vcmp.gt.f32.partialorder %v2208_v46, 0.0  ;;  %v2464_v47 = vmul.f32 0.2, %v2208_v46  ;;  %5935 = vmatmul.mubr.msk.bf16.gmra.mrb[124].mxu0 %vm737_vm0, %v6600_v26  ;;  %v2590_v36 = vsel %vm2334_vm2, %v2206_v57, %v2462_v21 }
 0x230   : > { %vm2337_vm5 = vcmp.gt.f32.partialorder %v2209_v7, 0.0  ;;  %v2465_v3 = vmul.f32 0.2, %v2209_v7  ;;  %3950 = vmatprep.mubr.bf16.mxu0 %v6603_v24  ;;  %v2591_v62 = vsel %vm2335_vm3, %v2207_v32, %v2463_v17 }
 0x231   : > { %v2592_v13 = vsel %vm2336_vm4, %v2208_v46, %v2464_v47 }
 0x232   : > { %v2838_v39 = vpack.c.bf16 %v2592_v13, %v2590_v36  ;;  %v1537_v30 = vpop.f32.mrb[20].mxu0  ;;  %v2593_v37 = vsel %vm2337_vm5, %v2209_v7, %v2465_v3 }
 0x233   : > { %v2210_v28 = vadd.f32 %v7329_v51, %v1537_v30  ;;  %v1539_v42 = vpop.f32.mrb[21].mxu0  ;;  %v2839_v50 = vpack.c.bf16 %v2593_v37, %v2591_v62 }
 0x234   : > { %v2211_v10 = vadd.f32 %v7329_v51, %v1539_v42  ;;  %v1541_v33 = vpop.f32.mrb[22].mxu0 }
 0x235   : > { %v2466_v53 = vmul.f32 0.2, %v2210_v28  ;;  %v2212_v5 = vadd.f32 %v7337_v54, %v1541_v33  ;;  %v1543_v16 = vpop.f32.mrb[23].mxu0  ;;  %3926 = vmatprep.subr.bf16.mxu0 %v2839_v50  ;;  %6076 = vmatprep.subr.bf16.mxu1 %v2839_v50  ;;  %vm2338_vm0 = vcmp.gt.f32.partialorder %v2210_v28, 0.0 }
 0x236   : > { %v2467_v38 = vmul.f32 0.2, %v2211_v10  ;;  %v2213_v57 = vadd.f32 %v7337_v54, %v1543_v16  ;;  %3927 = vmatpush1.bf16.msra.mxu0 %v2838_v39  ;;  %6092 = vmatpush1.bf16.msra.mxu1 %v2838_v39  ;;  %vm2339_vm6 = vcmp.gt.f32.partialorder %v2211_v10, 0.0 }
 0x237   : > { %vm2340_vm7 = vcmp.gt.f32.partialorder %v2212_v5, 0.0  ;;  %v2468_v45 = vmul.f32 0.2, %v2212_v5  ;;  %v2594_v26 = vsel %vm2338_vm0, %v2210_v28, %v2466_v53 }
 0x238   : > { %vm2341_vm8 = vcmp.gt.f32.partialorder %v2213_v57, 0.0  ;;  %v2469_v52 = vmul.f32 0.2, %v2213_v57  ;;  %v2595_v24 = vsel %vm2339_vm6, %v2211_v10, %v2467_v38 }
 0x239   : > { %v2596_v51 = vsel %vm2340_vm7, %v2212_v5, %v2468_v45 }
 0x23a   : > { %v2840_v32 = vpack.c.bf16 %v2596_v51, %v2594_v26  ;;  %v1547_v31 = vpop.f32.mrb[24].mxu0  ;;  %v2597_v21 = vsel %vm2341_vm8, %v2213_v57, %v2469_v52 }
 0x23b   : > { %v2214_v46 = vadd.f32 %v7342_v56, %v1547_v31  ;;  %v1549_v41 = vpop.f32.mrb[25].mxu0  ;;  %v2841_v17 = vpack.c.bf16 %v2597_v21, %v2595_v24 }
 0x23c   : > { %v2215_v7 = vadd.f32 %v7342_v56, %v1549_v41  ;;  %v1551_v54 = vpop.f32.mrb[26].mxu0 }
 0x23d   : > { %v2470_v47 = vmul.f32 0.2, %v2214_v46  ;;  %v2216_v3 = vadd.f32 %v7350_v59, %v1551_v54  ;;  %v1553_v36 = vpop.f32.mrb[27].mxu0  ;;  %3928 = vmatprep.subr.bf16.mxu0 %v2841_v17  ;;  %6077 = vmatprep.subr.bf16.mxu1 %v2841_v17  ;;  %vm2342_vm9 = vcmp.gt.f32.partialorder %v2214_v46, 0.0 }
 0x23e   : > { %v2471_v13 = vmul.f32 0.2, %v2215_v7  ;;  %v2217_v39 = vadd.f32 %v7350_v59, %v1553_v36  ;;  %3929 = vmatpush1.bf16.msra.mxu0 %v2840_v32  ;;  %6093 = vmatpush1.bf16.msra.mxu1 %v2840_v32  ;;  %vm2343_vm10 = vcmp.gt.f32.partialorder %v2215_v7, 0.0 }
 0x23f   : > { %vm2344_vm11 = vcmp.gt.f32.partialorder %v2216_v3, 0.0  ;;  %v2472_v30 = vmul.f32 0.2, %v2216_v3  ;;  %v2598_v37 = vsel %vm2342_vm9, %v2214_v46, %v2470_v47 }
 0x240   : > { %vm2345_vm12 = vcmp.gt.f32.partialorder %v2217_v39, 0.0  ;;  %v2473_v62 = vmul.f32 0.2, %v2217_v39  ;;  %v2599_v50 = vsel %vm2343_vm10, %v2215_v7, %v2471_v13 }
 0x241   : > { %v2600_v56 = vsel %vm2344_vm11, %v2216_v3, %v2472_v30 }
 0x242   : > { %v2842_v28 = vpack.c.bf16 %v2600_v56, %v2598_v37  ;;  %v1557_v42 = vpop.f32.mrb[28].mxu0  ;;  %v2601_v10 = vsel %vm2345_vm12, %v2217_v39, %v2473_v62 }
 0x243   : > { %v2218_v33 = vadd.f32 %v7354_v60, %v1557_v42  ;;  %v1559_v53 = vpop.f32.mrb[29].mxu0  ;;  %v2843_v5 = vpack.c.bf16 %v2601_v10, %v2599_v50 }
 0x244   : > { %v2219_v16 = vadd.f32 %v7354_v60, %v1559_v53  ;;  %v1561_v59 = vpop.f32.mrb[30].mxu0 }
 0x245   : > { %v2474_v38 = vmul.f32 0.2, %v2218_v33  ;;  %v2220_v57 = vadd.f32 %v7362_v63, %v1561_v59  ;;  %v1563_v45 = vpop.f32.mrb[31].mxu0  ;;  %3930 = vmatprep.subr.bf16.mxu0 %v2843_v5  ;;  %6078 = vmatprep.subr.bf16.mxu1 %v2843_v5  ;;  %vm2346_vm13 = vcmp.gt.f32.partialorder %v2218_v33, 0.0 }
 0x246   : > { %v2475_v52 = vmul.f32 0.2, %v2219_v16  ;;  %v2221_v26 = vadd.f32 %v7362_v63, %v1563_v45  ;;  %3931 = vmatpush1.bf16.msra.mxu0 %v2842_v28  ;;  %6094 = vmatpush1.bf16.msra.mxu1 %v2842_v28  ;;  %vm2347_vm14 = vcmp.gt.f32.partialorder %v2219_v16, 0.0 }
 0x247   : > { %vm2348_vm15 = vcmp.gt.f32.partialorder %v2220_v57, 0.0  ;;  %v2476_v51 = vmul.f32 0.2, %v2220_v57  ;;  %v2602_v31 = vsel %vm2346_vm13, %v2218_v33, %v2474_v38 }
 0x248   : > { %vm2349_vm1 = vcmp.gt.f32.partialorder %v2221_v26, 0.0  ;;  %v2477_v32 = vmul.f32 0.2, %v2221_v26  ;;  %v2603_v46 = vsel %vm2347_vm14, %v2219_v16, %v2475_v52 }
 0x249   : > { %v2604_v60 = vsel %vm2348_vm15, %v2220_v57, %v2476_v51 }
 0x24a   : > { %v2844_v24 = vpack.c.bf16 %v2604_v60, %v2602_v31  ;;  %v1567_v21 = vpop.f32.mrb[32].mxu0  ;;  %v2605_v41 = vsel %vm2349_vm1, %v2221_v26, %v2477_v32 }
 0x24b   : > { %v2222_v17 = vadd.f32 %v7367_v1, %v1567_v21  ;;  %v1569_v7 = vpop.f32.mrb[33].mxu0  ;;  %v2845_v54 = vpack.c.bf16 %v2605_v41, %v2603_v46 }
 0x24c   : > { %v2223_v47 = vadd.f32 %v7367_v1, %v1569_v7  ;;  %v1571_v63 = vpop.f32.mrb[34].mxu0 }
 0x24d   : > { %v2478_v3 = vmul.f32 0.2, %v2222_v17  ;;  %v2224_v36 = vadd.f32 %v7375_v4, %v1571_v63  ;;  %v1573_v13 = vpop.f32.mrb[35].mxu0  ;;  %3932 = vmatprep.subr.bf16.mxu0 %v2845_v54  ;;  %6079 = vmatprep.subr.bf16.mxu1 %v2845_v54  ;;  %vm2350_vm2 = vcmp.gt.f32.partialorder %v2222_v17, 0.0 }
 0x24e   : > { %v2479_v39 = vmul.f32 0.2, %v2223_v47  ;;  %v2225_v30 = vadd.f32 %v7375_v4, %v1573_v13  ;;  %3933 = vmatpush1.bf16.msra.mxu0 %v2844_v24  ;;  %6095 = vmatpush1.bf16.msra.mxu1 %v2844_v24  ;;  %vm2351_vm3 = vcmp.gt.f32.partialorder %v2223_v47, 0.0 }
 0x24f   : > { %vm2352_vm4 = vcmp.gt.f32.partialorder %v2224_v36, 0.0  ;;  %v2480_v62 = vmul.f32 0.2, %v2224_v36  ;;  %v2606_v56 = vsel %vm2350_vm2, %v2222_v17, %v2478_v3 }
 0x250   : > { %vm2353_vm5 = vcmp.gt.f32.partialorder %v2225_v30, 0.0  ;;  %v2481_v37 = vmul.f32 0.2, %v2225_v30  ;;  %v2607_v50 = vsel %vm2351_vm3, %v2223_v47, %v2479_v39 }
 0x251   : > { %v2608_v1 = vsel %vm2352_vm4, %v2224_v36, %v2480_v62 }
 0x252   : > { %v2846_v28 = vpack.c.bf16 %v2608_v1, %v2606_v56  ;;  %v1577_v42 = vpop.f32.mrb[36].mxu0  ;;  %v2609_v10 = vsel %vm2353_vm5, %v2225_v30, %v2481_v37 }
 0x253   : > { %v2226_v33 = vadd.f32 %v7379_v6, %v1577_v42  ;;  %v1579_v53 = vpop.f32.mrb[37].mxu0  ;;  %v2847_v5 = vpack.c.bf16 %v2609_v10, %v2607_v50 }
 0x254   : > { %v2227_v16 = vadd.f32 %v7379_v6, %v1579_v53  ;;  %v1581_v4 = vpop.f32.mrb[38].mxu0 }
 0x255   : > { %v2482_v59 = vmul.f32 0.2, %v2226_v33  ;;  %v2228_v38 = vadd.f32 %v7387_v9, %v1581_v4  ;;  %v1583_v57 = vpop.f32.mrb[39].mxu0  ;;  %3934 = vmatprep.subr.bf16.mxu0 %v2847_v5  ;;  %6080 = vmatprep.subr.bf16.mxu1 %v2847_v5  ;;  %vm2354_vm0 = vcmp.gt.f32.partialorder %v2226_v33, 0.0 }
 0x256   : > { %v2483_v45 = vmul.f32 0.2, %v2227_v16  ;;  %v2229_v52 = vadd.f32 %v7387_v9, %v1583_v57  ;;  %3935 = vmatpush1.bf16.msra.mxu0 %v2846_v28  ;;  %6096 = vmatpush1.bf16.msra.mxu1 %v2846_v28  ;;  %vm2355_vm6 = vcmp.gt.f32.partialorder %v2227_v16, 0.0 }
 0x257   : > { %vm2356_vm7 = vcmp.gt.f32.partialorder %v2228_v38, 0.0  ;;  %v2484_v26 = vmul.f32 0.2, %v2228_v38  ;;  %v2610_v32 = vsel %vm2354_vm0, %v2226_v33, %v2482_v59 }
 0x258   : > { %vm2357_vm8 = vcmp.gt.f32.partialorder %v2229_v52, 0.0  ;;  %v2485_v51 = vmul.f32 0.2, %v2229_v52  ;;  %v2611_v24 = vsel %vm2355_vm6, %v2227_v16, %v2483_v45 }
 0x259   : > { %v2612_v6 = vsel %vm2356_vm7, %v2228_v38, %v2484_v26 }
 0x25a   : > { %v2848_v31 = vpack.c.bf16 %v2612_v6, %v2610_v32  ;;  %v1587_v60 = vpop.f32.mrb[40].mxu0  ;;  %v2613_v21 = vsel %vm2357_vm8, %v2229_v52, %v2485_v51 }
 0x25b   : > { %v2230_v46 = vadd.f32 %v7392_v11, %v1587_v60  ;;  %v1589_v41 = vpop.f32.mrb[41].mxu0  ;;  %v2849_v17 = vpack.c.bf16 %v2613_v21, %v2611_v24 }
 0x25c   : > { %v2231_v7 = vadd.f32 %v7392_v11, %v1589_v41  ;;  %v1591_v9 = vpop.f32.mrb[42].mxu0 }
 0x25d   : > { %v2486_v54 = vmul.f32 0.2, %v2230_v46  ;;  %v2232_v47 = vadd.f32 %v7400_v14, %v1591_v9  ;;  %v1593_v63 = vpop.f32.mrb[43].mxu0  ;;  %3936 = vmatprep.subr.bf16.mxu0 %v2849_v17  ;;  %6081 = vmatprep.subr.bf16.mxu1 %v2849_v17  ;;  %vm2358_vm9 = vcmp.gt.f32.partialorder %v2230_v46, 0.0 }
 0x25e   : > { %v2487_v3 = vmul.f32 0.2, %v2231_v7  ;;  %v2233_v36 = vadd.f32 %v7400_v14, %v1593_v63  ;;  %3937 = vmatpush1.bf16.msra.mxu0 %v2848_v31  ;;  %6097 = vmatpush1.bf16.msra.mxu1 %v2848_v31  ;;  %vm2359_vm10 = vcmp.gt.f32.partialorder %v2231_v7, 0.0 }
 0x25f   : > { %vm2360_vm11 = vcmp.gt.f32.partialorder %v2232_v47, 0.0  ;;  %v2488_v13 = vmul.f32 0.2, %v2232_v47  ;;  %v2614_v30 = vsel %vm2358_vm9, %v2230_v46, %v2486_v54 }
 0x260   : > { %vm2361_vm12 = vcmp.gt.f32.partialorder %v2233_v36, 0.0  ;;  %v2489_v39 = vmul.f32 0.2, %v2233_v36  ;;  %v2615_v56 = vsel %vm2359_vm10, %v2231_v7, %v2487_v3 }
 0x261   : > { %v2616_v11 = vsel %vm2360_vm11, %v2232_v47, %v2488_v13 }
 0x262   : > { %v2850_v62 = vpack.c.bf16 %v2616_v11, %v2614_v30  ;;  %v1597_v37 = vpop.f32.mrb[44].mxu0  ;;  %v2617_v1 = vsel %vm2361_vm12, %v2233_v36, %v2489_v39 }
 0x263   : > { %v2234_v28 = vadd.f32 %v7404_v15, %v1597_v37  ;;  %v1599_v42 = vpop.f32.mrb[45].mxu0  ;;  %v2851_v50 = vpack.c.bf16 %v2617_v1, %v2615_v56 }
 0x264   : > { %v2235_v10 = vadd.f32 %v7404_v15, %v1599_v42  ;;  %v1601_v14 = vpop.f32.mrb[46].mxu0 }
 0x265   : > { %v2490_v33 = vmul.f32 0.2, %v2234_v28  ;;  %v2236_v53 = vadd.f32 %v7412_v18, %v1601_v14  ;;  %v1603_v5 = vpop.f32.mrb[47].mxu0  ;;  %3938 = vmatprep.subr.bf16.mxu0 %v2851_v50  ;;  %6082 = vmatprep.subr.bf16.mxu1 %v2851_v50  ;;  %vm2362_vm13 = vcmp.gt.f32.partialorder %v2234_v28, 0.0 }
 0x266   : > { %v2491_v16 = vmul.f32 0.2, %v2235_v10  ;;  %v2237_v4 = vadd.f32 %v7412_v18, %v1603_v5  ;;  %3939 = vmatpush1.bf16.msra.mxu0 %v2850_v62  ;;  %6098 = vmatpush1.bf16.msra.mxu1 %v2850_v62  ;;  %vm2363_vm14 = vcmp.gt.f32.partialorder %v2235_v10, 0.0 }
 0x267   : > { %vm2364_vm15 = vcmp.gt.f32.partialorder %v2236_v53, 0.0  ;;  %v2492_v59 = vmul.f32 0.2, %v2236_v53  ;;  %v2618_v57 = vsel %vm2362_vm13, %v2234_v28, %v2490_v33 }
 0x268   : > { %vm2365_vm1 = vcmp.gt.f32.partialorder %v2237_v4, 0.0  ;;  %v2493_v38 = vmul.f32 0.2, %v2237_v4  ;;  %v2619_v26 = vsel %vm2363_vm14, %v2235_v10, %v2491_v16 }
 0x269   : > { %v2620_v15 = vsel %vm2364_vm15, %v2236_v53, %v2492_v59 }
 0x26a   : > { %v2852_v45 = vpack.c.bf16 %v2620_v15, %v2618_v57  ;;  %v1607_v52 = vpop.f32.mrb[48].mxu0  ;;  %v2621_v51 = vsel %vm2365_vm1, %v2237_v4, %v2493_v38 }
 0x26b   : > { %v2238_v32 = vadd.f32 %v7417_v20, %v1607_v52  ;;  %v1609_v6 = vpop.f32.mrb[49].mxu0  ;;  %v2853_v31 = vpack.c.bf16 %v2621_v51, %v2619_v26 }
 0x26c   : > { %v2239_v60 = vadd.f32 %v7417_v20, %v1609_v6  ;;  %v1611_v18 = vpop.f32.mrb[50].mxu0 }
 0x26d   : > { %v2494_v24 = vmul.f32 0.2, %v2238_v32  ;;  %v2240_v21 = vadd.f32 %v7426_v23, %v1611_v18  ;;  %v1613_v46 = vpop.f32.mrb[51].mxu0  ;;  %3940 = vmatprep.subr.bf16.mxu0 %v2853_v31  ;;  %6083 = vmatprep.subr.bf16.mxu1 %v2853_v31  ;;  %vm2366_vm2 = vcmp.gt.f32.partialorder %v2238_v32, 0.0 }
 0x26e   : > { %v2495_v41 = vmul.f32 0.2, %v2239_v60  ;;  %v2241_v17 = vadd.f32 %v7426_v23, %v1613_v46  ;;  %3941 = vmatpush1.bf16.msra.mxu0 %v2852_v45  ;;  %6099 = vmatpush1.bf16.msra.mxu1 %v2852_v45  ;;  %vm2367_vm3 = vcmp.gt.f32.partialorder %v2239_v60, 0.0 }
 0x26f   : > { %vm2368_vm4 = vcmp.gt.f32.partialorder %v2240_v21, 0.0  ;;  %v2496_v7 = vmul.f32 0.2, %v2240_v21  ;;  %v2622_v54 = vsel %vm2366_vm2, %v2238_v32, %v2494_v24 }
 0x270   : > { %vm2369_vm5 = vcmp.gt.f32.partialorder %v2241_v17, 0.0  ;;  %v2497_v9 = vmul.f32 0.2, %v2241_v17  ;;  %v2623_v3 = vsel %vm2367_vm3, %v2239_v60, %v2495_v41 }
 0x271   : > { %v2624_v20 = vsel %vm2368_vm4, %v2240_v21, %v2496_v7 }
 0x272   : > { %v2854_v47 = vpack.c.bf16 %v2624_v20, %v2622_v54  ;;  %v1617_v63 = vpop.f32.mrb[52].mxu0  ;;  %v2625_v36 = vsel %vm2369_vm5, %v2241_v17, %v2497_v9 }
 0x273   : > { %v2242_v13 = vadd.f32 %v7432_v25, %v1617_v63  ;;  %v1619_v39 = vpop.f32.mrb[53].mxu0  ;;  %v2855_v30 = vpack.c.bf16 %v2625_v36, %v2623_v3 }
 0x274   : > { %v2243_v11 = vadd.f32 %v7432_v25, %v1619_v39  ;;  %v1621_v23 = vpop.f32.mrb[54].mxu0 }
 0x275   : > { %v2498_v62 = vmul.f32 0.2, %v2242_v13  ;;  %v2244_v37 = vadd.f32 %v7443_v29, %v1621_v23  ;;  %v1623_v56 = vpop.f32.mrb[55].mxu0  ;;  %3942 = vmatprep.subr.bf16.mxu0 %v2855_v30  ;;  %6084 = vmatprep.subr.bf16.mxu1 %v2855_v30  ;;  %vm2370_vm0 = vcmp.gt.f32.partialorder %v2242_v13, 0.0 }
 0x276   : > { %v2499_v1 = vmul.f32 0.2, %v2243_v11  ;;  %v2245_v28 = vadd.f32 %v7443_v29, %v1623_v56  ;;  %3943 = vmatpush1.bf16.msra.mxu0 %v2854_v47  ;;  %6100 = vmatpush1.bf16.msra.mxu1 %v2854_v47  ;;  %vm2371_vm6 = vcmp.gt.f32.partialorder %v2243_v11, 0.0 }
 0x277   : > { %vm2372_vm7 = vcmp.gt.f32.partialorder %v2244_v37, 0.0  ;;  %v2500_v42 = vmul.f32 0.2, %v2244_v37  ;;  %v2626_v10 = vsel %vm2370_vm0, %v2242_v13, %v2498_v62 }
 0x278   : > { %vm2373_vm8 = vcmp.gt.f32.partialorder %v2245_v28, 0.0  ;;  %v2501_v50 = vmul.f32 0.2, %v2245_v28  ;;  %v2627_v53 = vsel %vm2371_vm6, %v2243_v11, %v2499_v1  ;;  %v6601_v1 = vld [vmem:[%s8871_s5] ss:$16 sps:$4 sm:$0xff]  }
 0x279   : > { %v2628_v25 = vsel %vm2372_vm7, %v2244_v37, %v2500_v42 }
 0x27a   : > { %v2856_v14 = vpack.c.bf16 %v2628_v25, %v2626_v10  ;;  %v1627_v33 = vpop.f32.mrb[56].mxu0  ;;  %v2629_v5 = vsel %vm2373_vm8, %v2245_v28, %v2501_v50  ;;  %v6604_v28 = vld [vmem:[%s8871_s5 + $0x60] ss:$16 sps:$4 sm:$0xff]   ;;  %v6607_v25 = vld [vmem:[%s8871_s5 + $0x24] ss:$16 sps:$4 sm:$0xff]  }
 0x27b   : > { %v2246_v16 = vadd.f32 %v7449_v34, %v1627_v33  ;;  %v1629_v4 = vpop.f32.mrb[57].mxu0  ;;  %v2857_v59 = vpack.c.bf16 %v2629_v5, %v2627_v53  ;;  %v6609_v33 = vld [vmem:[%s8871_s5 + $0x84] ss:$16 sps:$4 sm:$0xff]  }
 0x27c   : > { %v2247_v38 = vadd.f32 %v7449_v34, %v1629_v4  ;;  %v1631_v29 = vpop.f32.mrb[58].mxu0 }
 0x27d   : > { %v2502_v57 = vmul.f32 0.2, %v2246_v16  ;;  %v2248_v15 = vadd.f32 %v7461_v40, %v1631_v29  ;;  %v1633_v45 = vpop.f32.mrb[59].mxu0  ;;  %3944 = vmatprep.subr.bf16.mxu0 %v2857_v59  ;;  %6085 = vmatprep.subr.bf16.mxu1 %v2857_v59  ;;  %vm2374_vm9 = vcmp.gt.f32.partialorder %v2246_v16, 0.0 }
 0x27e   : > { %v2503_v52 = vmul.f32 0.2, %v2247_v38  ;;  %v2249_v26 = vadd.f32 %v7461_v40, %v1633_v45  ;;  %3945 = vmatpush1.bf16.msra.mxu0 %v2856_v14  ;;  %6101 = vmatpush1.bf16.msra.mxu1 %v2856_v14  ;;  %vm2375_vm10 = vcmp.gt.f32.partialorder %v2247_v38, 0.0 }
 0x27f   : > { %vm2376_vm11 = vcmp.gt.f32.partialorder %v2248_v15, 0.0  ;;  %v2504_v51 = vmul.f32 0.2, %v2248_v15  ;;  %v2630_v6 = vsel %vm2374_vm9, %v2246_v16, %v2502_v57 }
 0x280   : > { %vm2377_vm12 = vcmp.gt.f32.partialorder %v2249_v26, 0.0  ;;  %v2505_v32 = vmul.f32 0.2, %v2249_v26  ;;  %v2631_v18 = vsel %vm2375_vm10, %v2247_v38, %v2503_v52 }
 0x281   : > { %v2632_v34 = vsel %vm2376_vm11, %v2248_v15, %v2504_v51  ;;  %v6611_v51 = vld [vmem:[%s8871_s5 + $0x20] ss:$16 sps:$4 sm:$0xff]  }
 0x282   : > { %v2858_v31 = vpack.c.bf16 %v2632_v34, %v2630_v6  ;;  %v1637_v60 = vpop.f32.mrb[60].mxu0  ;;  %v2633_v24 = vsel %vm2377_vm12, %v2249_v26, %v2505_v32  ;;  %v6612_v32 = vld [vmem:[%s8871_s5 + $0x80] ss:$16 sps:$4 sm:$0xff]  }
 0x283   : > { %v2250_v21 = vadd.f32 %v7466_v44, %v1637_v60  ;;  %v1639_v46 = vpop.f32.mrb[61].mxu0  ;;  %v2859_v41 = vpack.c.bf16 %v2633_v24, %v2631_v18  ;;  %v6613_v60 = vld [vmem:[%s8871_s5 + $0x44] ss:$16 sps:$4 sm:$0xff]  }
 0x284   : > { %v2251_v17 = vadd.f32 %v7466_v44, %v1639_v46  ;;  %v1641_v40 = vpop.f32.mrb[62].mxu0  ;;  %v6615_v24 = vld [vmem:[%s8871_s5 + $0xa4] ss:$16 sps:$4 sm:$0xff]  }
 0x285   : > { %v2506_v7 = vmul.f32 0.2, %v2250_v21  ;;  %v2252_v9 = vadd.f32 %v7476_v49, %v1641_v40  ;;  %v1643_v54 = vpop.f32.mrb[63].mxu0  ;;  %3946 = vmatprep.subr.bf16.mxu0 %v2859_v41  ;;  %6086 = vmatprep.subr.bf16.mxu1 %v2859_v41  ;;  %vm2378_vm13 = vcmp.gt.f32.partialorder %v2250_v21, 0.0 }
 0x286   : > { %v2507_v20 = vmul.f32 0.2, %v2251_v17  ;;  %v2253_v47 = vadd.f32 %v7476_v49, %v1643_v54  ;;  %3947 = vmatpush1.bf16.msra.mxu0 %v2858_v31  ;;  %6102 = vmatpush1.bf16.msra.mxu1 %v2858_v31  ;;  %vm2379_vm14 = vcmp.gt.f32.partialorder %v2251_v17, 0.0 }
 0x287   : > { %vm2380_vm15 = vcmp.gt.f32.partialorder %v2252_v9, 0.0  ;;  %v2508_v63 = vmul.f32 0.2, %v2252_v9  ;;  %v2634_v36 = vsel %vm2378_vm13, %v2250_v21, %v2506_v7 }
 0x288   : > { %vm2381_vm1 = vcmp.gt.f32.partialorder %v2253_v47, 0.0  ;;  %v2509_v3 = vmul.f32 0.2, %v2253_v47  ;;  %v2635_v30 = vsel %vm2379_vm14, %v2251_v17, %v2507_v20 }
 0x289   : > { %v2636_v44 = vsel %vm2380_vm15, %v2252_v9, %v2508_v63 }
 0x28a   : > { %v2860_v13 = vpack.c.bf16 %v2636_v44, %v2634_v36  ;;  %v1647_v39 = vpop.f32.mrb[64].mxu0  ;;  %v2637_v11 = vsel %vm2381_vm1, %v2253_v47, %v2509_v3  ;;  %v6617_v36 = vld [vmem:[%s8871_s5 + $0x40] ss:$16 sps:$4 sm:$0xff]  }
 0x28b   : > { %v2254_v23 = vadd.f32 %v7484_v55, %v1647_v39  ;;  %v1649_v62 = vpop.f32.mrb[65].mxu0  ;;  %v2861_v37 = vpack.c.bf16 %v2637_v11, %v2635_v30  ;;  %v6618_v30 = vld [vmem:[%s8871_s5 + $0xa0] ss:$16 sps:$4 sm:$0xff]  }
 0x28c   : > { %v2255_v56 = vadd.f32 %v7484_v55, %v1649_v62  ;;  %v1651_v49 = vpop.f32.mrb[66].mxu0 }
 0x28d   : > { %v2510_v42 = vmul.f32 0.2, %v2254_v23  ;;  %v2256_v50 = vadd.f32 %v7493_v61, %v1651_v49  ;;  %v1653_v10 = vpop.f32.mrb[67].mxu0  ;;  %3948 = vmatprep.subr.bf16.mxu0 %v2861_v37  ;;  %6087 = vmatprep.subr.bf16.mxu1 %v2861_v37  ;;  %vm2382_vm2 = vcmp.gt.f32.partialorder %v2254_v23, 0.0 }
 0x28e   : > { %v2511_v55 = vmul.f32 0.2, %v2255_v56  ;;  %v2257_v14 = vadd.f32 %v7493_v61, %v1653_v10  ;;  %3949 = vmatpush1.bf16.msra.mxu0 %v2860_v13  ;;  %6103 = vmatpush1.bf16.msra.mxu1 %v2860_v13  ;;  %vm2383_vm3 = vcmp.gt.f32.partialorder %v2255_v56, 0.0 }
 0x28f   : > { %vm2384_vm4 = vcmp.gt.f32.partialorder %v2256_v50, 0.0  ;;  %v2512_v53 = vmul.f32 0.2, %v2256_v50  ;;  %v2638_v16 = vsel %vm2382_vm2, %v2254_v23, %v2510_v42 }
 0x290   : > { %vm2385_vm5 = vcmp.gt.f32.partialorder %v2257_v14, 0.0  ;;  %v2513_v5 = vmul.f32 0.2, %v2257_v14  ;;  %v2639_v29 = vsel %vm2383_vm3, %v2255_v56, %v2511_v55 }
 0x291   : > { %v2640_v4 = vsel %vm2384_vm4, %v2256_v50, %v2512_v53  ;;  %3951 = vmatmul.mubr.bf16.vlgmr.msra.gmra.mrb[128].mxu0 %v6601_v1  ;;  %3981 = vmatmul.mubr.bf16.vlgmr.msra.gmra.mrb[0].mxu1 %v6604_v28 }
 0x292   : > { %v2862_v59 = vpack.c.bf16 %v2640_v4, %v2638_v16  ;;  %v1657_v38 = vpop.f32.mrb[68].mxu0  ;;  %v2641_v57 = vsel %vm2385_vm5, %v2257_v14, %v2513_v5  ;;  %3960 = vmatprep.mubr.bf16.mxu0 %v6607_v25  ;;  %3990 = vmatprep.mubr.bf16.mxu1 %v6609_v33  ;;  %v6621_v16 = vld [vmem:[%s8871_s5 + $0xc0] ss:$16 sps:$4 sm:$0xff]  }
 0x293   : > { %v2258_v61 = vadd.f32 %v7499_v0, %v1657_v38  ;;  %v1659_v15 = vpop.f32.mrb[69].mxu0  ;;  %v2863_v45 = vpack.c.bf16 %v2641_v57, %v2639_v29  ;;  %v6622_v38 = vld [vmem:[%s8871_s5 + $0xe4] ss:$16 sps:$4 sm:$0xff]  }
 0x294   : > { %v2259_v52 = vadd.f32 %v7499_v0, %v1659_v15  ;;  %v1661_v26 = vpop.f32.mrb[70].mxu0 }
 0x295   : > { %v2514_v6 = vmul.f32 0.2, %v2258_v61  ;;  %v2260_v34 = vadd.f32 %v7510_v8, %v1661_v26  ;;  %v1663_v31 = vpop.f32.mrb[71].mxu0  ;;  %4271 = vmatprep.subr.bf16.mxu1 %v2863_v45  ;;  %vm2386_vm0 = vcmp.gt.f32.partialorder %v2258_v61, 0.0 }
 0x296   : > { %v2515_v0 = vmul.f32 0.2, %v2259_v52  ;;  %v2261_v18 = vadd.f32 %v7510_v8, %v1663_v31  ;;  %4272 = vmatpush1.bf16.msra.mxu1 %v2862_v59  ;;  %vm2387_vm6 = vcmp.gt.f32.partialorder %v2259_v52, 0.0 }
 0x297   : > { %vm2388_vm7 = vcmp.gt.f32.partialorder %v2260_v34, 0.0  ;;  %v2516_v21 = vmul.f32 0.2, %v2260_v34  ;;  %v2642_v41 = vsel %vm2386_vm0, %v2258_v61, %v2514_v6 }
 0x298   : > { %vm2389_vm8 = vcmp.gt.f32.partialorder %v2261_v18, 0.0  ;;  %v2517_v46 = vmul.f32 0.2, %v2261_v18  ;;  %v2643_v9 = vsel %vm2387_vm6, %v2259_v52, %v2515_v0 }
 0x299   : > { %v2644_v17 = vsel %vm2388_vm7, %v2260_v34, %v2516_v21  ;;  %3961 = vmatmul.mubr.bf16.gmra.mrb[132].mxu0 %v6611_v51  ;;  %3991 = vmatmul.mubr.bf16.gmra.mrb[4].mxu1 %v6612_v32 }
 0x29a   : > { %v2864_v40 = vpack.c.bf16 %v2644_v17, %v2642_v41  ;;  %v1667_v7 = vpop.f32.mrb[72].mxu0  ;;  %v2645_v54 = vsel %vm2389_vm8, %v2261_v18, %v2517_v46  ;;  %3970 = vmatprep.mubr.bf16.mxu0 %v6613_v60  ;;  %4000 = vmatprep.mubr.bf16.mxu1 %v6615_v24  ;;  %v6624_v18 = vld [vmem:[%s8871_s5 + $0xe0] ss:$16 sps:$4 sm:$0xff]   ;;  %v6625_v46 = vld [vmem:[%s8871_s5 + $0x104] ss:$16 sps:$4 sm:$0xff]  }
 0x29b   : > { %v2262_v8 = vadd.f32 %v7516_v12, %v1667_v7  ;;  %v1669_v20 = vpop.f32.mrb[73].mxu0  ;;  %v2865_v47 = vpack.c.bf16 %v2645_v54, %v2643_v9 }
 0x29c   : > { %v2263_v63 = vadd.f32 %v7516_v12, %v1669_v20  ;;  %v1671_v3 = vpop.f32.mrb[74].mxu0  ;;  %v6619_v12 = vld [vmem:[%s8871_s5 + $0xc4] ss:$16 sps:$4 sm:$0xff]  }
 0x29d   : > { %v2518_v44 = vmul.f32 0.2, %v2262_v8  ;;  %v2264_v13 = vadd.f32 %v7528_v19, %v1671_v3  ;;  %v1673_v39 = vpop.f32.mrb[75].mxu0  ;;  %4273 = vmatprep.subr.bf16.mxu1 %v2865_v47  ;;  %vm2390_vm9 = vcmp.gt.f32.partialorder %v2262_v8, 0.0 }
 0x29e   : > { %v2519_v11 = vmul.f32 0.2, %v2263_v63  ;;  %v2265_v23 = vadd.f32 %v7528_v19, %v1673_v39  ;;  %4274 = vmatpush1.bf16.msra.mxu1 %v2864_v40  ;;  %vm2391_vm10 = vcmp.gt.f32.partialorder %v2263_v63, 0.0  ;;  %v6627_v39 = vld [vmem:[%s8871_s5 + $0x100] ss:$16 sps:$4 sm:$0xff]  }
 0x29f   : > { %vm2392_vm11 = vcmp.gt.f32.partialorder %v2264_v13, 0.0  ;;  %v2520_v62 = vmul.f32 0.2, %v2264_v13  ;;  %v2646_v56 = vsel %vm2390_vm9, %v2262_v8, %v2518_v44 }
 0x2a0   : > { %vm2393_vm12 = vcmp.gt.f32.partialorder %v2265_v23, 0.0  ;;  %v2521_v37 = vmul.f32 0.2, %v2265_v23  ;;  %v2647_v42 = vsel %vm2391_vm10, %v2263_v63, %v2519_v11 }
 0x2a1   : > { %v2648_v49 = vsel %vm2392_vm11, %v2264_v13, %v2520_v62  ;;  %3971 = vmatmul.mubr.bf16.gmra.mrb[136].mxu0 %v6617_v36  ;;  %4001 = vmatmul.mubr.bf16.gmra.mrb[8].mxu1 %v6618_v30 }
 0x2a2   : > { %v2866_v1 = vpack.c.bf16 %v2648_v49, %v2646_v56  ;;  %v1677_v28 = vpop.f32.mrb[76].mxu0  ;;  %v2649_v50 = vsel %vm2393_vm12, %v2265_v23, %v2521_v37  ;;  %4010 = vmatprep.mubr.bf16.mxu1 %v6619_v12  ;;  %v6628_v23 = vld [vmem:[%s8871_s5 + $0x124] ss:$16 sps:$4 sm:$0xff]  }
 0x2a3   : > { %v2266_v19 = vadd.f32 %v7533_v22, %v1677_v28  ;;  %v1679_v10 = vpop.f32.mrb[77].mxu0  ;;  %v2867_v25 = vpack.c.bf16 %v2649_v50, %v2647_v42 }
 0x2a4   : > { %v2267_v55 = vadd.f32 %v7533_v22, %v1679_v10  ;;  %v1681_v14 = vpop.f32.mrb[78].mxu0 }
 0x2a5   : > { %v2522_v33 = vmul.f32 0.2, %v2266_v19  ;;  %v2268_v53 = vadd.f32 %v7543_v27, %v1681_v14  ;;  %v1683_v5 = vpop.f32.mrb[79].mxu0  ;;  %4275 = vmatprep.subr.bf16.mxu1 %v2867_v25  ;;  %vm2394_vm13 = vcmp.gt.f32.partialorder %v2266_v19, 0.0 }
 0x2a6   : > { %v2523_v4 = vmul.f32 0.2, %v2267_v55  ;;  %v2269_v59 = vadd.f32 %v7543_v27, %v1683_v5  ;;  %4276 = vmatpush1.bf16.msra.mxu1 %v2866_v1  ;;  %vm2395_vm14 = vcmp.gt.f32.partialorder %v2267_v55, 0.0 }
 0x2a7   : > { %vm2396_vm15 = vcmp.gt.f32.partialorder %v2268_v53, 0.0  ;;  %v2524_v22 = vmul.f32 0.2, %v2268_v53  ;;  %v2650_v57 = vsel %vm2394_vm13, %v2266_v19, %v2522_v33 }
 0x2a8   : > { %vm2397_vm1 = vcmp.gt.f32.partialorder %v2269_v59, 0.0  ;;  %v2525_v29 = vmul.f32 0.2, %v2269_v59  ;;  %v2651_v52 = vsel %vm2395_vm14, %v2267_v55, %v2523_v4  ;;  %v8982_v55 = vld [vmem:[#allocation8_spill] sm:$0xff] }
 0x2a9   : > { %v2652_v61 = vsel %vm2396_vm15, %v2268_v53, %v2524_v22  ;;  %4011 = vmatmul.mubr.bf16.gmra.mrb[12].mxu1 %v6621_v16  ;;  %v6630_v53 = vld [vmem:[%s8871_s5 + $0x120] ss:$16 sps:$4 sm:$0xff]   ;;  %v6631_v4 = vld [vmem:[%s8871_s5 + $0x144] ss:$16 sps:$4 sm:$0xff]  }
 0x2aa   : > { %v2868_v15 = vpack.c.bf16 %v2652_v61, %v2650_v57  ;;  %v1687_v45 = vpop.f32.mrb[80].mxu0  ;;  %v2653_v26 = vsel %vm2397_vm1, %v2269_v59, %v2525_v29  ;;  %4020 = vmatprep.mubr.bf16.mxu1 %v6622_v38 }
 0x2ab   : > { %v2270_v27 = vadd.f32 %v7551_v35, %v1687_v45  ;;  %v1689_v51 = vpop.f32.mrb[81].mxu0  ;;  %v2869_v32 = vpack.c.bf16 %v2653_v26, %v2651_v52  ;;  %v8983_v45 = vld [vmem:[#allocation9_spill] sm:$0xff] }
 0x2ac   : > { %v2271_v6 = vadd.f32 %v7551_v35, %v1689_v51  ;;  %v1691_v34 = vpop.f32.mrb[82].mxu0 }
 0x2ad   : > { %v2526_v31 = vmul.f32 0.2, %v2270_v27  ;;  %v2272_v60 = vadd.f32 %v7560_v43, %v1691_v34  ;;  %v1693_v0 = vpop.f32.mrb[83].mxu0  ;;  %4277 = vmatprep.subr.bf16.mxu1 %v2869_v32  ;;  %vm2398_vm2 = vcmp.gt.f32.partialorder %v2270_v27, 0.0  ;;  %v8984_v34 = vld [vmem:[#allocation10_spill] sm:$0xff] }
 0x2ae   : > { %v2527_v24 = vmul.f32 0.2, %v2271_v6  ;;  %v2273_v21 = vadd.f32 %v7560_v43, %v1693_v0  ;;  %4278 = vmatpush1.bf16.msra.mxu1 %v2868_v15  ;;  %vm2399_vm3 = vcmp.gt.f32.partialorder %v2271_v6, 0.0  ;;  %v6633_v0 = vld [vmem:[%s8871_s5 + $0x140] ss:$16 sps:$4 sm:$0xff]  }
 0x2af   : > { %vm2400_vm4 = vcmp.gt.f32.partialorder %v2272_v60, 0.0  ;;  %v2528_v35 = vmul.f32 0.2, %v2272_v60  ;;  %v2654_v17 = vsel %vm2398_vm2, %v2270_v27, %v2526_v31 }
 0x2b0   : > { %vm2401_vm5 = vcmp.gt.f32.partialorder %v2273_v21, 0.0  ;;  %v2529_v41 = vmul.f32 0.2, %v2273_v21  ;;  %v2655_v54 = vsel %vm2399_vm3, %v2271_v6, %v2527_v24 }
 0x2b1   : > { %v2656_v40 = vsel %vm2400_vm4, %v2272_v60, %v2528_v35  ;;  %4021 = vmatmul.mubr.bf16.gmra.mrb[16].mxu1 %v6624_v18 }
 0x2b2   : > { %v2870_v7 = vpack.c.bf16 %v2656_v40, %v2654_v17  ;;  %v1697_v9 = vpop.f32.mrb[84].mxu0  ;;  %v2657_v8 = vsel %vm2401_vm5, %v2273_v21, %v2529_v41  ;;  %4030 = vmatprep.mubr.bf16.mxu1 %v6625_v46  ;;  %v6634_v21 = vld [vmem:[%s8871_s5 + $0x164] ss:$16 sps:$4 sm:$0xff]  }
 0x2b3   : > { %v2274_v43 = vadd.f32 %v7566_v48, %v1697_v9  ;;  %v1699_v20 = vpop.f32.mrb[85].mxu0  ;;  %v2871_v47 = vpack.c.bf16 %v2657_v8, %v2655_v54  ;;  %v8985_v8 = vld [vmem:[#allocation11_spill] sm:$0xff] }
 0x2b4   : > { %v2275_v63 = vadd.f32 %v7566_v48, %v1699_v20  ;;  %v1701_v3 = vpop.f32.mrb[86].mxu0 }
 0x2b5   : > { %v2530_v36 = vmul.f32 0.2, %v2274_v43  ;;  %v2276_v44 = vadd.f32 %v7577_v58, %v1701_v3  ;;  %v1703_v13 = vpop.f32.mrb[87].mxu0  ;;  %4279 = vmatprep.subr.bf16.mxu1 %v2871_v47  ;;  %vm2402_vm0 = vcmp.gt.f32.partialorder %v2274_v43, 0.0 }
 0x2b6   : > { %v2531_v30 = vmul.f32 0.2, %v2275_v63  ;;  %v2277_v11 = vadd.f32 %v7577_v58, %v1703_v13  ;;  %4280 = vmatpush1.bf16.msra.mxu1 %v2870_v7  ;;  %vm2403_vm6 = vcmp.gt.f32.partialorder %v2275_v63, 0.0 }
 0x2b7   : > { %vm2404_vm7 = vcmp.gt.f32.partialorder %v2276_v44, 0.0  ;;  %v2532_v48 = vmul.f32 0.2, %v2276_v44  ;;  %v2658_v62 = vsel %vm2402_vm0, %v2274_v43, %v2530_v36 }
 0x2b8   : > { %vm2405_vm8 = vcmp.gt.f32.partialorder %v2277_v11, 0.0  ;;  %v2533_v12 = vmul.f32 0.2, %v2277_v11  ;;  %v2659_v1 = vsel %vm2403_vm6, %v2275_v63, %v2531_v30  ;;  %v6636_v30 = vld [vmem:[%s8871_s5 + $0x160] ss:$16 sps:$4 sm:$0xff]  }
 0x2b9   : > { %v2660_v37 = vsel %vm2404_vm7, %v2276_v44, %v2532_v48  ;;  %4031 = vmatmul.mubr.bf16.gmra.mrb[20].mxu1 %v6627_v39  ;;  %v8986_v44 = vld [vmem:[#allocation12_spill] sm:$0xff] }
 0x2ba   : > { %v2872_v56 = vpack.c.bf16 %v2660_v37, %v2658_v62  ;;  %v1707_v49 = vpop.f32.mrb[88].mxu0  ;;  %v2661_v28 = vsel %vm2405_vm8, %v2277_v11, %v2533_v12  ;;  %4040 = vmatprep.mubr.bf16.mxu1 %v6628_v23  ;;  %v6637_v48 = vld [vmem:[%s8871_s5 + $0x184] ss:$16 sps:$4 sm:$0xff]  }
 0x2bb   : > { %v2278_v58 = vadd.f32 %v7583_v2, %v1707_v49  ;;  %v1709_v42 = vpop.f32.mrb[89].mxu0  ;;  %v2873_v50 = vpack.c.bf16 %v2661_v28, %v2659_v1 }
 0x2bc   : > { %v2279_v19 = vadd.f32 %v7583_v2, %v1709_v42  ;;  %v1711_v10 = vpop.f32.mrb[90].mxu0  ;;  %v8987_v42 = vld [vmem:[#allocation13_spill] sm:$0xff] }
 0x2bd   : > { %v2534_v25 = vmul.f32 0.2, %v2278_v58  ;;  %v2280_v14 = vadd.f32 %v8982_v55, %v1711_v10  ;;  %v1713_v33 = vpop.f32.mrb[91].mxu0  ;;  %4281 = vmatprep.subr.bf16.mxu1 %v2873_v50  ;;  %vm2406_vm9 = vcmp.gt.f32.partialorder %v2278_v58, 0.0 }
 0x2be   : > { %v2535_v5 = vmul.f32 0.2, %v2279_v19  ;;  %v2281_v16 = vadd.f32 %v8982_v55, %v1713_v33  ;;  %4282 = vmatpush1.bf16.msra.mxu1 %v2872_v56  ;;  %vm2407_vm10 = vcmp.gt.f32.partialorder %v2279_v19, 0.0  ;;  %v8988_v33 = vld [vmem:[#allocation14_spill] sm:$0xff] }
 0x2bf   : > { %vm2408_vm11 = vcmp.gt.f32.partialorder %v2280_v14, 0.0  ;;  %v2536_v2 = vmul.f32 0.2, %v2280_v14  ;;  %v2662_v38 = vsel %vm2406_vm9, %v2278_v58, %v2534_v25 }
 0x2c0   : > { %vm2409_vm12 = vcmp.gt.f32.partialorder %v2281_v16, 0.0  ;;  %v2537_v59 = vmul.f32 0.2, %v2281_v16  ;;  %v2663_v61 = vsel %vm2407_vm10, %v2279_v19, %v2535_v5 }
 0x2c1   : > { %v2664_v22 = vsel %vm2408_vm11, %v2280_v14, %v2536_v2  ;;  %4041 = vmatmul.mubr.bf16.gmra.mrb[24].mxu1 %v6630_v53 }
 0x2c2   : > { %v2874_v29 = vpack.c.bf16 %v2664_v22, %v2662_v38  ;;  %v1717_v57 = vpop.f32.mrb[92].mxu0  ;;  %v2665_v15 = vsel %vm2409_vm12, %v2281_v16, %v2537_v59  ;;  %4050 = vmatprep.mubr.bf16.mxu1 %v6631_v4  ;;  %v6639_v16 = vld [vmem:[%s8871_s5 + $0x180] ss:$16 sps:$4 sm:$0xff]   ;;  %v6640_v59 = vld [vmem:[%s8871_s5 + $0x1a4] ss:$16 sps:$4 sm:$0xff]  }
 0x2c3   : > { %v2282_v52 = vadd.f32 %v8983_v45, %v1717_v57  ;;  %v1719_v26 = vpop.f32.mrb[93].mxu0  ;;  %v2875_v27 = vpack.c.bf16 %v2665_v15, %v2663_v61 }
 0x2c4   : > { %v2283_v51 = vadd.f32 %v8983_v45, %v1719_v26  ;;  %v1721_v32 = vpop.f32.mrb[94].mxu0  ;;  %v8989_v26 = vld [vmem:[#allocation15_spill] sm:$0xff] }
 0x2c5   : > { %v2538_v6 = vmul.f32 0.2, %v2282_v52  ;;  %v2284_v31 = vadd.f32 %v8984_v34, %v1721_v32  ;;  %v1723_v60 = vpop.f32.mrb[95].mxu0  ;;  %4283 = vmatprep.subr.bf16.mxu1 %v2875_v27  ;;  %vm2410_vm13 = vcmp.gt.f32.partialorder %v2282_v52, 0.0 }
 0x2c6   : > { %v2539_v18 = vmul.f32 0.2, %v2283_v51  ;;  %v2285_v24 = vadd.f32 %v8984_v34, %v1723_v60  ;;  %4284 = vmatpush1.bf16.msra.mxu1 %v2874_v29  ;;  %vm2411_vm14 = vcmp.gt.f32.partialorder %v2283_v51, 0.0  ;;  %v8990_v60 = vld [vmem:[#allocation16_spill] sm:$0xff] }
 0x2c7   : > { %vm2412_vm15 = vcmp.gt.f32.partialorder %v2284_v31, 0.0  ;;  %v2540_v46 = vmul.f32 0.2, %v2284_v31  ;;  %v2666_v41 = vsel %vm2410_vm13, %v2282_v52, %v2538_v6 }
 0x2c8   : > { %vm2413_vm1 = vcmp.gt.f32.partialorder %v2285_v24, 0.0  ;;  %v2541_v35 = vmul.f32 0.2, %v2285_v24  ;;  %v2667_v9 = vsel %vm2411_vm14, %v2283_v51, %v2539_v18 }
 0x2c9   : > { %v2668_v17 = vsel %vm2412_vm15, %v2284_v31, %v2540_v46  ;;  %4051 = vmatmul.mubr.bf16.gmra.mrb[28].mxu1 %v6633_v0 }
 0x2ca   : > { %v2876_v40 = vpack.c.bf16 %v2668_v17, %v2666_v41  ;;  %v1727_v7 = vpop.f32.mrb[96].mxu0  ;;  %v2669_v54 = vsel %vm2413_vm1, %v2285_v24, %v2541_v35  ;;  %4060 = vmatprep.mubr.bf16.mxu1 %v6634_v21  ;;  %v6642_v24 = vld [vmem:[%s8871_s5 + $0x1a0] ss:$16 sps:$4 sm:$0xff]   ;;  %v6643_v35 = vld [vmem:[%s8871_s5 + $0x1c4] ss:$16 sps:$4 sm:$0xff]  }
 0x2cb   : > { %v2286_v43 = vadd.f32 %v8985_v8, %v1727_v7  ;;  %v1729_v20 = vpop.f32.mrb[97].mxu0  ;;  %v2877_v47 = vpack.c.bf16 %v2669_v54, %v2667_v9 }
 0x2cc   : > { %v2287_v63 = vadd.f32 %v8985_v8, %v1729_v20  ;;  %v1731_v3 = vpop.f32.mrb[98].mxu0  ;;  %v8991_v20 = vld [vmem:[#allocation17_spill] sm:$0xff] }
 0x2cd   : > { %v2542_v36 = vmul.f32 0.2, %v2286_v43  ;;  %v2288_v13 = vadd.f32 %v8986_v44, %v1731_v3  ;;  %v1733_v39 = vpop.f32.mrb[99].mxu0  ;;  %4285 = vmatprep.subr.bf16.mxu1 %v2877_v47  ;;  %vm2414_vm2 = vcmp.gt.f32.partialorder %v2286_v43, 0.0 }
 0x2ce   : > { %v2543_v11 = vmul.f32 0.2, %v2287_v63  ;;  %v2289_v23 = vadd.f32 %v8986_v44, %v1733_v39  ;;  %4286 = vmatpush1.bf16.msra.mxu1 %v2876_v40  ;;  %vm2415_vm3 = vcmp.gt.f32.partialorder %v2287_v63, 0.0  ;;  %v8992_v39 = vld [vmem:[#allocation18_spill] sm:$0xff] }
 0x2cf   : > { %vm2416_vm4 = vcmp.gt.f32.partialorder %v2288_v13, 0.0  ;;  %v2544_v12 = vmul.f32 0.2, %v2288_v13  ;;  %v2670_v37 = vsel %vm2414_vm2, %v2286_v43, %v2542_v36 }
 0x2d0   : > { %vm2417_vm5 = vcmp.gt.f32.partialorder %v2289_v23, 0.0  ;;  %v2545_v62 = vmul.f32 0.2, %v2289_v23  ;;  %v2671_v28 = vsel %vm2415_vm3, %v2287_v63, %v2543_v11 }
 0x2d1   : > { %v2672_v56 = vsel %vm2416_vm4, %v2288_v13, %v2544_v12  ;;  %4061 = vmatmul.mubr.bf16.gmra.mrb[32].mxu1 %v6636_v30 }
 0x2d2   : > { %v2878_v49 = vpack.c.bf16 %v2672_v56, %v2670_v37  ;;  %v1737_v1 = vpop.f32.mrb[100].mxu0  ;;  %v2673_v58 = vsel %vm2417_vm5, %v2289_v23, %v2545_v62  ;;  %4070 = vmatprep.mubr.bf16.mxu1 %v6637_v48  ;;  %v6645_v23 = vld [vmem:[%s8871_s5 + $0x1c0] ss:$16 sps:$4 sm:$0xff]   ;;  %v6646_v62 = vld [vmem:[%s8871_s5 + $0x1e4] ss:$16 sps:$4 sm:$0xff]  }
 0x2d3   : > { %v2290_v50 = vadd.f32 %v8987_v42, %v1737_v1  ;;  %v1739_v19 = vpop.f32.mrb[101].mxu0  ;;  %v2879_v10 = vpack.c.bf16 %v2673_v58, %v2671_v28 }
 0x2d4   : > { %v2291_v25 = vadd.f32 %v8987_v42, %v1739_v19  ;;  %v1741_v55 = vpop.f32.mrb[102].mxu0  ;;  %v8993_v19 = vld [vmem:[#allocation19_spill] sm:$0xff] }
 0x2d5   : > { %v2546_v14 = vmul.f32 0.2, %v2290_v50  ;;  %v2292_v53 = vadd.f32 %v8988_v33, %v1741_v55  ;;  %v1743_v5 = vpop.f32.mrb[103].mxu0  ;;  %4287 = vmatprep.subr.bf16.mxu1 %v2879_v10  ;;  %vm2418_vm0 = vcmp.gt.f32.partialorder %v2290_v50, 0.0 }
 0x2d6   : > { %v2547_v4 = vmul.f32 0.2, %v2291_v25  ;;  %v2293_v2 = vadd.f32 %v8988_v33, %v1743_v5  ;;  %4288 = vmatpush1.bf16.msra.mxu1 %v2878_v49  ;;  %vm2419_vm6 = vcmp.gt.f32.partialorder %v2291_v25, 0.0  ;;  %v8994_v5 = vld [vmem:[#allocation20_spill] sm:$0xff] }
 0x2d7   : > { %vm2420_vm7 = vcmp.gt.f32.partialorder %v2292_v53, 0.0  ;;  %v2548_v38 = vmul.f32 0.2, %v2292_v53  ;;  %v2674_v29 = vsel %vm2418_vm0, %v2290_v50, %v2546_v14 }
 0x2d8   : > { %vm2421_vm8 = vcmp.gt.f32.partialorder %v2293_v2, 0.0  ;;  %v2549_v22 = vmul.f32 0.2, %v2293_v2  ;;  %v2675_v45 = vsel %vm2419_vm6, %v2291_v25, %v2547_v4 }
 0x2d9   : > { %v2676_v57 = vsel %vm2420_vm7, %v2292_v53, %v2548_v38  ;;  %4071 = vmatmul.mubr.bf16.gmra.mrb[36].mxu1 %v6639_v16 }
 0x2da   : > { %v2880_v61 = vpack.c.bf16 %v2676_v57, %v2674_v29  ;;  %v1747_v15 = vpop.f32.mrb[104].mxu0  ;;  %v2677_v52 = vsel %vm2421_vm8, %v2293_v2, %v2549_v22  ;;  %4080 = vmatprep.mubr.bf16.mxu1 %v6640_v59  ;;  %v6648_v2 = vld [vmem:[%s8871_s5 + $0x1e0] ss:$16 sps:$4 sm:$0xff]   ;;  %v6649_v22 = vld [vmem:[%s8871_s5 + $0x204] ss:$16 sps:$4 sm:$0xff]  }
 0x2db   : > { %v2294_v27 = vadd.f32 %v8989_v26, %v1747_v15  ;;  %v1749_v51 = vpop.f32.mrb[105].mxu0  ;;  %v2881_v32 = vpack.c.bf16 %v2677_v52, %v2675_v45 }
 0x2dc   : > { %v2295_v6 = vadd.f32 %v8989_v26, %v1749_v51  ;;  %v1751_v34 = vpop.f32.mrb[106].mxu0  ;;  %v8995_v51 = vld [vmem:[#allocation21_spill] sm:$0xff] }
 0x2dd   : > { %v2550_v31 = vmul.f32 0.2, %v2294_v27  ;;  %v2296_v0 = vadd.f32 %v8990_v60, %v1751_v34  ;;  %v1753_v18 = vpop.f32.mrb[107].mxu0  ;;  %4289 = vmatprep.subr.bf16.mxu1 %v2881_v32  ;;  %vm2422_vm9 = vcmp.gt.f32.partialorder %v2294_v27, 0.0 }
 0x2de   : > { %v2551_v21 = vmul.f32 0.2, %v2295_v6  ;;  %v2297_v46 = vadd.f32 %v8990_v60, %v1753_v18  ;;  %4290 = vmatpush1.bf16.msra.mxu1 %v2880_v61  ;;  %vm2423_vm10 = vcmp.gt.f32.partialorder %v2295_v6, 0.0  ;;  %v8996_v18 = vld [vmem:[#allocation22_spill] sm:$0xff] }
 0x2df   : > { %vm2424_vm11 = vcmp.gt.f32.partialorder %v2296_v0, 0.0  ;;  %v2552_v41 = vmul.f32 0.2, %v2296_v0  ;;  %v2678_v40 = vsel %vm2422_vm9, %v2294_v27, %v2550_v31 }
 0x2e0   : > { %vm2425_vm12 = vcmp.gt.f32.partialorder %v2297_v46, 0.0  ;;  %v2553_v17 = vmul.f32 0.2, %v2297_v46  ;;  %v2679_v8 = vsel %vm2423_vm10, %v2295_v6, %v2551_v21 }
 0x2e1   : > { %v2680_v7 = vsel %vm2424_vm11, %v2296_v0, %v2552_v41  ;;  %4081 = vmatmul.mubr.bf16.gmra.mrb[40].mxu1 %v6642_v24 }
 0x2e2   : > { %v2882_v9 = vpack.c.bf16 %v2680_v7, %v2678_v40  ;;  %v1757_v54 = vpop.f32.mrb[108].mxu0  ;;  %v2681_v43 = vsel %vm2425_vm12, %v2297_v46, %v2553_v17  ;;  %4090 = vmatprep.mubr.bf16.mxu1 %v6643_v35  ;;  %v6651_v46 = vld [vmem:[%s8871_s5 + $0x200] ss:$16 sps:$4 sm:$0xff]   ;;  %v6652_v17 = vld [vmem:[%s8871_s5 + $0x224] ss:$16 sps:$4 sm:$0xff]  }
 0x2e3   : > { %v2298_v47 = vadd.f32 %v8991_v20, %v1757_v54  ;;  %v1759_v63 = vpop.f32.mrb[109].mxu0  ;;  %v2883_v3 = vpack.c.bf16 %v2681_v43, %v2679_v8 }
 0x2e4   : > { %v2299_v36 = vadd.f32 %v8991_v20, %v1759_v63  ;;  %v1761_v44 = vpop.f32.mrb[110].mxu0  ;;  %v8997_v63 = vld [vmem:[#allocation23_spill] sm:$0xff] }
 0x2e5   : > { %v2554_v13 = vmul.f32 0.2, %v2298_v47  ;;  %v2300_v30 = vadd.f32 %v8992_v39, %v1761_v44  ;;  %v1763_v11 = vpop.f32.mrb[111].mxu0  ;;  %4291 = vmatprep.subr.bf16.mxu1 %v2883_v3  ;;  %vm2426_vm13 = vcmp.gt.f32.partialorder %v2298_v47, 0.0 }
 0x2e6   : > { %v2555_v48 = vmul.f32 0.2, %v2299_v36  ;;  %v2301_v12 = vadd.f32 %v8992_v39, %v1763_v11  ;;  %4292 = vmatpush1.bf16.msra.mxu1 %v2882_v9  ;;  %vm2427_vm14 = vcmp.gt.f32.partialorder %v2299_v36, 0.0  ;;  %v8998_v11 = vld [vmem:[#allocation24_spill] sm:$0xff] }
 0x2e7   : > { %vm2428_vm15 = vcmp.gt.f32.partialorder %v2300_v30, 0.0  ;;  %v2556_v37 = vmul.f32 0.2, %v2300_v30  ;;  %v2682_v49 = vsel %vm2426_vm13, %v2298_v47, %v2554_v13 }
 0x2e8   : > { %vm2429_vm1 = vcmp.gt.f32.partialorder %v2301_v12, 0.0  ;;  %v2557_v56 = vmul.f32 0.2, %v2301_v12  ;;  %v2683_v42 = vsel %vm2427_vm14, %v2299_v36, %v2555_v48 }
 0x2e9   : > { %v2684_v1 = vsel %vm2428_vm15, %v2300_v30, %v2556_v37  ;;  %4091 = vmatmul.mubr.bf16.gmra.mrb[44].mxu1 %v6645_v23 }
 0x2ea   : > { %v2884_v28 = vpack.c.bf16 %v2684_v1, %v2682_v49  ;;  %v1767_v58 = vpop.f32.mrb[112].mxu0  ;;  %v2685_v50 = vsel %vm2429_vm1, %v2301_v12, %v2557_v56  ;;  %4100 = vmatprep.mubr.bf16.mxu1 %v6646_v62  ;;  %v6654_v12 = vld [vmem:[%s8871_s5 + $0x220] ss:$16 sps:$4 sm:$0xff]   ;;  %v6655_v56 = vld [vmem:[%s8871_s5 + $0x244] ss:$16 sps:$4 sm:$0xff]  }
 0x2eb   : > { %v2302_v10 = vadd.f32 %v8993_v19, %v1767_v58  ;;  %v1769_v25 = vpop.f32.mrb[113].mxu0  ;;  %v2885_v55 = vpack.c.bf16 %v2685_v50, %v2683_v42 }
 0x2ec   : > { %v2303_v14 = vadd.f32 %v8993_v19, %v1769_v25  ;;  %v1771_v33 = vpop.f32.mrb[114].mxu0  ;;  %v8999_v25 = vld [vmem:[#allocation25_spill] sm:$0xff] }
 0x2ed   : > { %v2558_v53 = vmul.f32 0.2, %v2302_v10  ;;  %v2304_v16 = vadd.f32 %v8994_v5, %v1771_v33  ;;  %v1773_v4 = vpop.f32.mrb[115].mxu0  ;;  %4293 = vmatprep.subr.bf16.mxu1 %v2885_v55  ;;  %vm2430_vm2 = vcmp.gt.f32.partialorder %v2302_v10, 0.0 }
 0x2ee   : > { %v2559_v59 = vmul.f32 0.2, %v2303_v14  ;;  %v2305_v38 = vadd.f32 %v8994_v5, %v1773_v4  ;;  %4294 = vmatpush1.bf16.msra.mxu1 %v2884_v28  ;;  %vm2431_vm3 = vcmp.gt.f32.partialorder %v2303_v14, 0.0  ;;  %v9000_v4 = vld [vmem:[#allocation26_spill] sm:$0xff] }
 0x2ef   : > { %vm2432_vm4 = vcmp.gt.f32.partialorder %v2304_v16, 0.0  ;;  %v2560_v29 = vmul.f32 0.2, %v2304_v16  ;;  %v2686_v61 = vsel %vm2430_vm2, %v2302_v10, %v2558_v53 }
 0x2f0   : > { %vm2433_vm5 = vcmp.gt.f32.partialorder %v2305_v38, 0.0  ;;  %v2561_v57 = vmul.f32 0.2, %v2305_v38  ;;  %v2687_v26 = vsel %vm2431_vm3, %v2303_v14, %v2559_v59 }
 0x2f1   : > { %v2688_v15 = vsel %vm2432_vm4, %v2304_v16, %v2560_v29  ;;  %4101 = vmatmul.mubr.bf16.gmra.mrb[48].mxu1 %v6648_v2 }
 0x2f2   : > { %v2886_v45 = vpack.c.bf16 %v2688_v15, %v2686_v61  ;;  %v1777_v52 = vpop.f32.mrb[116].mxu0  ;;  %v2689_v27 = vsel %vm2433_vm5, %v2305_v38, %v2561_v57  ;;  %4110 = vmatprep.mubr.bf16.mxu1 %v6649_v22  ;;  %v6657_v38 = vld [vmem:[%s8871_s5 + $0x240] ss:$16 sps:$4 sm:$0xff]   ;;  %v6658_v57 = vld [vmem:[%s8871_s5 + $0x264] ss:$16 sps:$4 sm:$0xff]  }
 0x2f3   : > { %v2306_v32 = vadd.f32 %v8995_v51, %v1777_v52  ;;  %v1779_v6 = vpop.f32.mrb[117].mxu0  ;;  %v2887_v34 = vpack.c.bf16 %v2689_v27, %v2687_v26 }
 0x2f4   : > { %v2307_v31 = vadd.f32 %v8995_v51, %v1779_v6  ;;  %v1781_v60 = vpop.f32.mrb[118].mxu0  ;;  %v6660_v6 = vld [vmem:[%s8871_s5 + $0x260] ss:$16 sps:$4 sm:$0xff]  }
 0x2f5   : > { %v2562_v0 = vmul.f32 0.2, %v2306_v32  ;;  %v2308_v24 = vadd.f32 %v8996_v18, %v1781_v60  ;;  %v1783_v21 = vpop.f32.mrb[119].mxu0  ;;  %4295 = vmatprep.subr.bf16.mxu1 %v2887_v34  ;;  %vm2434_vm0 = vcmp.gt.f32.partialorder %v2306_v32, 0.0  ;;  %v6661_v34 = vld [vmem:[%s8871_s5 + $0x284] ss:$16 sps:$4 sm:$0xff]  }
 0x2f6   : > { %v2563_v35 = vmul.f32 0.2, %v2307_v31  ;;  %v2309_v41 = vadd.f32 %v8996_v18, %v1783_v21  ;;  %4296 = vmatpush1.bf16.msra.mxu1 %v2886_v45  ;;  %vm2435_vm6 = vcmp.gt.f32.partialorder %v2307_v31, 0.0  ;;  %v6664_v60 = vld [vmem:[%s8871_s5 + $0x2a4] ss:$16 sps:$4 sm:$0xff]  }
 0x2f7   : > { %vm2436_vm7 = vcmp.gt.f32.partialorder %v2308_v24, 0.0  ;;  %v2564_v40 = vmul.f32 0.2, %v2308_v24  ;;  %v2690_v9 = vsel %vm2434_vm0, %v2306_v32, %v2562_v0  ;;  %v6666_v0 = vld [vmem:[%s8871_s5 + $0x2a0] ss:$16 sps:$4 sm:$0xff]  }
 0x2f8   : > { %vm2437_vm8 = vcmp.gt.f32.partialorder %v2309_v41, 0.0  ;;  %v2565_v7 = vmul.f32 0.2, %v2309_v41  ;;  %v2691_v20 = vsel %vm2435_vm6, %v2307_v31, %v2563_v35  ;;  %v6663_v31 = vld [vmem:[%s8871_s5 + $0x280] ss:$16 sps:$4 sm:$0xff]  }
 0x2f9   : > { %v2692_v54 = vsel %vm2436_vm7, %v2308_v24, %v2564_v40  ;;  %4111 = vmatmul.mubr.bf16.gmra.mrb[52].mxu1 %v6651_v46  ;;  %v6667_v18 = vld [vmem:[%s8871_s5 + $0x2c4] ss:$16 sps:$4 sm:$0xff]   ;;  %v6669_v24 = vld [vmem:[%s8871_s5 + $0x2c0] ss:$16 sps:$4 sm:$0xff]  }
 0x2fa   : > { %v2888_v8 = vpack.c.bf16 %v2692_v54, %v2690_v9  ;;  %v1787_v43 = vpop.f32.mrb[120].mxu0  ;;  %v2693_v47 = vsel %vm2437_vm8, %v2309_v41, %v2565_v7  ;;  %4120 = vmatprep.mubr.bf16.mxu1 %v6652_v17  ;;  %v6670_v21 = vld [vmem:[%s8871_s5 + $0x2e4] ss:$16 sps:$4 sm:$0xff]   ;;  %v6672_v46 = vld [vmem:[%s8871_s5 + $0x2e0] ss:$16 sps:$4 sm:$0xff]  }
 0x2fb   : > { %v2310_v3 = vadd.f32 %v8997_v63, %v1787_v43  ;;  %v1789_v36 = vpop.f32.mrb[121].mxu0  ;;  %v2889_v44 = vpack.c.bf16 %v2693_v47, %v2691_v20  ;;  %v6673_v35 = vld [vmem:[%s8871_s5 + $0x304] ss:$16 sps:$4 sm:$0xff]   ;;  %v6675_v41 = vld [vmem:[%s8871_s5 + $0x300] ss:$16 sps:$4 sm:$0xff]  }
 0x2fc   : > { %v2311_v13 = vadd.f32 %v8997_v63, %v1789_v36  ;;  %v1791_v39 = vpop.f32.mrb[122].mxu0  ;;  %v6676_v17 = vld [vmem:[%s8871_s5 + $0x324] ss:$16 sps:$4 sm:$0xff]   ;;  %v6678_v40 = vld [vmem:[%s8871_s5 + $0x320] ss:$16 sps:$4 sm:$0xff]  }
 0x2fd   : > { %v2566_v30 = vmul.f32 0.2, %v2310_v3  ;;  %v2312_v23 = vadd.f32 %v8998_v11, %v1791_v39  ;;  %v1793_v48 = vpop.f32.mrb[123].mxu0  ;;  %4297 = vmatprep.subr.bf16.mxu1 %v2889_v44  ;;  %vm2438_vm9 = vcmp.gt.f32.partialorder %v2310_v3, 0.0  ;;  %v6679_v7 = vld [vmem:[%s8871_s5 + $0x344] ss:$16 sps:$4 sm:$0xff]  }
 0x2fe   : > { %v2567_v62 = vmul.f32 0.2, %v2311_v13  ;;  %v2313_v37 = vadd.f32 %v8998_v11, %v1793_v48  ;;  %4298 = vmatpush1.bf16.msra.mxu1 %v2888_v8  ;;  %vm2439_vm10 = vcmp.gt.f32.partialorder %v2311_v13, 0.0  ;;  %v6681_v9 = vld [vmem:[%s8871_s5 + $0x340] ss:$16 sps:$4 sm:$0xff]  }
 0x2ff   : > { %vm2440_vm11 = vcmp.gt.f32.partialorder %v2312_v23, 0.0  ;;  %v2568_v49 = vmul.f32 0.2, %v2312_v23  ;;  %v2694_v28 = vsel %vm2438_vm9, %v2310_v3, %v2566_v30  ;;  %v6682_v54 = vld [vmem:[%s8871_s5 + $0x364] ss:$16 sps:$4 sm:$0xff]  }
 0x300   : > { %vm2441_vm12 = vcmp.gt.f32.partialorder %v2313_v37, 0.0  ;;  %v2569_v1 = vmul.f32 0.2, %v2313_v37  ;;  %v2695_v19 = vsel %vm2439_vm10, %v2311_v13, %v2567_v62  ;;  %v6684_v8 = vld [vmem:[%s8871_s5 + $0x360] ss:$16 sps:$4 sm:$0xff]  }
 0x301   : > { %v2696_v58 = vsel %vm2440_vm11, %v2312_v23, %v2568_v49  ;;  %4121 = vmatmul.mubr.bf16.gmra.mrb[56].mxu1 %v6654_v12  ;;  %v6685_v43 = vld [vmem:[%s8871_s5 + $0x384] ss:$16 sps:$4 sm:$0xff]   ;;  %v6687_v20 = vld [vmem:[%s8871_s5 + $0x380] ss:$16 sps:$4 sm:$0xff]  }
 0x302   : > { %v2890_v42 = vpack.c.bf16 %v2696_v58, %v2694_v28  ;;  %v1797_v50 = vpop.f32.mrb[124].mxu0  ;;  %v2697_v10 = vsel %vm2441_vm12, %v2313_v37, %v2569_v1  ;;  %4130 = vmatprep.mubr.bf16.mxu1 %v6655_v56  ;;  %v6688_v47 = vld [vmem:[%s8871_s5 + $0x3a4] ss:$16 sps:$4 sm:$0xff]   ;;  %v6690_v63 = vld [vmem:[%s8871_s5 + $0x3a0] ss:$16 sps:$4 sm:$0xff]  }
 0x303   : > { %v2314_v55 = vadd.f32 %v8999_v25, %v1797_v50  ;;  %v1799_v14 = vpop.f32.mrb[125].mxu0  ;;  %v2891_v33 = vpack.c.bf16 %v2697_v10, %v2695_v19  ;;  %v6691_v3 = vld [vmem:[%s8871_s5 + $0x3c4] ss:$16 sps:$4 sm:$0xff]   ;;  %v6693_v13 = vld [vmem:[%s8871_s5 + $0x3c0] ss:$16 sps:$4 sm:$0xff]  }
 0x304   : > { %v2315_v53 = vadd.f32 %v8999_v25, %v1799_v14  ;;  %v1801_v5 = vpop.f32.mrb[126].mxu0  ;;  %v6694_v30 = vld [vmem:[%s8871_s5 + $0x3e4] ss:$16 sps:$4 sm:$0xff]   ;;  %v6696_v12 = vld [vmem:[%s8871_s5 + $0x3e0] ss:$16 sps:$4 sm:$0xff]  }
 0x305   : > { %v2570_v16 = vmul.f32 0.2, %v2314_v55  ;;  %v2316_v2 = vadd.f32 %v9000_v4, %v1801_v5  ;;  %v1803_v59 = vpop.f32.mrb[127].mxu0  ;;  %4299 = vmatprep.subr.bf16.mxu1 %v2891_v33  ;;  %vm2442_vm13 = vcmp.gt.f32.partialorder %v2314_v55, 0.0  ;;  %v6699_v37 = vld [vmem:[%s8871_s5 + $0xc] ss:$16 sps:$4 sm:$0xff]  }
 0x306   : > { %v2571_v22 = vmul.f32 0.2, %v2315_v53  ;;  %v2317_v29 = vadd.f32 %v9000_v4, %v1803_v59  ;;  %4300 = vmatpush1.bf16.msra.mxu1 %v2890_v42  ;;  %vm2443_vm14 = vcmp.gt.f32.partialorder %v2315_v53, 0.0  ;;  %v6697_v28 = vld [vmem:[%s8871_s5 + $0x8] ss:$16 sps:$4 sm:$0xff]  }
 0x307   : > { %vm2444_vm15 = vcmp.gt.f32.partialorder %v2316_v2, 0.0  ;;  %v2572_v61 = vmul.f32 0.2, %v2316_v2  ;;  %v2698_v45 = vsel %vm2442_vm13, %v2314_v55, %v2570_v16  ;;  %v6700_v42 = vld [vmem:[%s8871_s5 + $0x2c] ss:$16 sps:$4 sm:$0xff]  }
 0x308   : > { %vm2445_vm1 = vcmp.gt.f32.partialorder %v2317_v29, 0.0  ;;  %v2573_v15 = vmul.f32 0.2, %v2317_v29  ;;  %v2699_v27 = vsel %vm2443_vm14, %v2315_v53, %v2571_v22  ;;  %v6702_v19 = vld [vmem:[%s8871_s5 + $0x28] ss:$16 sps:$4 sm:$0xff]  }
 0x309   : > { %v2700_v52 = vsel %vm2444_vm15, %v2316_v2, %v2572_v61  ;;  %4131 = vmatmul.mubr.bf16.gmra.mrb[60].mxu1 %v6657_v38  ;;  %v6703_v10 = vld [vmem:[%s8871_s5 + $0x4c] ss:$16 sps:$4 sm:$0xff]   ;;  %v6705_v25 = vld [vmem:[%s8871_s5 + $0x48] ss:$16 sps:$4 sm:$0xff]  }
 0x30a   : > { %v2892_v26 = vpack.c.bf16 %v2700_v52, %v2698_v45  ;;  %v2701_v51 = vsel %vm2445_vm1, %v2317_v29, %v2573_v15  ;;  %4140 = vmatprep.mubr.bf16.mxu1 %v6658_v57  ;;  %v6706_v55 = vld [vmem:[%s8871_s5 + $0x6c] ss:$16 sps:$4 sm:$0xff]   ;;  %v6708_v14 = vld [vmem:[%s8871_s5 + $0x68] ss:$16 sps:$4 sm:$0xff]  }
 0x30b   : > { %v2893_v32 = vpack.c.bf16 %v2701_v51, %v2699_v27  ;;  %v6709_v33 = vld [vmem:[%s8871_s5 + $0x8c] ss:$16 sps:$4 sm:$0xff]   ;;  %v6711_v53 = vld [vmem:[%s8871_s5 + $0x88] ss:$16 sps:$4 sm:$0xff]  }
 0x30c   : > { %v6712_v5 = vld [vmem:[%s8871_s5 + $0xac] ss:$16 sps:$4 sm:$0xff]   ;;  %v6714_v16 = vld [vmem:[%s8871_s5 + $0xa8] ss:$16 sps:$4 sm:$0xff]  }
 0x30d   : > { %4301 = vmatprep.subr.bf16.mxu1 %v2893_v32  ;;  %v6715_v4 = vld [vmem:[%s8871_s5 + $0xcc] ss:$16 sps:$4 sm:$0xff]   ;;  %v6717_v2 = vld [vmem:[%s8871_s5 + $0xc8] ss:$16 sps:$4 sm:$0xff]  }
 0x30e   : > { %4302 = vmatpush1.bf16.msra.mxu1 %v2892_v26  ;;  %v6718_v59 = vld [vmem:[%s8871_s5 + $0xec] ss:$16 sps:$4 sm:$0xff]   ;;  %v6720_v38 = vld [vmem:[%s8871_s5 + $0xe8] ss:$16 sps:$4 sm:$0xff]  }
 0x30f   : > { %v6721_v22 = vld [vmem:[%s8871_s5 + $0x10c] ss:$16 sps:$4 sm:$0xff]   ;;  %v6723_v29 = vld [vmem:[%s8871_s5 + $0x108] ss:$16 sps:$4 sm:$0xff]  }
 0x310   : > { %v6724_v57 = vld [vmem:[%s8871_s5 + $0x12c] ss:$16 sps:$4 sm:$0xff]   ;;  %v6726_v61 = vld [vmem:[%s8871_s5 + $0x128] ss:$16 sps:$4 sm:$0xff]  }
 0x311   : > { %4141 = vmatmul.mubr.bf16.gmra.mrb[64].mxu1 %v6660_v6  ;;  %v6727_v15 = vld [vmem:[%s8871_s5 + $0x14c] ss:$16 sps:$4 sm:$0xff]   ;;  %v6729_v45 = vld [vmem:[%s8871_s5 + $0x148] ss:$16 sps:$4 sm:$0xff]  }
 0x312   : > { %4150 = vmatprep.mubr.bf16.mxu1 %v6661_v34  ;;  %v6730_v52 = vld [vmem:[%s8871_s5 + $0x16c] ss:$16 sps:$4 sm:$0xff]   ;;  %v6732_v26 = vld [vmem:[%s8871_s5 + $0x168] ss:$16 sps:$4 sm:$0xff]  }
 0x313   : > { %v6733_v27 = vld [vmem:[%s8871_s5 + $0x18c] ss:$16 sps:$4 sm:$0xff]   ;;  %v6735_v51 = vld [vmem:[%s8871_s5 + $0x188] ss:$16 sps:$4 sm:$0xff]  }
 0x314   : > { %v6736_v32 = vld [vmem:[%s8871_s5 + $0x1ac] ss:$16 sps:$4 sm:$0xff]   ;;  %v6738_v6 = vld [vmem:[%s8871_s5 + $0x1a8] ss:$16 sps:$4 sm:$0xff]  }
 0x315   : > { %v6739_v34 = vld [vmem:[%s8871_s5 + $0x1cc] ss:$16 sps:$4 sm:$0xff]  }
 0x319   : > { %4151 = vmatmul.mubr.bf16.gmra.mrb[68].mxu1 %v6663_v31  ;;  %v6741_v31 = vld [vmem:[%s8871_s5 + $0x1c8] ss:$16 sps:$4 sm:$0xff]  }
 0x31a   : > { %4160 = vmatprep.mubr.bf16.mxu1 %v6664_v60  ;;  %v6742_v60 = vld [vmem:[%s8871_s5 + $0x1ec] ss:$16 sps:$4 sm:$0xff]  }
 0x321   : > { %4161 = vmatmul.mubr.bf16.gmra.mrb[72].mxu1 %v6666_v0  ;;  %v8511_v0 = vpop.permute.xlu1 %3115 }
 0x322   : > { %4170 = vmatprep.mubr.bf16.mxu1 %v6667_v18  ;;  %v6744_v18 = vld [vmem:[%s8871_s5 + $0x1e8] ss:$16 sps:$4 sm:$0xff]  }
 0x329   : > { %4171 = vmatmul.mubr.bf16.gmra.mrb[76].mxu1 %v6669_v24  ;;  %v6745_v24 = vld [vmem:[%s8871_s5 + $0x20c] ss:$16 sps:$4 sm:$0xff]  }
 0x32a   : > { %4180 = vmatprep.mubr.bf16.mxu1 %v6670_v21  ;;  %v8519_v21 = vpop.permute.xlu0 %3120 }
 0x331   : > { %4181 = vmatmul.mubr.bf16.gmra.mrb[80].mxu1 %v6672_v46  ;;  %v8521_v46 = vpop.permute.xlu1 %3125 }
 0x332   : > { %4190 = vmatprep.mubr.bf16.mxu1 %v6673_v35  ;;  %v6747_v35 = vld [vmem:[%s8871_s5 + $0x208] ss:$16 sps:$4 sm:$0xff]  }
 0x339   : > { %4191 = vmatmul.mubr.bf16.gmra.mrb[84].mxu1 %v6675_v41  ;;  %v6748_v41 = vld [vmem:[%s8871_s5 + $0x22c] ss:$16 sps:$4 sm:$0xff]  }
 0x33a   : > { %4200 = vmatprep.mubr.bf16.mxu1 %v6676_v17  ;;  %v8529_v17 = vpop.permute.xlu0 %3130 }
 0x341   : > { %4201 = vmatmul.mubr.bf16.gmra.mrb[88].mxu1 %v6678_v40  ;;  %v8531_v40 = vpop.permute.xlu1 %3135 }
 0x342   : > { %4210 = vmatprep.mubr.bf16.mxu1 %v6679_v7  ;;  %v6750_v7 = vld [vmem:[%s8871_s5 + $0x228] ss:$16 sps:$4 sm:$0xff]  }
 0x349   : > { %4211 = vmatmul.mubr.bf16.gmra.mrb[92].mxu1 %v6681_v9  ;;  %v8536_v9 = vpop.permute.xlu0 %3140 }
 0x34a   : > { %4220 = vmatprep.mubr.bf16.mxu1 %v6682_v54  ;;  %v6751_v54 = vld [vmem:[%s8871_s5 + $0x24c] ss:$16 sps:$4 sm:$0xff]  }
 0x351   : > { %4221 = vmatmul.mubr.bf16.gmra.mrb[96].mxu1 %v6684_v8  ;;  %v8541_v8 = vpop.permute.xlu1 %3145 }
 0x352   : > { %4230 = vmatprep.mubr.bf16.mxu1 %v6685_v43  ;;  %v8543_v43 = vpop.permute.xlu0 %3150 }
 0x359   : > { %4231 = vmatmul.mubr.bf16.gmra.mrb[100].mxu1 %v6687_v20  ;;  %v8545_v20 = vpop.permute.xlu1 %3155 }
 0x35a   : > { %4240 = vmatprep.mubr.bf16.mxu1 %v6688_v47  ;;  %v6753_v47 = vld [vmem:[%s8871_s5 + $0x248] ss:$16 sps:$4 sm:$0xff]  }
 0x361   : > { %4241 = vmatmul.mubr.bf16.gmra.mrb[104].mxu1 %v6690_v63  ;;  %v6754_v63 = vld [vmem:[%s8871_s5 + $0x26c] ss:$16 sps:$4 sm:$0xff]  }
 0x362   : > { %4250 = vmatprep.mubr.bf16.mxu1 %v6691_v3  ;;  %v8553_v3 = vpop.permute.xlu0 %3160 }
 0x364   : > { %v8385_v36 = vpop.f32.mrb[128].mxu0 }
 0x365   : > { %v8387_v44 = vpop.f32.mrb[129].mxu0 }
 0x366   : > { %v8392_v39 = vpop.f32.mrb[130].mxu0 }
 0x367   : > { %v8397_v11 = vpop.f32.mrb[131].mxu0 }
 0x369   : > { %4251 = vmatmul.mubr.bf16.gmra.mrb[108].mxu1 %v6693_v13  ;;  %v8555_v13 = vpop.permute.xlu1 %3165 }
 0x36a   : > { %4260 = vmatprep.mubr.bf16.mxu1 %v6694_v30  ;;  %v6756_v30 = vld [vmem:[%s8871_s5 + $0x268] ss:$16 sps:$4 sm:$0xff]  }
 0x36c   : > { %v8399_v23 = vpop.f32.mrb[132].mxu0 }
 0x36d   : > { %v8401_v48 = vpop.f32.mrb[133].mxu0 }
 0x36e   : > { %v8406_v62 = vpop.f32.mrb[134].mxu0 }
 0x36f   : > { %v8411_v56 = vpop.f32.mrb[135].mxu0 }
 0x371   : > { %4261 = vmatmul.mubr.bf16.gmra.mrb[112].mxu1 %v6696_v12  ;;  %v6757_v12 = vld [vmem:[%s8871_s5 + $0x28c] ss:$16 sps:$4 sm:$0xff]  }
 0x372   : > { %4303 = vmatprep.mubr.bf16.mxu1 %v6699_v37  ;;  %v8563_v37 = vpop.permute.xlu0 %3170 }
 0x374   : > { %v8413_v49 = vpop.f32.mrb[136].mxu0 }
 0x375   : > { %v8415_v1 = vpop.f32.mrb[137].mxu0 }
 0x376   : > { %v8420_v58 = vpop.f32.mrb[138].mxu0 }
 0x377   : > { %v8425_v50 = vpop.f32.mrb[139].mxu0 }
 0x379   : > { %4304 = vmatmul.mubr.bf16.vlgmr.msra.gmra.mrb[116].mxu1 %v6697_v28  ;;  %v8565_v28 = vpop.permute.xlu1 %3175 }
 0x37a   : > { %4313 = vmatprep.mubr.bf16.mxu1 %v6700_v42  ;;  %v6759_v42 = vld [vmem:[%s8871_s5 + $0x288] ss:$16 sps:$4 sm:$0xff]  }
 0x381   : > { %4314 = vmatmul.mubr.bf16.gmra.mrb[120].mxu1 %v6702_v19  ;;  %v8570_v19 = vpop.permute.xlu0 %3180 }
 0x382   : > { %4323 = vmatprep.mubr.bf16.mxu1 %v6703_v10  ;;  %v6760_v10 = vld [vmem:[%s8871_s5 + $0x2ac] ss:$16 sps:$4 sm:$0xff]  }
 0x389   : > { %4324 = vmatmul.mubr.bf16.gmra.mrb[124].mxu1 %v6705_v25  ;;  %v8575_v25 = vpop.permute.xlu1 %3185 }
 0x38a   : > { %4333 = vmatprep.mubr.bf16.mxu1 %v6706_v55  ;;  %v8577_v55 = vpop.permute.xlu0 %3190 }
 0x391   : > { %4334 = vmatmul.mubr.bf16.gmra.mrb[0].mxu1 %v6708_v14  ;;  %v8579_v14 = vpop.permute.xlu1 %3195 }
 0x392   : > { %4343 = vmatprep.mubr.bf16.mxu1 %v6709_v33  ;;  %v6762_v33 = vld [vmem:[%s8871_s5 + $0x2a8] ss:$16 sps:$4 sm:$0xff]  }
 0x399   : > { %4344 = vmatmul.mubr.bf16.gmra.mrb[4].mxu1 %v6711_v53  ;;  %v6763_v53 = vld [vmem:[%s8871_s5 + $0x2cc] ss:$16 sps:$4 sm:$0xff]  }
 0x39a   : > { %4353 = vmatprep.mubr.bf16.mxu1 %v6712_v5  ;;  %v8587_v5 = vpop.permute.xlu0 %3200 }
 0x3a1   : > { %4354 = vmatmul.mubr.bf16.gmra.mrb[8].mxu1 %v6714_v16  ;;  %v8589_v16 = vpop.permute.xlu1 %3205 }
 0x3a2   : > { %4363 = vmatprep.mubr.bf16.mxu1 %v6715_v4  ;;  %v6765_v4 = vld [vmem:[%s8871_s5 + $0x2c8] ss:$16 sps:$4 sm:$0xff]  }
 0x3a9   : > { %4364 = vmatmul.mubr.bf16.gmra.mrb[12].mxu1 %v6717_v2  ;;  %v6766_v2 = vld [vmem:[%s8871_s5 + $0x2ec] ss:$16 sps:$4 sm:$0xff]  }
 0x3aa   : > { %4373 = vmatprep.mubr.bf16.mxu1 %v6718_v59  ;;  %v8597_v59 = vpop.permute.xlu0 %3210 }
 0x3b1   : > { %4374 = vmatmul.mubr.bf16.gmra.mrb[16].mxu1 %v6720_v38  ;;  %v8599_v38 = vpop.permute.xlu1 %3215 }
 0x3b2   : > { %4383 = vmatprep.mubr.bf16.mxu1 %v6721_v22  ;;  %v6768_v22 = vld [vmem:[%s8871_s5 + $0x2e8] ss:$16 sps:$4 sm:$0xff]  }
 0x3b9   : > { %4384 = vmatmul.mubr.bf16.gmra.mrb[20].mxu1 %v6723_v29  ;;  %v8604_v29 = vpop.permute.xlu0 %3220 }
 0x3ba   : > { %4393 = vmatprep.mubr.bf16.mxu1 %v6724_v57  ;;  %v6769_v57 = vld [vmem:[%s8871_s5 + $0x30c] ss:$16 sps:$4 sm:$0xff]  }
 0x3c1   : > { %4394 = vmatmul.mubr.bf16.gmra.mrb[24].mxu1 %v6726_v61  ;;  %v8609_v61 = vpop.permute.xlu1 %3225 }
 0x3c2   : > { %4403 = vmatprep.mubr.bf16.mxu1 %v6727_v15  ;;  %v8611_v15 = vpop.permute.xlu0 %3230 }
 0x3c9   : > { %4404 = vmatmul.mubr.bf16.gmra.mrb[28].mxu1 %v6729_v45  ;;  %v8613_v45 = vpop.permute.xlu1 %3235 }
 0x3ca   : > { %4413 = vmatprep.mubr.bf16.mxu1 %v6730_v52  ;;  %v6771_v52 = vld [vmem:[%s8871_s5 + $0x308] ss:$16 sps:$4 sm:$0xff]  }
 0x3d1   : > { %4414 = vmatmul.mubr.bf16.gmra.mrb[32].mxu1 %v6732_v26  ;;  %v6772_v26 = vld [vmem:[%s8871_s5 + $0x32c] ss:$16 sps:$4 sm:$0xff]  }
 0x3d2   : > { %4423 = vmatprep.mubr.bf16.mxu1 %v6733_v27  ;;  %v8621_v27 = vpop.permute.xlu0 %3240 }
 0x3d9   : > { %4424 = vmatmul.mubr.bf16.gmra.mrb[36].mxu1 %v6735_v51  ;;  %v8623_v51 = vpop.permute.xlu1 %3245 }
 0x3da   : > { %4433 = vmatprep.mubr.bf16.mxu1 %v6736_v32  ;;  %v6774_v32 = vld [vmem:[%s8871_s5 + $0x328] ss:$16 sps:$4 sm:$0xff]  }
 0x3e1   : > { %4434 = vmatmul.mubr.bf16.gmra.mrb[40].mxu1 %v6738_v6  ;;  %v6775_v6 = vld [vmem:[%s8871_s5 + $0x34c] ss:$16 sps:$4 sm:$0xff]  }
 0x3e2   : > { %4443 = vmatprep.mubr.bf16.mxu1 %v6739_v34  ;;  %v8631_v34 = vpop.permute.xlu0 %3250 }
 0x3e9   : > { %4444 = vmatmul.mubr.bf16.gmra.mrb[44].mxu1 %v6741_v31  ;;  %v8633_v31 = vpop.permute.xlu1 %3255 }
 0x3ea   : > { %4453 = vmatprep.mubr.bf16.mxu1 %v6742_v60  ;;  %v6777_v60 = vld [vmem:[%s8871_s5 + $0x348] ss:$16 sps:$4 sm:$0xff]  }
 0x3f1   : > { %4454 = vmatmul.mubr.bf16.gmra.mrb[48].mxu1 %v6744_v18  ;;  %v8638_v18 = vpop.permute.xlu0 %3260 }
 0x3f2   : > { %4463 = vmatprep.mubr.bf16.mxu1 %v6745_v24  ;;  %v6778_v24 = vld [vmem:[%s8871_s5 + $0x36c] ss:$16 sps:$4 sm:$0xff]  }
 0x3f9   : > { %4464 = vmatmul.mubr.bf16.gmra.mrb[52].mxu1 %v6747_v35  ;;  %v8643_v35 = vpop.permute.xlu1 %3265 }
 0x3fa   : > { %4473 = vmatprep.mubr.bf16.mxu1 %v6748_v41  ;;  %v9001_v41 = vld [vmem:[#allocation27_spill] sm:$0xff] }
 0x401   : > { %4474 = vmatmul.mubr.bf16.gmra.mrb[56].mxu1 %v6750_v7  ;;  %v3953_v7 = vadd.f32 %v8385_v36, %v9001_v41 }
 0x402   : > { %4483 = vmatprep.mubr.bf16.mxu1 %v6751_v54  ;;  %v8647_v54 = vpop.permute.xlu0 %3270 }
 0x409   : > { %4484 = vmatmul.mubr.bf16.gmra.mrb[60].mxu1 %v6753_v47  ;;  %v3955_v47 = vadd.f32 %v8387_v44, %v9001_v41  ;;  %v6781_v44 = vld [vmem:[%s8871_s5 + $0x38c] ss:$16 sps:$4 sm:$0xff]  }
 0x40a   : > { %4493 = vmatprep.mubr.bf16.mxu1 %v6754_v63 }
 0x411   : > { %4494 = vmatmul.mubr.bf16.gmra.mrb[64].mxu1 %v6756_v30  ;;  %v8651_v30 = vpop.permute.xlu1 %3275 }
 0x412   : > { %4503 = vmatprep.mubr.bf16.mxu1 %v6757_v12  ;;  %v9002_v12 = vld [vmem:[#allocation28_spill] sm:$0xff] }
 0x413   : > { %v3959_v36 = vadd.f32 %v8397_v11, %v9002_v12 }
 0x415   : > { %v5080_v41 = vpop.permute.xlu1 %5079 }
 0x419   : > { %4504 = vmatmul.mubr.bf16.gmra.mrb[68].mxu1 %v6759_v42  ;;  %v3957_v42 = vadd.f32 %v8392_v39, %v9002_v12 }
 0x41a   : > { %4513 = vmatprep.mubr.bf16.mxu1 %v6760_v10 }
 0x421   : > { %4514 = vmatmul.mubr.bf16.gmra.mrb[72].mxu1 %v6762_v33 }
 0x422   : > { %4523 = vmatprep.mubr.bf16.mxu1 %v6763_v53  ;;  %v6780_v53 = vld [vmem:[%s8871_s5 + $0x368] ss:$16 sps:$4 sm:$0xff]  }
 0x429   : > { %4524 = vmatmul.mubr.bf16.gmra.mrb[76].mxu1 %v6765_v4 }
 0x42a   : > { %4533 = vmatprep.mubr.bf16.mxu1 %v6766_v2 }
 0x431   : > { %4534 = vmatmul.mubr.bf16.gmra.mrb[80].mxu1 %v6768_v22 }
 0x432   : > { %4543 = vmatprep.mubr.bf16.mxu1 %v6769_v57 }
 0x439   : > { %4544 = vmatmul.mubr.bf16.gmra.mrb[84].mxu1 %v6771_v52 }
 0x43a   : > { %4553 = vmatprep.mubr.bf16.mxu1 %v6772_v26 }
 0x441   : > { %4554 = vmatmul.mubr.bf16.gmra.mrb[88].mxu1 %v6774_v32 }
 0x442   : > { %4563 = vmatprep.mubr.bf16.mxu1 %v6775_v6 }
 0x449   : > { %4564 = vmatmul.mubr.bf16.gmra.mrb[92].mxu1 %v6777_v60 }
 0x44a   : > { %4573 = vmatprep.mubr.bf16.mxu1 %v6778_v24  ;;  %v5075_v24 = vpop.permute.xlu0 %5074 }
 0x44c   : > { %v4305_v63 = vpop.f32.mrb[116].mxu1 }
 0x44d   : > { %v4306_v10 = vadd.f32 %v4305_v63, %v3953_v7  ;;  %v4307_v33 = vpop.f32.mrb[117].mxu1  ;;  %v9003_v7 = vld [vmem:[#allocation29_spill] sm:$0xff] }
 0x44e   : > { %v4308_v4 = vadd.f32 %v4307_v33, %v3955_v47  ;;  %v4309_v2 = vpop.f32.mrb[118].mxu1  ;;  %v3963_v47 = vadd.f32 %v8399_v23, %v9003_v7  ;;  %v3965_v12 = vadd.f32 %v8401_v48, %v9003_v7  ;;  %v5085_v7 = vpop.permute.xlu0 %5084 }
 0x44f   : > { %vm4624_vm2 = vcmp.gt.f32.partialorder %v4306_v10, 0.0  ;;  %v4752_v22 = vmul.f32 0.2, %v4306_v10  ;;  %v4310_v57 = vadd.f32 %v4309_v2, %v3957_v42  ;;  %v4311_v52 = vpop.f32.mrb[119].mxu1  ;;  %v9004_v2 = vld [vmem:[#allocation30_spill] sm:$0xff] }
 0x450   : > { %vm4625_vm3 = vcmp.gt.f32.partialorder %v4308_v4, 0.0  ;;  %v4753_v39 = vmul.f32 0.2, %v4308_v4  ;;  %v4312_v26 = vadd.f32 %v4311_v52, %v3959_v36  ;;  %v3969_v23 = vadd.f32 %v8411_v56, %v9004_v2 }
 0x451   : > { %v4880_v32 = vsel %vm4624_vm2, %v4306_v10, %v4752_v22  ;;  %vm4626_vm4 = vcmp.gt.f32.partialorder %v4310_v57, 0.0  ;;  %v4754_v6 = vmul.f32 0.2, %v4310_v57  ;;  %4574 = vmatmul.mubr.bf16.gmra.mrb[96].mxu1 %v6780_v53  ;;  %v3967_v53 = vadd.f32 %v8406_v62, %v9004_v2 }
 0x452   : > { %v4881_v60 = vsel %vm4625_vm3, %v4308_v4, %v4753_v39  ;;  %vm4627_vm5 = vcmp.gt.f32.partialorder %v4312_v26, 0.0  ;;  %v4755_v11 = vmul.f32 0.2, %v4312_v26  ;;  %4583 = vmatprep.mubr.bf16.mxu1 %v6781_v44  ;;  %v5392_v42 = vmul.f32 %v5075_v24, %v4880_v32  ;;  %v6783_v39 = vld [vmem:[%s8871_s5 + $0x388] ss:$16 sps:$4 sm:$0xff]  }
 0x453   : > { %v4882_v63 = vsel %vm4626_vm4, %v4310_v57, %v4754_v6  ;;  %v5393_v4 = vmul.f32 %v5075_v24, %v4881_v60 }
 0x454   : > { %v5394_v33 = vmul.f32 %v5080_v41, %v4882_v63  ;;  %v4883_v36 = vsel %vm4627_vm5, %v4312_v26, %v4755_v11  ;;  %v4315_v10 = vpop.f32.mrb[120].mxu1  ;;  %v6784_v26 = vld [vmem:[%s8871_s5 + $0x3ac] ss:$16 sps:$4 sm:$0xff]  }
 0x455   : > { %v5395_v22 = vmul.f32 %v5080_v41, %v4883_v36  ;;  %v4316_v52 = vadd.f32 %v4315_v10, %v3963_v47  ;;  %v4317_v44 = vpop.f32.mrb[121].mxu1  ;;  %v9005_v36 = vld [vmem:[#allocation31_spill] sm:$0xff] }
 0x456   : > { %v5520_v57 = vadd.f32 %v5394_v33, %v5392_v42  ;;  %v4318_v48 = vadd.f32 %v4317_v44, %v3965_v12  ;;  %v4319_v32 = vpop.f32.mrb[122].mxu1  ;;  %v5090_v33 = vpop.permute.xlu1 %5089  ;;  %v3973_v10 = vadd.f32 %v8413_v49, %v9005_v36  ;;  %v6786_v49 = vld [vmem:[%s8871_s5 + $0x3a8] ss:$16 sps:$4 sm:$0xff]  }
 0x457   : > { %v5589_v6 = vadd.f32 %v5395_v22, %v5393_v4  ;;  %vm4628_vm0 = vcmp.gt.f32.partialorder %v4316_v52, 0.0  ;;  %v4756_v62 = vmul.f32 0.2, %v4316_v52  ;;  %v4320_v60 = vadd.f32 %v4319_v32, %v3967_v53  ;;  %v4321_v11 = vpop.f32.mrb[123].mxu1  ;;  %v9006_v32 = vld [vmem:[#allocation32_spill] sm:$0xff] }
 0x458   : > { %vm4629_vm6 = vcmp.gt.f32.partialorder %v4318_v48, 0.0  ;;  %v4757_v24 = vmul.f32 0.2, %v4318_v48  ;;  %v4322_v41 = vadd.f32 %v4321_v11, %v3969_v23  ;;  %v3975_v4 = vadd.f32 %v8415_v1, %v9005_v36 }
 0x459   : > { %v4884_v47 = vsel %vm4628_vm0, %v4316_v52, %v4756_v62  ;;  %vm4630_vm7 = vcmp.gt.f32.partialorder %v4320_v60, 0.0  ;;  %v4758_v63 = vmul.f32 0.2, %v4320_v60  ;;  %4584 = vmatmul.mubr.bf16.gmra.mrb[100].mxu1 %v6783_v39  ;;  %v3977_v39 = vadd.f32 %v8420_v58, %v9006_v32 }
 0x45a   : > { %v5396_v56 = vmul.f32 %v5085_v7, %v4884_v47  ;;  %v4885_v12 = vsel %vm4629_vm6, %v4318_v48, %v4757_v24  ;;  %vm4631_vm8 = vcmp.gt.f32.partialorder %v4322_v41, 0.0  ;;  %v4759_v42 = vmul.f32 0.2, %v4322_v41  ;;  %4593 = vmatprep.mubr.bf16.mxu1 %v6784_v26 }
 0x45b   : > { %v5397_v2 = vmul.f32 %v5085_v7, %v4885_v12  ;;  %v4886_v53 = vsel %vm4630_vm7, %v4320_v60, %v4758_v63  ;;  %v3979_v60 = vadd.f32 %v8425_v50, %v9006_v32  ;;  %v5095_v12 = vpop.permute.xlu0 %5094 }
 0x45c   : > { %v5521_v22 = vadd.f32 %v5520_v57, %v5396_v56  ;;  %v5398_v44 = vmul.f32 %v5090_v33, %v4886_v53  ;;  %v4887_v52 = vsel %vm4631_vm8, %v4322_v41, %v4759_v42  ;;  %v4325_v23 = vpop.f32.mrb[124].mxu1  ;;  %v6787_v41 = vld [vmem:[%s8871_s5 + $0x3cc] ss:$16 sps:$4 sm:$0xff]  }
 0x45d   : > { %v5590_v48 = vadd.f32 %v5589_v6, %v5397_v2  ;;  %v5399_v62 = vmul.f32 %v5090_v33, %v4887_v52  ;;  %v4326_v11 = vadd.f32 %v4325_v23, %v3973_v10  ;;  %v4327_v26 = vpop.f32.mrb[125].mxu1  ;;  %v5100_v2 = vpop.permute.xlu1 %5099 }
 0x45e   : > { %v5522_v24 = vadd.f32 %v5521_v22, %v5398_v44  ;;  %v4328_v1 = vadd.f32 %v4327_v26, %v3975_v4  ;;  %v4329_v57 = vpop.f32.mrb[126].mxu1  ;;  %v6789_v26 = vld [vmem:[%s8871_s5 + $0x3c8] ss:$16 sps:$4 sm:$0xff]  }
 0x45f   : > { %v5591_v7 = vadd.f32 %v5590_v48, %v5399_v62  ;;  %vm4632_vm9 = vcmp.gt.f32.partialorder %v4326_v11, 0.0  ;;  %v4760_v58 = vmul.f32 0.2, %v4326_v11  ;;  %v4330_v6 = vadd.f32 %v4329_v57, %v3977_v39  ;;  %v4331_v47 = vpop.f32.mrb[127].mxu1  ;;  %v9007_v48 = vld [vmem:[#allocation33_spill] sm:$0xff] }
 0x460   : > { %vm4633_vm10 = vcmp.gt.f32.partialorder %v4328_v1, 0.0  ;;  %v4761_v63 = vmul.f32 0.2, %v4328_v1  ;;  %v4332_v56 = vadd.f32 %v4331_v47, %v3979_v60 }
 0x461   : > { %v4888_v42 = vsel %vm4632_vm9, %v4326_v11, %v4760_v58  ;;  %vm4634_vm11 = vcmp.gt.f32.partialorder %v4330_v6, 0.0  ;;  %v4762_v33 = vmul.f32 0.2, %v4330_v6  ;;  %4594 = vmatmul.mubr.bf16.gmra.mrb[104].mxu1 %v6786_v49 }
 0x462   : > { %v5400_v50 = vmul.f32 %v5095_v12, %v4888_v42  ;;  %v4889_v36 = vsel %vm4633_vm10, %v4328_v1, %v4761_v63  ;;  %vm4635_vm12 = vcmp.gt.f32.partialorder %v4332_v56, 0.0  ;;  %v4763_v10 = vmul.f32 0.2, %v4332_v56  ;;  %4603 = vmatprep.mubr.bf16.mxu1 %v6787_v41 }
 0x463   : > { %v5401_v53 = vmul.f32 %v5095_v12, %v4889_v36  ;;  %v4890_v4 = vsel %vm4634_vm11, %v4330_v6, %v4762_v33 }
 0x464   : > { %v5523_v22 = vadd.f32 %v5522_v24, %v5400_v50  ;;  %v5402_v44 = vmul.f32 %v5100_v2, %v4890_v4  ;;  %v4891_v52 = vsel %vm4635_vm12, %v4332_v56, %v4763_v10  ;;  %v4335_v23 = vpop.f32.mrb[0].mxu1  ;;  %v6790_v24 = vld [vmem:[%s8871_s5 + $0x3ec] ss:$16 sps:$4 sm:$0xff]   ;;  %v5105_v56 = vpop.permute.xlu0 %5104 }
 0x465   : > { %v5592_v32 = vadd.f32 %v5591_v7, %v5401_v53  ;;  %v5403_v39 = vmul.f32 %v5100_v2, %v4891_v52  ;;  %v6128_v62 = vadd.f32 %v4335_v23, %v9007_v48  ;;  %v4337_v11 = vpop.f32.mrb[1].mxu1  ;;  %v9008_v7 = vld [vmem:[#allocation34_spill] sm:$0xff]  ;;  %v5110_v10 = vpop.permute.xlu1 %5109 }
 0x466   : > { %v5524_v49 = vadd.f32 %v5523_v22, %v5402_v44  ;;  %v6129_v60 = vadd.f32 %v4337_v11, %v9007_v48  ;;  %v4339_v1 = vpop.f32.mrb[2].mxu1  ;;  %v6792_v11 = vld [vmem:[%s8871_s5 + $0x3e8] ss:$16 sps:$4 sm:$0xff]  }
 0x467   : > { %v5593_v57 = vadd.f32 %v5592_v32, %v5403_v39  ;;  %vm4636_vm13 = vcmp.gt.f32.partialorder %v6128_v62, 0.0  ;;  %v4764_v41 = vmul.f32 0.2, %v6128_v62  ;;  %v6130_v58 = vadd.f32 %v4339_v1, %v9008_v7  ;;  %v4341_v6 = vpop.f32.mrb[3].mxu1  ;;  %v9009_v39 = vld [vmem:[#allocation35_spill] sm:$0xff] }
 0x468   : > { %vm4637_vm14 = vcmp.gt.f32.partialorder %v6129_v60, 0.0  ;;  %v4765_v47 = vmul.f32 0.2, %v6129_v60  ;;  %v6131_v63 = vadd.f32 %v4341_v6, %v9008_v7 }
 0x469   : > { %v4892_v12 = vsel %vm4636_vm13, %v6128_v62, %v4764_v41  ;;  %vm4638_vm15 = vcmp.gt.f32.partialorder %v6130_v58, 0.0  ;;  %v4766_v42 = vmul.f32 0.2, %v6130_v58  ;;  %4604 = vmatmul.mubr.bf16.gmra.mrb[108].mxu1 %v6789_v26 }
 0x46a   : > { %v5404_v33 = vmul.f32 %v5105_v56, %v4892_v12  ;;  %v4893_v50 = vsel %vm4637_vm14, %v6129_v60, %v4765_v47  ;;  %vm4639_vm1 = vcmp.gt.f32.partialorder %v6131_v63, 0.0  ;;  %v4767_v36 = vmul.f32 0.2, %v6131_v63  ;;  %4613 = vmatprep.mubr.bf16.mxu1 %v6790_v24  ;;  %v5115_v47 = vpop.permute.xlu0 %5114 }
 0x46b   : > { %v5405_v2 = vmul.f32 %v5105_v56, %v4893_v50  ;;  %v4894_v53 = vsel %vm4638_vm15, %v6130_v58, %v4766_v42  ;;  %v5120_v50 = vpop.permute.xlu1 %5119 }
 0x46c   : > { %v5525_v4 = vadd.f32 %v5524_v49, %v5404_v33  ;;  %v5406_v22 = vmul.f32 %v5110_v10, %v4894_v53  ;;  %v4895_v44 = vsel %vm4639_vm1, %v6131_v63, %v4767_v36  ;;  %v4345_v52 = vpop.f32.mrb[4].mxu1  ;;  %v9010_v49 = vld [vmem:[#allocation36_spill] sm:$0xff] }
 0x46d   : > { %v5594_v23 = vadd.f32 %v5593_v57, %v5405_v2  ;;  %v5407_v32 = vmul.f32 %v5110_v10, %v4895_v44  ;;  %v6132_v48 = vadd.f32 %v4345_v52, %v9009_v39  ;;  %v4347_v62 = vpop.f32.mrb[5].mxu1 }
 0x46e   : > { %v5526_v26 = vadd.f32 %v5525_v4, %v5406_v22  ;;  %v6133_v60 = vadd.f32 %v4347_v62, %v9009_v39  ;;  %v4349_v1 = vpop.f32.mrb[6].mxu1 }
 0x46f   : > { %v5595_v24 = vadd.f32 %v5594_v23, %v5407_v32  ;;  %vm4640_vm2 = vcmp.gt.f32.partialorder %v6132_v48, 0.0  ;;  %v4768_v41 = vmul.f32 0.2, %v6132_v48  ;;  %v6134_v7 = vadd.f32 %v4349_v1, %v9010_v49  ;;  %v4351_v58 = vpop.f32.mrb[7].mxu1  ;;  %v9011_v23 = vld [vmem:[#allocation37_spill] sm:$0xff] }
 0x470   : > { %vm4641_vm3 = vcmp.gt.f32.partialorder %v6133_v60, 0.0  ;;  %v4769_v57 = vmul.f32 0.2, %v6133_v60  ;;  %v6135_v6 = vadd.f32 %v4351_v58, %v9010_v49 }
 0x471   : > { %v4896_v63 = vsel %vm4640_vm2, %v6132_v48, %v4768_v41  ;;  %vm4642_vm4 = vcmp.gt.f32.partialorder %v6134_v7, 0.0  ;;  %v4770_v56 = vmul.f32 0.2, %v6134_v7  ;;  %4614 = vmatmul.mubr.bf16.gmra.mrb[112].mxu1 %v6792_v11  ;;  %v9012_v41 = vld [vmem:[#allocation38_spill] sm:$0xff] }
 0x472   : > { %v5408_v12 = vmul.f32 %v5115_v47, %v4896_v63  ;;  %v4897_v42 = vsel %vm4641_vm3, %v6133_v60, %v4769_v57  ;;  %vm4643_vm5 = vcmp.gt.f32.partialorder %v6135_v6, 0.0  ;;  %v4771_v33 = vmul.f32 0.2, %v6135_v6  ;;  %v5125_v57 = vpop.permute.xlu0 %5124 }
 0x473   : > { %v5409_v36 = vmul.f32 %v5115_v47, %v4897_v42  ;;  %v4898_v10 = vsel %vm4642_vm4, %v6134_v7, %v4770_v56 }
 0x474   : > { %v5527_v2 = vadd.f32 %v5526_v26, %v5408_v12  ;;  %v5410_v53 = vmul.f32 %v5120_v50, %v4898_v10  ;;  %v4899_v4 = vsel %vm4643_vm5, %v6135_v6, %v4771_v33  ;;  %v4355_v22 = vpop.f32.mrb[8].mxu1  ;;  %v5130_v12 = vpop.permute.xlu1 %5129 }
 0x475   : > { %v5596_v44 = vadd.f32 %v5595_v24, %v5409_v36  ;;  %v5411_v52 = vmul.f32 %v5120_v50, %v4899_v4  ;;  %v6136_v32 = vadd.f32 %v4355_v22, %v9011_v23  ;;  %v4357_v39 = vpop.f32.mrb[9].mxu1  ;;  %v9013_v22 = vld [vmem:[#allocation39_spill] sm:$0xff] }
 0x476   : > { %v5528_v48 = vadd.f32 %v5527_v2, %v5410_v53  ;;  %v6137_v62 = vadd.f32 %v4357_v39, %v9011_v23  ;;  %v4359_v11 = vpop.f32.mrb[10].mxu1 }
 0x477   : > { %v5597_v1 = vadd.f32 %v5596_v44, %v5411_v52  ;;  %vm4644_vm0 = vcmp.gt.f32.partialorder %v6136_v32, 0.0  ;;  %v4772_v60 = vmul.f32 0.2, %v6136_v32  ;;  %v6138_v49 = vadd.f32 %v4359_v11, %v9012_v41  ;;  %v4361_v58 = vpop.f32.mrb[11].mxu1 }
 0x478   : > { %vm4645_vm6 = vcmp.gt.f32.partialorder %v6137_v62, 0.0  ;;  %v4773_v26 = vmul.f32 0.2, %v6137_v62  ;;  %v6139_v7 = vadd.f32 %v4361_v58, %v9012_v41 }
 0x479   : > { %v4900_v24 = vsel %vm4644_vm0, %v6136_v32, %v4772_v60  ;;  %vm4646_vm7 = vcmp.gt.f32.partialorder %v6138_v49, 0.0  ;;  %v4774_v6 = vmul.f32 0.2, %v6138_v49  ;;  %v9014_v60 = vld [vmem:[#allocation40_spill] sm:$0xff] }
 0x47a   : > { %v5412_v47 = vmul.f32 %v5125_v57, %v4900_v24  ;;  %v4901_v63 = vsel %vm4645_vm6, %v6137_v62, %v4773_v26  ;;  %vm4647_vm8 = vcmp.gt.f32.partialorder %v6139_v7, 0.0  ;;  %v4775_v56 = vmul.f32 0.2, %v6139_v7  ;;  %v5135_v26 = vpop.permute.xlu0 %5134 }
 0x47b   : > { %v5413_v42 = vmul.f32 %v5125_v57, %v4901_v63  ;;  %v4902_v33 = vsel %vm4646_vm7, %v6138_v49, %v4774_v6 }
 0x47c   : > { %v5529_v50 = vadd.f32 %v5528_v48, %v5412_v47  ;;  %v5414_v36 = vmul.f32 %v5130_v12, %v4902_v33  ;;  %v4903_v10 = vsel %vm4647_vm8, %v6139_v7, %v4775_v56  ;;  %v4365_v2 = vpop.f32.mrb[12].mxu1  ;;  %v5140_v47 = vpop.permute.xlu1 %5139 }
 0x47d   : > { %v5598_v53 = vadd.f32 %v5597_v1, %v5413_v42  ;;  %v5415_v4 = vmul.f32 %v5130_v12, %v4903_v10  ;;  %v6140_v44 = vadd.f32 %v4365_v2, %v9013_v22  ;;  %v4367_v52 = vpop.f32.mrb[13].mxu1  ;;  %v9015_v2 = vld [vmem:[#allocation41_spill] sm:$0xff] }
 0x47e   : > { %v5530_v23 = vadd.f32 %v5529_v50, %v5414_v36  ;;  %v6141_v32 = vadd.f32 %v4367_v52, %v9013_v22  ;;  %v4369_v39 = vpop.f32.mrb[14].mxu1 }
 0x47f   : > { %v5599_v11 = vadd.f32 %v5598_v53, %v5415_v4  ;;  %vm4648_vm9 = vcmp.gt.f32.partialorder %v6140_v44, 0.0  ;;  %v4776_v62 = vmul.f32 0.2, %v6140_v44  ;;  %v6142_v41 = vadd.f32 %v4369_v39, %v9014_v60  ;;  %v4371_v58 = vpop.f32.mrb[15].mxu1 }
 0x480   : > { %vm4649_vm10 = vcmp.gt.f32.partialorder %v6141_v32, 0.0  ;;  %v4777_v48 = vmul.f32 0.2, %v6141_v32  ;;  %v6143_v49 = vadd.f32 %v4371_v58, %v9014_v60 }
 0x481   : > { %v4904_v1 = vsel %vm4648_vm9, %v6140_v44, %v4776_v62  ;;  %vm4650_vm11 = vcmp.gt.f32.partialorder %v6142_v41, 0.0  ;;  %v4778_v7 = vmul.f32 0.2, %v6142_v41  ;;  %v9016_v62 = vld [vmem:[#allocation42_spill] sm:$0xff] }
 0x482   : > { %v5416_v57 = vmul.f32 %v5135_v26, %v4904_v1  ;;  %v4905_v24 = vsel %vm4649_vm10, %v6141_v32, %v4777_v48  ;;  %vm4651_vm12 = vcmp.gt.f32.partialorder %v6143_v49, 0.0  ;;  %v4779_v6 = vmul.f32 0.2, %v6143_v49  ;;  %v5145_v48 = vpop.permute.xlu0 %5144 }
 0x483   : > { %v5417_v63 = vmul.f32 %v5135_v26, %v4905_v24  ;;  %v4906_v56 = vsel %vm4650_vm11, %v6142_v41, %v4778_v7 }
 0x484   : > { %v5531_v12 = vadd.f32 %v5530_v23, %v5416_v57  ;;  %v5418_v42 = vmul.f32 %v5140_v47, %v4906_v56  ;;  %v4907_v33 = vsel %vm4651_vm12, %v6143_v49, %v4779_v6  ;;  %v4375_v50 = vpop.f32.mrb[16].mxu1  ;;  %v5150_v57 = vpop.permute.xlu1 %5149 }
 0x485   : > { %v5600_v36 = vadd.f32 %v5599_v11, %v5417_v63  ;;  %v5419_v10 = vmul.f32 %v5140_v47, %v4907_v33  ;;  %v6144_v53 = vadd.f32 %v4375_v50, %v9015_v2  ;;  %v4377_v4 = vpop.f32.mrb[17].mxu1  ;;  %v9017_v50 = vld [vmem:[#allocation43_spill] sm:$0xff] }
 0x486   : > { %v5532_v22 = vadd.f32 %v5531_v12, %v5418_v42  ;;  %v6145_v44 = vadd.f32 %v4377_v4, %v9015_v2  ;;  %v4379_v52 = vpop.f32.mrb[18].mxu1 }
 0x487   : > { %v5601_v39 = vadd.f32 %v5600_v36, %v5419_v10  ;;  %vm4652_vm13 = vcmp.gt.f32.partialorder %v6144_v53, 0.0  ;;  %v4780_v32 = vmul.f32 0.2, %v6144_v53  ;;  %v6146_v60 = vadd.f32 %v4379_v52, %v9016_v62  ;;  %v4381_v58 = vpop.f32.mrb[19].mxu1 }
 0x488   : > { %vm4653_vm14 = vcmp.gt.f32.partialorder %v6145_v44, 0.0  ;;  %v4781_v23 = vmul.f32 0.2, %v6145_v44  ;;  %v6147_v41 = vadd.f32 %v4381_v58, %v9016_v62 }
 0x489   : > { %v4908_v11 = vsel %vm4652_vm13, %v6144_v53, %v4780_v32  ;;  %vm4654_vm15 = vcmp.gt.f32.partialorder %v6146_v60, 0.0  ;;  %v4782_v49 = vmul.f32 0.2, %v6146_v60  ;;  %v9018_v32 = vld [vmem:[#allocation44_spill] sm:$0xff] }
 0x48a   : > { %v5420_v26 = vmul.f32 %v5145_v48, %v4908_v11  ;;  %v4909_v1 = vsel %vm4653_vm14, %v6145_v44, %v4781_v23  ;;  %vm4655_vm1 = vcmp.gt.f32.partialorder %v6147_v41, 0.0  ;;  %v4783_v7 = vmul.f32 0.2, %v6147_v41  ;;  %v5155_v23 = vpop.permute.xlu0 %5154 }
 0x48b   : > { %v5421_v24 = vmul.f32 %v5145_v48, %v4909_v1  ;;  %v4910_v6 = vsel %vm4654_vm15, %v6146_v60, %v4782_v49 }
 0x48c   : > { %v5533_v47 = vadd.f32 %v5532_v22, %v5420_v26  ;;  %v5422_v63 = vmul.f32 %v5150_v57, %v4910_v6  ;;  %v4911_v56 = vsel %vm4655_vm1, %v6147_v41, %v4783_v7  ;;  %v4385_v12 = vpop.f32.mrb[20].mxu1  ;;  %v5160_v26 = vpop.permute.xlu1 %5159 }
 0x48d   : > { %v5602_v42 = vadd.f32 %v5601_v39, %v5421_v24  ;;  %v5423_v33 = vmul.f32 %v5150_v57, %v4911_v56  ;;  %v6148_v36 = vadd.f32 %v4385_v12, %v9017_v50  ;;  %v4387_v10 = vpop.f32.mrb[21].mxu1  ;;  %v9019_v12 = vld [vmem:[#allocation45_spill] sm:$0xff] }
 0x48e   : > { %v5534_v2 = vadd.f32 %v5533_v47, %v5422_v63  ;;  %v6149_v53 = vadd.f32 %v4387_v10, %v9017_v50  ;;  %v4389_v4 = vpop.f32.mrb[22].mxu1 }
 0x48f   : > { %v5603_v52 = vadd.f32 %v5602_v42, %v5423_v33  ;;  %vm4656_vm2 = vcmp.gt.f32.partialorder %v6148_v36, 0.0  ;;  %v4784_v44 = vmul.f32 0.2, %v6148_v36  ;;  %v6150_v62 = vadd.f32 %v4389_v4, %v9018_v32  ;;  %v4391_v58 = vpop.f32.mrb[23].mxu1 }
 0x490   : > { %vm4657_vm3 = vcmp.gt.f32.partialorder %v6149_v53, 0.0  ;;  %v4785_v22 = vmul.f32 0.2, %v6149_v53  ;;  %v6151_v60 = vadd.f32 %v4391_v58, %v9018_v32 }
 0x491   : > { %v4912_v39 = vsel %vm4656_vm2, %v6148_v36, %v4784_v44  ;;  %vm4658_vm4 = vcmp.gt.f32.partialorder %v6150_v62, 0.0  ;;  %v4786_v41 = vmul.f32 0.2, %v6150_v62  ;;  %v9020_v44 = vld [vmem:[#allocation46_spill] sm:$0xff] }
 0x492   : > { %v5424_v48 = vmul.f32 %v5155_v23, %v4912_v39  ;;  %v4913_v11 = vsel %vm4657_vm3, %v6149_v53, %v4785_v22  ;;  %vm4659_vm5 = vcmp.gt.f32.partialorder %v6151_v60, 0.0  ;;  %v4787_v49 = vmul.f32 0.2, %v6151_v60  ;;  %v5165_v22 = vpop.permute.xlu0 %5164 }
 0x493   : > { %v5425_v1 = vmul.f32 %v5155_v23, %v4913_v11  ;;  %v4914_v7 = vsel %vm4658_vm4, %v6150_v62, %v4786_v41 }
 0x494   : > { %v5535_v57 = vadd.f32 %v5534_v2, %v5424_v48  ;;  %v5426_v24 = vmul.f32 %v5160_v26, %v4914_v7  ;;  %v4915_v6 = vsel %vm4659_vm5, %v6151_v60, %v4787_v49  ;;  %v4395_v47 = vpop.f32.mrb[24].mxu1  ;;  %v5170_v48 = vpop.permute.xlu1 %5169 }
 0x495   : > { %v5604_v63 = vadd.f32 %v5603_v52, %v5425_v1  ;;  %v5427_v56 = vmul.f32 %v5160_v26, %v4915_v6  ;;  %v6152_v42 = vadd.f32 %v4395_v47, %v9019_v12  ;;  %v4397_v33 = vpop.f32.mrb[25].mxu1  ;;  %v9021_v47 = vld [vmem:[#allocation47_spill] sm:$0xff] }
 0x496   : > { %v5536_v50 = vadd.f32 %v5535_v57, %v5426_v24  ;;  %v6153_v36 = vadd.f32 %v4397_v33, %v9019_v12  ;;  %v4399_v10 = vpop.f32.mrb[26].mxu1 }
 0x497   : > { %v5605_v4 = vadd.f32 %v5604_v63, %v5427_v56  ;;  %vm4660_vm0 = vcmp.gt.f32.partialorder %v6152_v42, 0.0  ;;  %v4788_v53 = vmul.f32 0.2, %v6152_v42  ;;  %v6154_v32 = vadd.f32 %v4399_v10, %v9020_v44  ;;  %v4401_v58 = vpop.f32.mrb[27].mxu1 }
 0x498   : > { %vm4661_vm6 = vcmp.gt.f32.partialorder %v6153_v36, 0.0  ;;  %v4789_v2 = vmul.f32 0.2, %v6153_v36  ;;  %v6155_v62 = vadd.f32 %v4401_v58, %v9020_v44 }
 0x499   : > { %v4916_v52 = vsel %vm4660_vm0, %v6152_v42, %v4788_v53  ;;  %vm4662_vm7 = vcmp.gt.f32.partialorder %v6154_v32, 0.0  ;;  %v4790_v60 = vmul.f32 0.2, %v6154_v32  ;;  %v9022_v53 = vld [vmem:[#allocation48_spill] sm:$0xff] }
 0x49a   : > { %v5428_v23 = vmul.f32 %v5165_v22, %v4916_v52  ;;  %v4917_v39 = vsel %vm4661_vm6, %v6153_v36, %v4789_v2  ;;  %vm4663_vm8 = vcmp.gt.f32.partialorder %v6155_v62, 0.0  ;;  %v4791_v41 = vmul.f32 0.2, %v6155_v62  ;;  %v5175_v2 = vpop.permute.xlu0 %5174 }
 0x49b   : > { %v5429_v11 = vmul.f32 %v5165_v22, %v4917_v39  ;;  %v4918_v49 = vsel %vm4662_vm7, %v6154_v32, %v4790_v60 }
 0x49c   : > { %v5537_v26 = vadd.f32 %v5536_v50, %v5428_v23  ;;  %v5430_v1 = vmul.f32 %v5170_v48, %v4918_v49  ;;  %v4919_v7 = vsel %vm4663_vm8, %v6155_v62, %v4791_v41  ;;  %v4405_v57 = vpop.f32.mrb[28].mxu1  ;;  %v5180_v23 = vpop.permute.xlu1 %5179 }
 0x49d   : > { %v5606_v24 = vadd.f32 %v5605_v4, %v5429_v11  ;;  %v5431_v6 = vmul.f32 %v5170_v48, %v4919_v7  ;;  %v6156_v63 = vadd.f32 %v4405_v57, %v9021_v47  ;;  %v4407_v56 = vpop.f32.mrb[29].mxu1  ;;  %v9023_v57 = vld [vmem:[#allocation49_spill] sm:$0xff] }
 0x49e   : > { %v5538_v12 = vadd.f32 %v5537_v26, %v5430_v1  ;;  %v6157_v42 = vadd.f32 %v4407_v56, %v9021_v47  ;;  %v4409_v33 = vpop.f32.mrb[30].mxu1 }
 0x49f   : > { %v5607_v10 = vadd.f32 %v5606_v24, %v5431_v6  ;;  %vm4664_vm9 = vcmp.gt.f32.partialorder %v6156_v63, 0.0  ;;  %v4792_v36 = vmul.f32 0.2, %v6156_v63  ;;  %v6158_v44 = vadd.f32 %v4409_v33, %v9022_v53  ;;  %v4411_v58 = vpop.f32.mrb[31].mxu1 }
 0x4a0   : > { %vm4665_vm10 = vcmp.gt.f32.partialorder %v6157_v42, 0.0  ;;  %v4793_v50 = vmul.f32 0.2, %v6157_v42  ;;  %v6159_v32 = vadd.f32 %v4411_v58, %v9022_v53 }
 0x4a1   : > { %v4920_v4 = vsel %vm4664_vm9, %v6156_v63, %v4792_v36  ;;  %vm4666_vm11 = vcmp.gt.f32.partialorder %v6158_v44, 0.0  ;;  %v4794_v62 = vmul.f32 0.2, %v6158_v44  ;;  %v9024_v36 = vld [vmem:[#allocation50_spill] sm:$0xff] }
 0x4a2   : > { %v5432_v22 = vmul.f32 %v5175_v2, %v4920_v4  ;;  %v4921_v52 = vsel %vm4665_vm10, %v6157_v42, %v4793_v50  ;;  %vm4667_vm12 = vcmp.gt.f32.partialorder %v6159_v32, 0.0  ;;  %v4795_v60 = vmul.f32 0.2, %v6159_v32  ;;  %v5185_v50 = vpop.permute.xlu0 %5184 }
 0x4a3   : > { %v5433_v39 = vmul.f32 %v5175_v2, %v4921_v52  ;;  %v4922_v41 = vsel %vm4666_vm11, %v6158_v44, %v4794_v62 }
 0x4a4   : > { %v5539_v48 = vadd.f32 %v5538_v12, %v5432_v22  ;;  %v5434_v11 = vmul.f32 %v5180_v23, %v4922_v41  ;;  %v4923_v49 = vsel %vm4667_vm12, %v6159_v32, %v4795_v60  ;;  %v4415_v26 = vpop.f32.mrb[32].mxu1  ;;  %v5190_v22 = vpop.permute.xlu1 %5189 }
 0x4a5   : > { %v5608_v1 = vadd.f32 %v5607_v10, %v5433_v39  ;;  %v5435_v7 = vmul.f32 %v5180_v23, %v4923_v49  ;;  %v6160_v24 = vadd.f32 %v4415_v26, %v9023_v57  ;;  %v4417_v6 = vpop.f32.mrb[33].mxu1  ;;  %v9025_v26 = vld [vmem:[#allocation51_spill] sm:$0xff] }
 0x4a6   : > { %v5540_v47 = vadd.f32 %v5539_v48, %v5434_v11  ;;  %v6161_v63 = vadd.f32 %v4417_v6, %v9023_v57  ;;  %v4419_v56 = vpop.f32.mrb[34].mxu1 }
 0x4a7   : > { %v5609_v33 = vadd.f32 %v5608_v1, %v5435_v7  ;;  %vm4668_vm13 = vcmp.gt.f32.partialorder %v6160_v24, 0.0  ;;  %v4796_v42 = vmul.f32 0.2, %v6160_v24  ;;  %v6162_v53 = vadd.f32 %v4419_v56, %v9024_v36  ;;  %v4421_v58 = vpop.f32.mrb[35].mxu1 }
 0x4a8   : > { %vm4669_vm14 = vcmp.gt.f32.partialorder %v6161_v63, 0.0  ;;  %v4797_v12 = vmul.f32 0.2, %v6161_v63  ;;  %v6163_v44 = vadd.f32 %v4421_v58, %v9024_v36 }
 0x4a9   : > { %v4924_v10 = vsel %vm4668_vm13, %v6160_v24, %v4796_v42  ;;  %vm4670_vm15 = vcmp.gt.f32.partialorder %v6162_v53, 0.0  ;;  %v4798_v32 = vmul.f32 0.2, %v6162_v53  ;;  %v9026_v42 = vld [vmem:[#allocation52_spill] sm:$0xff] }
 0x4aa   : > { %v5436_v2 = vmul.f32 %v5185_v50, %v4924_v10  ;;  %v4925_v4 = vsel %vm4669_vm14, %v6161_v63, %v4797_v12  ;;  %vm4671_vm1 = vcmp.gt.f32.partialorder %v6163_v44, 0.0  ;;  %v4799_v62 = vmul.f32 0.2, %v6163_v44  ;;  %v5195_v12 = vpop.permute.xlu0 %5194 }
 0x4ab   : > { %v5437_v52 = vmul.f32 %v5185_v50, %v4925_v4  ;;  %v4926_v60 = vsel %vm4670_vm15, %v6162_v53, %v4798_v32 }
 0x4ac   : > { %v5541_v23 = vadd.f32 %v5540_v47, %v5436_v2  ;;  %v5438_v39 = vmul.f32 %v5190_v22, %v4926_v60  ;;  %v4927_v41 = vsel %vm4671_vm1, %v6163_v44, %v4799_v62  ;;  %v4425_v48 = vpop.f32.mrb[36].mxu1  ;;  %v5200_v2 = vpop.permute.xlu1 %5199 }
 0x4ad   : > { %v5610_v11 = vadd.f32 %v5609_v33, %v5437_v52  ;;  %v5439_v49 = vmul.f32 %v5190_v22, %v4927_v41  ;;  %v6164_v1 = vadd.f32 %v4425_v48, %v9025_v26  ;;  %v4427_v7 = vpop.f32.mrb[37].mxu1  ;;  %v9027_v48 = vld [vmem:[#allocation53_spill] sm:$0xff] }
 0x4ae   : > { %v5542_v57 = vadd.f32 %v5541_v23, %v5438_v39  ;;  %v6165_v24 = vadd.f32 %v4427_v7, %v9025_v26  ;;  %v4429_v6 = vpop.f32.mrb[38].mxu1 }
 0x4af   : > { %v5611_v56 = vadd.f32 %v5610_v11, %v5439_v49  ;;  %vm4672_vm2 = vcmp.gt.f32.partialorder %v6164_v1, 0.0  ;;  %v4800_v63 = vmul.f32 0.2, %v6164_v1  ;;  %v6166_v36 = vadd.f32 %v4429_v6, %v9026_v42  ;;  %v4431_v58 = vpop.f32.mrb[39].mxu1 }
 0x4b0   : > { %vm4673_vm3 = vcmp.gt.f32.partialorder %v6165_v24, 0.0  ;;  %v4801_v47 = vmul.f32 0.2, %v6165_v24  ;;  %v6167_v53 = vadd.f32 %v4431_v58, %v9026_v42 }
 0x4b1   : > { %v4928_v33 = vsel %vm4672_vm2, %v6164_v1, %v4800_v63  ;;  %vm4674_vm4 = vcmp.gt.f32.partialorder %v6166_v36, 0.0  ;;  %v4802_v44 = vmul.f32 0.2, %v6166_v36  ;;  %v9028_v63 = vld [vmem:[#allocation54_spill] sm:$0xff] }
 0x4b2   : > { %v5440_v50 = vmul.f32 %v5195_v12, %v4928_v33  ;;  %v4929_v10 = vsel %vm4673_vm3, %v6165_v24, %v4801_v47  ;;  %vm4675_vm5 = vcmp.gt.f32.partialorder %v6167_v53, 0.0  ;;  %v4803_v32 = vmul.f32 0.2, %v6167_v53  ;;  %v5205_v47 = vpop.permute.xlu0 %5204 }
 0x4b3   : > { %v5441_v4 = vmul.f32 %v5195_v12, %v4929_v10  ;;  %v4930_v62 = vsel %vm4674_vm4, %v6166_v36, %v4802_v44 }
 0x4b4   : > { %v5543_v22 = vadd.f32 %v5542_v57, %v5440_v50  ;;  %v5442_v52 = vmul.f32 %v5200_v2, %v4930_v62  ;;  %v4931_v60 = vsel %vm4675_vm5, %v6167_v53, %v4803_v32  ;;  %v4435_v23 = vpop.f32.mrb[40].mxu1  ;;  %v5210_v50 = vpop.permute.xlu1 %5209 }
 0x4b5   : > { %v5612_v39 = vadd.f32 %v5611_v56, %v5441_v4  ;;  %v5443_v41 = vmul.f32 %v5200_v2, %v4931_v60  ;;  %v6168_v11 = vadd.f32 %v4435_v23, %v9027_v48  ;;  %v4437_v49 = vpop.f32.mrb[41].mxu1  ;;  %v9029_v23 = vld [vmem:[#allocation55_spill] sm:$0xff] }
 0x4b6   : > { %v5544_v26 = vadd.f32 %v5543_v22, %v5442_v52  ;;  %v6169_v1 = vadd.f32 %v4437_v49, %v9027_v48  ;;  %v4439_v7 = vpop.f32.mrb[42].mxu1 }
 0x4b7   : > { %v5613_v6 = vadd.f32 %v5612_v39, %v5443_v41  ;;  %vm4676_vm0 = vcmp.gt.f32.partialorder %v6168_v11, 0.0  ;;  %v4804_v24 = vmul.f32 0.2, %v6168_v11  ;;  %v6170_v42 = vadd.f32 %v4439_v7, %v9028_v63  ;;  %v4441_v58 = vpop.f32.mrb[43].mxu1 }
 0x4b8   : > { %vm4677_vm6 = vcmp.gt.f32.partialorder %v6169_v1, 0.0  ;;  %v4805_v57 = vmul.f32 0.2, %v6169_v1  ;;  %v6171_v36 = vadd.f32 %v4441_v58, %v9028_v63 }
 0x4b9   : > { %v4932_v56 = vsel %vm4676_vm0, %v6168_v11, %v4804_v24  ;;  %vm4678_vm7 = vcmp.gt.f32.partialorder %v6170_v42, 0.0  ;;  %v4806_v53 = vmul.f32 0.2, %v6170_v42  ;;  %v9030_v24 = vld [vmem:[#allocation56_spill] sm:$0xff] }
 0x4ba   : > { %v5444_v12 = vmul.f32 %v5205_v47, %v4932_v56  ;;  %v4933_v33 = vsel %vm4677_vm6, %v6169_v1, %v4805_v57  ;;  %vm4679_vm8 = vcmp.gt.f32.partialorder %v6171_v36, 0.0  ;;  %v4807_v44 = vmul.f32 0.2, %v6171_v36  ;;  %v5215_v57 = vpop.permute.xlu0 %5214 }
 0x4bb   : > { %v5445_v10 = vmul.f32 %v5205_v47, %v4933_v33  ;;  %v4934_v32 = vsel %vm4678_vm7, %v6170_v42, %v4806_v53 }
 0x4bc   : > { %v5545_v2 = vadd.f32 %v5544_v26, %v5444_v12  ;;  %v5446_v4 = vmul.f32 %v5210_v50, %v4934_v32  ;;  %v4935_v62 = vsel %vm4679_vm8, %v6171_v36, %v4807_v44  ;;  %v4445_v22 = vpop.f32.mrb[44].mxu1  ;;  %v5220_v12 = vpop.permute.xlu1 %5219 }
 0x4bd   : > { %v5614_v52 = vadd.f32 %v5613_v6, %v5445_v10  ;;  %v5447_v60 = vmul.f32 %v5210_v50, %v4935_v62  ;;  %v6172_v39 = vadd.f32 %v4445_v22, %v9029_v23  ;;  %v4447_v41 = vpop.f32.mrb[45].mxu1  ;;  %v9031_v22 = vld [vmem:[#allocation57_spill] sm:$0xff] }
 0x4be   : > { %v5546_v48 = vadd.f32 %v5545_v2, %v5446_v4  ;;  %v6173_v11 = vadd.f32 %v4447_v41, %v9029_v23  ;;  %v4449_v49 = vpop.f32.mrb[46].mxu1 }
 0x4bf   : > { %v5615_v7 = vadd.f32 %v5614_v52, %v5447_v60  ;;  %vm4680_vm9 = vcmp.gt.f32.partialorder %v6172_v39, 0.0  ;;  %v4808_v1 = vmul.f32 0.2, %v6172_v39  ;;  %v6174_v63 = vadd.f32 %v4449_v49, %v9030_v24  ;;  %v4451_v58 = vpop.f32.mrb[47].mxu1 }
 0x4c0   : > { %vm4681_vm10 = vcmp.gt.f32.partialorder %v6173_v11, 0.0  ;;  %v4809_v26 = vmul.f32 0.2, %v6173_v11  ;;  %v6175_v42 = vadd.f32 %v4451_v58, %v9030_v24  ;;  %v5225_v58 = vpop.permute.xlu0 %5224 }
 0x4c1   : > { %v4936_v6 = vsel %vm4680_vm9, %v6172_v39, %v4808_v1  ;;  %vm4682_vm11 = vcmp.gt.f32.partialorder %v6174_v63, 0.0  ;;  %v4810_v36 = vmul.f32 0.2, %v6174_v63 }
 0x4c2   : > { %v5448_v47 = vmul.f32 %v5215_v57, %v4936_v6  ;;  %v4937_v56 = vsel %vm4681_vm10, %v6173_v11, %v4809_v26  ;;  %vm4683_vm12 = vcmp.gt.f32.partialorder %v6175_v42, 0.0  ;;  %v4811_v53 = vmul.f32 0.2, %v6175_v42 }
 0x4c3   : > { %v5449_v33 = vmul.f32 %v5215_v57, %v4937_v56  ;;  %v4938_v44 = vsel %vm4682_vm11, %v6174_v63, %v4810_v36  ;;  %v5230_v36 = vpop.permute.xlu1 %5229 }
 0x4c4   : > { %v5547_v50 = vadd.f32 %v5546_v48, %v5448_v47  ;;  %v5450_v10 = vmul.f32 %v5220_v12, %v4938_v44  ;;  %v4939_v32 = vsel %vm4683_vm12, %v6175_v42, %v4811_v53  ;;  %v4455_v2 = vpop.f32.mrb[48].mxu1 }
 0x4c5   : > { %v5616_v4 = vadd.f32 %v5615_v7, %v5449_v33  ;;  %v5451_v62 = vmul.f32 %v5220_v12, %v4939_v32  ;;  %v6176_v52 = vadd.f32 %v4455_v2, %v9031_v22  ;;  %v4457_v60 = vpop.f32.mrb[49].mxu1 }
 0x4c6   : > { %v5548_v23 = vadd.f32 %v5547_v50, %v5450_v10  ;;  %v6177_v39 = vadd.f32 %v4457_v60, %v9031_v22  ;;  %v4459_v41 = vpop.f32.mrb[50].mxu1 }
 0x4c7   : > { %v5617_v49 = vadd.f32 %v5616_v4, %v5451_v62  ;;  %vm4684_vm13 = vcmp.gt.f32.partialorder %v6176_v52, 0.0  ;;  %v4812_v11 = vmul.f32 0.2, %v6176_v52  ;;  %v6178_v1 = vadd.f32 %v4459_v41, %v8511_v0  ;;  %v4461_v24 = vpop.f32.mrb[51].mxu1 }
 0x4c8   : > { %vm4685_vm14 = vcmp.gt.f32.partialorder %v6177_v39, 0.0  ;;  %v4813_v48 = vmul.f32 0.2, %v6177_v39  ;;  %v6179_v63 = vadd.f32 %v4461_v24, %v8511_v0 }
 0x4c9   : > { %v4940_v7 = vsel %vm4684_vm13, %v6176_v52, %v4812_v11  ;;  %vm4686_vm15 = vcmp.gt.f32.partialorder %v6178_v1, 0.0  ;;  %v4814_v26 = vmul.f32 0.2, %v6178_v1  ;;  %v5235_v11 = vpop.permute.xlu0 %5234 }
 0x4ca   : > { %v5452_v42 = vmul.f32 %v5225_v58, %v4940_v7  ;;  %v4941_v57 = vsel %vm4685_vm14, %v6177_v39, %v4813_v48  ;;  %vm4687_vm1 = vcmp.gt.f32.partialorder %v6179_v63, 0.0  ;;  %v4815_v6 = vmul.f32 0.2, %v6179_v63 }
 0x4cb   : > { %v5453_v47 = vmul.f32 %v5225_v58, %v4941_v57  ;;  %v4942_v56 = vsel %vm4686_vm15, %v6178_v1, %v4814_v26 }
 0x4cc   : > { %v5549_v53 = vadd.f32 %v5548_v23, %v5452_v42  ;;  %v5454_v12 = vmul.f32 %v5230_v36, %v4942_v56  ;;  %v4943_v33 = vsel %vm4687_vm1, %v6179_v63, %v4815_v6  ;;  %v4465_v44 = vpop.f32.mrb[52].mxu1 }
 0x4cd   : > { %v5618_v50 = vadd.f32 %v5617_v49, %v5453_v47  ;;  %v5455_v10 = vmul.f32 %v5230_v36, %v4943_v33  ;;  %v6180_v32 = vadd.f32 %v4465_v44, %v8519_v21  ;;  %v4467_v0 = vpop.f32.mrb[53].mxu1 }
 0x4ce   : > { %v5550_v2 = vadd.f32 %v5549_v53, %v5454_v12  ;;  %v6181_v4 = vadd.f32 %v4467_v0, %v8519_v21  ;;  %v4469_v62 = vpop.f32.mrb[54].mxu1  ;;  %v5240_v21 = vpop.permute.xlu1 %5239 }
 0x4cf   : > { %v5619_v22 = vadd.f32 %v5618_v50, %v5455_v10  ;;  %vm4688_vm2 = vcmp.gt.f32.partialorder %v6180_v32, 0.0  ;;  %v4816_v52 = vmul.f32 0.2, %v6180_v32  ;;  %v6182_v60 = vadd.f32 %v4469_v62, %v8521_v46  ;;  %v4471_v39 = vpop.f32.mrb[55].mxu1 }
 0x4d0   : > { %vm4689_vm3 = vcmp.gt.f32.partialorder %v6181_v4, 0.0  ;;  %v4817_v23 = vmul.f32 0.2, %v6181_v4  ;;  %v6183_v41 = vadd.f32 %v4471_v39, %v8521_v46 }
 0x4d1   : > { %v4944_v49 = vsel %vm4688_vm2, %v6180_v32, %v4816_v52  ;;  %vm4690_vm4 = vcmp.gt.f32.partialorder %v6182_v60, 0.0  ;;  %v4818_v1 = vmul.f32 0.2, %v6182_v60 }
 0x4d2   : > { %v5456_v24 = vmul.f32 %v5235_v11, %v4944_v49  ;;  %v4945_v48 = vsel %vm4689_vm3, %v6181_v4, %v4817_v23  ;;  %vm4691_vm5 = vcmp.gt.f32.partialorder %v6183_v41, 0.0  ;;  %v4819_v63 = vmul.f32 0.2, %v6183_v41  ;;  %v5245_v4 = vpop.permute.xlu0 %5244 }
 0x4d3   : > { %v5457_v58 = vmul.f32 %v5235_v11, %v4945_v48  ;;  %v4946_v7 = vsel %vm4690_vm4, %v6182_v60, %v4818_v1 }
 0x4d4   : > { %v5551_v26 = vadd.f32 %v5550_v2, %v5456_v24  ;;  %v5458_v42 = vmul.f32 %v5240_v21, %v4946_v7  ;;  %v4947_v57 = vsel %vm4691_vm5, %v6183_v41, %v4819_v63  ;;  %v4475_v6 = vpop.f32.mrb[56].mxu1 }
 0x4d5   : > { %v5620_v36 = vadd.f32 %v5619_v22, %v5457_v58  ;;  %v5459_v47 = vmul.f32 %v5240_v21, %v4947_v57  ;;  %v6184_v56 = vadd.f32 %v4475_v6, %v8529_v17  ;;  %v4477_v46 = vpop.f32.mrb[57].mxu1 }
 0x4d6   : > { %v5552_v53 = vadd.f32 %v5551_v26, %v5458_v42  ;;  %v6185_v12 = vadd.f32 %v4477_v46, %v8529_v17  ;;  %v4479_v33 = vpop.f32.mrb[58].mxu1  ;;  %v5250_v17 = vpop.permute.xlu1 %5249 }
 0x4d7   : > { %v5621_v44 = vadd.f32 %v5620_v36, %v5459_v47  ;;  %vm4692_vm0 = vcmp.gt.f32.partialorder %v6184_v56, 0.0  ;;  %v4820_v50 = vmul.f32 0.2, %v6184_v56  ;;  %v6186_v10 = vadd.f32 %v4479_v33, %v8531_v40  ;;  %v4481_v32 = vpop.f32.mrb[59].mxu1  ;;  %v5255_v46 = vpop.permute.xlu0 %5254 }
 0x4d8   : > { %vm4693_vm6 = vcmp.gt.f32.partialorder %v6185_v12, 0.0  ;;  %v4821_v0 = vmul.f32 0.2, %v6185_v12  ;;  %v6187_v2 = vadd.f32 %v4481_v32, %v8531_v40 }
 0x4d9   : > { %v4948_v62 = vsel %vm4692_vm0, %v6184_v56, %v4820_v50  ;;  %vm4694_vm7 = vcmp.gt.f32.partialorder %v6186_v10, 0.0  ;;  %v4822_v22 = vmul.f32 0.2, %v6186_v10 }
 0x4da   : > { %v5460_v52 = vmul.f32 %v5245_v4, %v4948_v62  ;;  %v4949_v60 = vsel %vm4693_vm6, %v6185_v12, %v4821_v0  ;;  %vm4695_vm8 = vcmp.gt.f32.partialorder %v6187_v2, 0.0  ;;  %v4823_v39 = vmul.f32 0.2, %v6187_v2 }
 0x4db   : > { %v5461_v23 = vmul.f32 %v5245_v4, %v4949_v60  ;;  %v4950_v41 = vsel %vm4694_vm7, %v6186_v10, %v4822_v22 }
 0x4dc   : > { %v5553_v11 = vadd.f32 %v5552_v53, %v5460_v52  ;;  %v5462_v49 = vmul.f32 %v5250_v17, %v4950_v41  ;;  %v4951_v1 = vsel %vm4695_vm8, %v6187_v2, %v4823_v39  ;;  %v4485_v24 = vpop.f32.mrb[60].mxu1 }
 0x4dd   : > { %v5622_v48 = vadd.f32 %v5621_v44, %v5461_v23  ;;  %v5463_v63 = vmul.f32 %v5250_v17, %v4951_v1  ;;  %v6188_v21 = vadd.f32 %v4485_v24, %v8536_v9  ;;  %v4487_v40 = vpop.f32.mrb[61].mxu1 }
 0x4de   : > { %v5554_v58 = vadd.f32 %v5553_v11, %v5462_v49  ;;  %v6189_v7 = vadd.f32 %v4487_v40, %v8536_v9  ;;  %v4489_v26 = vpop.f32.mrb[62].mxu1  ;;  %v5260_v9 = vpop.permute.xlu1 %5259 }
 0x4df   : > { %v5623_v42 = vadd.f32 %v5622_v48, %v5463_v63  ;;  %vm4696_vm9 = vcmp.gt.f32.partialorder %v6188_v21, 0.0  ;;  %v4824_v57 = vmul.f32 0.2, %v6188_v21  ;;  %v6190_v6 = vadd.f32 %v4489_v26, %v8541_v8  ;;  %v4491_v36 = vpop.f32.mrb[63].mxu1  ;;  %v5265_v63 = vpop.permute.xlu0 %5264 }
 0x4e0   : > { %vm4697_vm10 = vcmp.gt.f32.partialorder %v6189_v7, 0.0  ;;  %v4825_v47 = vmul.f32 0.2, %v6189_v7  ;;  %v6191_v56 = vadd.f32 %v4491_v36, %v8541_v8 }
 0x4e1   : > { %v4952_v53 = vsel %vm4696_vm9, %v6188_v21, %v4824_v57  ;;  %vm4698_vm11 = vcmp.gt.f32.partialorder %v6190_v6, 0.0  ;;  %v4826_v12 = vmul.f32 0.2, %v6190_v6 }
 0x4e2   : > { %v5464_v33 = vmul.f32 %v5255_v46, %v4952_v53  ;;  %v4953_v44 = vsel %vm4697_vm10, %v6189_v7, %v4825_v47  ;;  %vm4699_vm12 = vcmp.gt.f32.partialorder %v6191_v56, 0.0  ;;  %v4827_v50 = vmul.f32 0.2, %v6191_v56 }
 0x4e3   : > { %v5465_v10 = vmul.f32 %v5255_v46, %v4953_v44  ;;  %v4954_v32 = vsel %vm4698_vm11, %v6190_v6, %v4826_v12 }
 0x4e4   : > { %v5555_v0 = vadd.f32 %v5554_v58, %v5464_v33  ;;  %v5466_v2 = vmul.f32 %v5260_v9, %v4954_v32  ;;  %v4955_v4 = vsel %vm4699_vm12, %v6191_v56, %v4827_v50  ;;  %v4495_v62 = vpop.f32.mrb[64].mxu1 }
 0x4e5   : > { %v5624_v22 = vadd.f32 %v5623_v42, %v5465_v10  ;;  %v5467_v52 = vmul.f32 %v5260_v9, %v4955_v4  ;;  %v6192_v60 = vadd.f32 %v4495_v62, %v8543_v43  ;;  %v4497_v8 = vpop.f32.mrb[65].mxu1  ;;  %v5275_v62 = vpop.permute.xlu0 %5274 }
 0x4e6   : > { %v5556_v39 = vadd.f32 %v5555_v0, %v5466_v2  ;;  %v6193_v17 = vadd.f32 %v4497_v8, %v8543_v43  ;;  %v4499_v23 = vpop.f32.mrb[66].mxu1  ;;  %v5270_v43 = vpop.permute.xlu1 %5269 }
 0x4e7   : > { %v5625_v41 = vadd.f32 %v5624_v22, %v5467_v52  ;;  %vm4700_vm13 = vcmp.gt.f32.partialorder %v6192_v60, 0.0  ;;  %v4828_v11 = vmul.f32 0.2, %v6192_v60  ;;  %v6194_v49 = vadd.f32 %v4499_v23, %v8545_v20  ;;  %v4501_v1 = vpop.f32.mrb[67].mxu1 }
 0x4e8   : > { %vm4701_vm14 = vcmp.gt.f32.partialorder %v6193_v17, 0.0  ;;  %v4829_v24 = vmul.f32 0.2, %v6193_v17  ;;  %v6195_v48 = vadd.f32 %v4501_v1, %v8545_v20 }
 0x4e9   : > { %v4956_v21 = vsel %vm4700_vm13, %v6192_v60, %v4828_v11  ;;  %vm4702_vm15 = vcmp.gt.f32.partialorder %v6194_v49, 0.0  ;;  %v4830_v40 = vmul.f32 0.2, %v6194_v49 }
 0x4ea   : > { %v5468_v58 = vmul.f32 %v5265_v63, %v4956_v21  ;;  %v4957_v7 = vsel %vm4701_vm14, %v6193_v17, %v4829_v24  ;;  %vm4703_vm1 = vcmp.gt.f32.partialorder %v6195_v48, 0.0  ;;  %v4831_v26 = vmul.f32 0.2, %v6195_v48 }
 0x4eb   : > { %v5469_v42 = vmul.f32 %v5265_v63, %v4957_v7  ;;  %v4958_v57 = vsel %vm4702_vm15, %v6194_v49, %v4830_v40 }
 0x4ec   : > { %v5557_v6 = vadd.f32 %v5556_v39, %v5468_v58  ;;  %v5470_v36 = vmul.f32 %v5270_v43, %v4958_v57  ;;  %v4959_v47 = vsel %vm4703_vm1, %v6195_v48, %v4831_v26  ;;  %v4505_v56 = vpop.f32.mrb[68].mxu1 }
 0x4ed   : > { %v5626_v46 = vadd.f32 %v5625_v41, %v5469_v42  ;;  %v5471_v53 = vmul.f32 %v5270_v43, %v4959_v47  ;;  %v6196_v12 = vadd.f32 %v4505_v56, %v8553_v3  ;;  %v4507_v20 = vpop.f32.mrb[69].mxu1 }
 0x4ee   : > { %v5558_v33 = vadd.f32 %v5557_v6, %v5470_v36  ;;  %v6197_v44 = vadd.f32 %v4507_v20, %v8553_v3  ;;  %v4509_v50 = vpop.f32.mrb[70].mxu1  ;;  %v5280_v3 = vpop.permute.xlu1 %5279 }
 0x4ef   : > { %v5627_v9 = vadd.f32 %v5626_v46, %v5471_v53  ;;  %vm4704_vm2 = vcmp.gt.f32.partialorder %v6196_v12, 0.0  ;;  %v4832_v10 = vmul.f32 0.2, %v6196_v12  ;;  %v6198_v32 = vadd.f32 %v4509_v50, %v8555_v13  ;;  %v4511_v0 = vpop.f32.mrb[71].mxu1  ;;  %v5285_v36 = vpop.permute.xlu0 %5284 }
 0x4f0   : > { %vm4705_vm3 = vcmp.gt.f32.partialorder %v6197_v44, 0.0  ;;  %v4833_v2 = vmul.f32 0.2, %v6197_v44  ;;  %v6199_v4 = vadd.f32 %v4511_v0, %v8555_v13 }
 0x4f1   : > { %v4960_v22 = vsel %vm4704_vm2, %v6196_v12, %v4832_v10  ;;  %vm4706_vm4 = vcmp.gt.f32.partialorder %v6198_v32, 0.0  ;;  %v4834_v52 = vmul.f32 0.2, %v6198_v32 }
 0x4f2   : > { %v5472_v60 = vmul.f32 %v5275_v62, %v4960_v22  ;;  %v4961_v8 = vsel %vm4705_vm3, %v6197_v44, %v4833_v2  ;;  %vm4707_vm5 = vcmp.gt.f32.partialorder %v6199_v4, 0.0  ;;  %v4835_v39 = vmul.f32 0.2, %v6199_v4 }
 0x4f3   : > { %v5473_v17 = vmul.f32 %v5275_v62, %v4961_v8  ;;  %v4962_v23 = vsel %vm4706_vm4, %v6198_v32, %v4834_v52 }
 0x4f4   : > { %v5559_v41 = vadd.f32 %v5558_v33, %v5472_v60  ;;  %v5474_v11 = vmul.f32 %v5280_v3, %v4962_v23  ;;  %v4963_v49 = vsel %vm4707_vm5, %v6199_v4, %v4835_v39  ;;  %v4515_v1 = vpop.f32.mrb[72].mxu1  ;;  %v5295_v23 = vpop.permute.xlu0 %5294 }
 0x4f5   : > { %v5628_v24 = vadd.f32 %v5627_v9, %v5473_v17  ;;  %v5475_v48 = vmul.f32 %v5280_v3, %v4963_v49  ;;  %v6200_v63 = vadd.f32 %v4515_v1, %v8563_v37  ;;  %v4517_v13 = vpop.f32.mrb[73].mxu1 }
 0x4f6   : > { %v5560_v21 = vadd.f32 %v5559_v41, %v5474_v11  ;;  %v6201_v40 = vadd.f32 %v4517_v13, %v8563_v37  ;;  %v4519_v58 = vpop.f32.mrb[74].mxu1  ;;  %v5290_v37 = vpop.permute.xlu1 %5289 }
 0x4f7   : > { %v5629_v7 = vadd.f32 %v5628_v24, %v5475_v48  ;;  %vm4708_vm0 = vcmp.gt.f32.partialorder %v6200_v63, 0.0  ;;  %v4836_v26 = vmul.f32 0.2, %v6200_v63  ;;  %v6202_v43 = vadd.f32 %v4519_v58, %v8565_v28  ;;  %v4521_v42 = vpop.f32.mrb[75].mxu1 }
 0x4f8   : > { %vm4709_vm6 = vcmp.gt.f32.partialorder %v6201_v40, 0.0  ;;  %v4837_v57 = vmul.f32 0.2, %v6201_v40  ;;  %v6203_v6 = vadd.f32 %v4521_v42, %v8565_v28 }
 0x4f9   : > { %v4964_v47 = vsel %vm4708_vm0, %v6200_v63, %v4836_v26  ;;  %vm4710_vm7 = vcmp.gt.f32.partialorder %v6202_v43, 0.0  ;;  %v4838_v56 = vmul.f32 0.2, %v6202_v43 }
 0x4fa   : > { %v5476_v46 = vmul.f32 %v5285_v36, %v4964_v47  ;;  %v4965_v53 = vsel %vm4709_vm6, %v6201_v40, %v4837_v57  ;;  %vm4711_vm8 = vcmp.gt.f32.partialorder %v6203_v6, 0.0  ;;  %v4839_v12 = vmul.f32 0.2, %v6203_v6 }
 0x4fb   : > { %v5477_v20 = vmul.f32 %v5285_v36, %v4965_v53  ;;  %v4966_v33 = vsel %vm4710_vm7, %v6202_v43, %v4838_v56 }
 0x4fc   : > { %v5561_v44 = vadd.f32 %v5560_v21, %v5476_v46  ;;  %v5478_v50 = vmul.f32 %v5290_v37, %v4966_v33  ;;  %v4967_v9 = vsel %vm4711_vm8, %v6203_v6, %v4839_v12  ;;  %v4525_v10 = vpop.f32.mrb[76].mxu1 }
 0x4fd   : > { %v5630_v32 = vadd.f32 %v5629_v7, %v5477_v20  ;;  %v5479_v0 = vmul.f32 %v5290_v37, %v4967_v9  ;;  %v6204_v2 = vadd.f32 %v4525_v10, %v8570_v19  ;;  %v4527_v28 = vpop.f32.mrb[77].mxu1  ;;  %v5305_v37 = vpop.permute.xlu0 %5304 }
 0x4fe   : > { %v5562_v4 = vadd.f32 %v5561_v44, %v5478_v50  ;;  %v6205_v62 = vadd.f32 %v4527_v28, %v8570_v19  ;;  %v4529_v22 = vpop.f32.mrb[78].mxu1  ;;  %v5300_v19 = vpop.permute.xlu1 %5299 }
 0x4ff   : > { %v5631_v52 = vadd.f32 %v5630_v32, %v5479_v0  ;;  %vm4712_vm9 = vcmp.gt.f32.partialorder %v6204_v2, 0.0  ;;  %v4840_v60 = vmul.f32 0.2, %v6204_v2  ;;  %v6206_v8 = vadd.f32 %v4529_v22, %v8575_v25  ;;  %v4531_v39 = vpop.f32.mrb[79].mxu1 }
 0x500   : > { %vm4713_vm10 = vcmp.gt.f32.partialorder %v6205_v62, 0.0  ;;  %v4841_v3 = vmul.f32 0.2, %v6205_v62  ;;  %v6207_v17 = vadd.f32 %v4531_v39, %v8575_v25 }
 0x501   : > { %v4968_v41 = vsel %vm4712_vm9, %v6204_v2, %v4840_v60  ;;  %vm4714_vm11 = vcmp.gt.f32.partialorder %v6206_v8, 0.0  ;;  %v4842_v11 = vmul.f32 0.2, %v6206_v8 }
 0x502   : > { %v5480_v49 = vmul.f32 %v5295_v23, %v4968_v41  ;;  %v4969_v1 = vsel %vm4713_vm10, %v6205_v62, %v4841_v3  ;;  %vm4715_vm12 = vcmp.gt.f32.partialorder %v6207_v17, 0.0  ;;  %v4843_v24 = vmul.f32 0.2, %v6207_v17 }
 0x503   : > { %v5481_v48 = vmul.f32 %v5295_v23, %v4969_v1  ;;  %v4970_v63 = vsel %vm4714_vm11, %v6206_v8, %v4842_v11  ;;  %v5315_v1 = vpop.permute.xlu0 %5314 }
 0x504   : > { %v5563_v13 = vadd.f32 %v5562_v4, %v5480_v49  ;;  %v5482_v21 = vmul.f32 %v5300_v19, %v4970_v63  ;;  %v4971_v40 = vsel %vm4715_vm12, %v6207_v17, %v4843_v24  ;;  %v4535_v58 = vpop.f32.mrb[80].mxu1 }
 0x505   : > { %v5632_v7 = vadd.f32 %v5631_v52, %v5481_v48  ;;  %v5483_v26 = vmul.f32 %v5300_v19, %v4971_v40  ;;  %v6208_v43 = vadd.f32 %v4535_v58, %v8577_v55  ;;  %v4537_v25 = vpop.f32.mrb[81].mxu1 }
 0x506   : > { %v5564_v42 = vadd.f32 %v5563_v13, %v5482_v21  ;;  %v6209_v57 = vadd.f32 %v4537_v25, %v8577_v55  ;;  %v4539_v6 = vpop.f32.mrb[82].mxu1  ;;  %v5310_v55 = vpop.permute.xlu1 %5309 }
 0x507   : > { %v5633_v36 = vadd.f32 %v5632_v7, %v5483_v26  ;;  %vm4716_vm13 = vcmp.gt.f32.partialorder %v6208_v43, 0.0  ;;  %v4844_v47 = vmul.f32 0.2, %v6208_v43  ;;  %v6210_v56 = vadd.f32 %v4539_v6, %v8579_v14  ;;  %v4541_v46 = vpop.f32.mrb[83].mxu1 }
 0x508   : > { %vm4717_vm14 = vcmp.gt.f32.partialorder %v6209_v57, 0.0  ;;  %v4845_v53 = vmul.f32 0.2, %v6209_v57  ;;  %v6211_v12 = vadd.f32 %v4541_v46, %v8579_v14 }
 0x509   : > { %v4972_v20 = vsel %vm4716_vm13, %v6208_v43, %v4844_v47  ;;  %vm4718_vm15 = vcmp.gt.f32.partialorder %v6210_v56, 0.0  ;;  %v4846_v33 = vmul.f32 0.2, %v6210_v56 }
 0x50a   : > { %v5484_v44 = vmul.f32 %v5305_v37, %v4972_v20  ;;  %v4973_v50 = vsel %vm4717_vm14, %v6209_v57, %v4845_v53  ;;  %vm4719_vm1 = vcmp.gt.f32.partialorder %v6211_v12, 0.0  ;;  %v4847_v9 = vmul.f32 0.2, %v6211_v12 }
 0x50b   : > { %v5485_v10 = vmul.f32 %v5305_v37, %v4973_v50  ;;  %v4974_v32 = vsel %vm4718_vm15, %v6210_v56, %v4846_v33  ;;  %v5325_v33 = vpop.permute.xlu0 %5324 }
 0x50c   : > { %v5565_v0 = vadd.f32 %v5564_v42, %v5484_v44  ;;  %v5486_v2 = vmul.f32 %v5310_v55, %v4974_v32  ;;  %v4975_v28 = vsel %vm4719_vm1, %v6211_v12, %v4847_v9  ;;  %v4545_v4 = vpop.f32.mrb[84].mxu1 }
 0x50d   : > { %v5634_v62 = vadd.f32 %v5633_v36, %v5485_v10  ;;  %v5487_v22 = vmul.f32 %v5310_v55, %v4975_v28  ;;  %v6212_v52 = vadd.f32 %v4545_v4, %v8587_v5  ;;  %v4547_v14 = vpop.f32.mrb[85].mxu1 }
 0x50e   : > { %v5566_v60 = vadd.f32 %v5565_v0, %v5486_v2  ;;  %v6213_v8 = vadd.f32 %v4547_v14, %v8587_v5  ;;  %v4549_v39 = vpop.f32.mrb[86].mxu1  ;;  %v5320_v5 = vpop.permute.xlu1 %5319 }
 0x50f   : > { %v5635_v3 = vadd.f32 %v5634_v62, %v5487_v22  ;;  %vm4720_vm2 = vcmp.gt.f32.partialorder %v6212_v52, 0.0  ;;  %v4848_v17 = vmul.f32 0.2, %v6212_v52  ;;  %v6214_v23 = vadd.f32 %v4549_v39, %v8589_v16  ;;  %v4551_v41 = vpop.f32.mrb[87].mxu1 }
 0x510   : > { %vm4721_vm3 = vcmp.gt.f32.partialorder %v6213_v8, 0.0  ;;  %v4849_v11 = vmul.f32 0.2, %v6213_v8  ;;  %v6215_v49 = vadd.f32 %v4551_v41, %v8589_v16 }
 0x511   : > { %v4976_v24 = vsel %vm4720_vm2, %v6212_v52, %v4848_v17  ;;  %vm4722_vm4 = vcmp.gt.f32.partialorder %v6214_v23, 0.0  ;;  %v4850_v19 = vmul.f32 0.2, %v6214_v23 }
 0x512   : > { %v5488_v48 = vmul.f32 %v5315_v1, %v4976_v24  ;;  %v4977_v63 = vsel %vm4721_vm3, %v6213_v8, %v4849_v11  ;;  %vm4723_vm5 = vcmp.gt.f32.partialorder %v6215_v49, 0.0  ;;  %v4851_v13 = vmul.f32 0.2, %v6215_v49 }
 0x513   : > { %v5489_v21 = vmul.f32 %v5315_v1, %v4977_v63  ;;  %v4978_v40 = vsel %vm4722_vm4, %v6214_v23, %v4850_v19  ;;  %v5335_v1 = vpop.permute.xlu0 %5334 }
 0x514   : > { %v5567_v58 = vadd.f32 %v5566_v60, %v5488_v48  ;;  %v5490_v7 = vmul.f32 %v5320_v5, %v4978_v40  ;;  %v4979_v26 = vsel %vm4723_vm5, %v6215_v49, %v4851_v13  ;;  %v4555_v43 = vpop.f32.mrb[88].mxu1 }
 0x515   : > { %v5636_v25 = vadd.f32 %v5635_v3, %v5489_v21  ;;  %v5491_v42 = vmul.f32 %v5320_v5, %v4979_v26  ;;  %v6216_v57 = vadd.f32 %v4555_v43, %v8597_v59  ;;  %v4557_v16 = vpop.f32.mrb[89].mxu1 }
 0x516   : > { %v5568_v6 = vadd.f32 %v5567_v58, %v5490_v7  ;;  %v6217_v36 = vadd.f32 %v4557_v16, %v8597_v59  ;;  %v4559_v47 = vpop.f32.mrb[90].mxu1  ;;  %v5330_v59 = vpop.permute.xlu1 %5329 }
 0x517   : > { %v5637_v56 = vadd.f32 %v5636_v25, %v5491_v42  ;;  %vm4724_vm0 = vcmp.gt.f32.partialorder %v6216_v57, 0.0  ;;  %v4852_v46 = vmul.f32 0.2, %v6216_v57  ;;  %v6218_v53 = vadd.f32 %v4559_v47, %v8599_v38  ;;  %v4561_v12 = vpop.f32.mrb[91].mxu1 }
 0x518   : > { %vm4725_vm6 = vcmp.gt.f32.partialorder %v6217_v36, 0.0  ;;  %v4853_v37 = vmul.f32 0.2, %v6217_v36  ;;  %v6219_v20 = vadd.f32 %v4561_v12, %v8599_v38 }
 0x519   : > { %v4980_v44 = vsel %vm4724_vm0, %v6216_v57, %v4852_v46  ;;  %vm4726_vm7 = vcmp.gt.f32.partialorder %v6218_v53, 0.0  ;;  %v4854_v50 = vmul.f32 0.2, %v6218_v53 }
 0x51a   : > { %v5492_v9 = vmul.f32 %v5325_v33, %v4980_v44  ;;  %v4981_v55 = vsel %vm4725_vm6, %v6217_v36, %v4853_v37  ;;  %vm4727_vm8 = vcmp.gt.f32.partialorder %v6219_v20, 0.0  ;;  %v4855_v10 = vmul.f32 0.2, %v6219_v20  ;;  %v5345_v37 = vpop.permute.xlu0 %5344 }
 0x51b   : > { %v5493_v32 = vmul.f32 %v5325_v33, %v4981_v55  ;;  %v4982_v0 = vsel %vm4726_vm7, %v6218_v53, %v4854_v50 }
 0x51c   : > { %v5569_v2 = vadd.f32 %v5568_v6, %v5492_v9  ;;  %v5494_v28 = vmul.f32 %v5330_v59, %v4982_v0  ;;  %v4983_v4 = vsel %vm4727_vm8, %v6219_v20, %v4855_v10  ;;  %v4565_v62 = vpop.f32.mrb[92].mxu1 }
 0x51d   : > { %v5638_v22 = vadd.f32 %v5637_v56, %v5493_v32  ;;  %v5495_v52 = vmul.f32 %v5330_v59, %v4983_v4  ;;  %v6220_v14 = vadd.f32 %v4565_v62, %v8604_v29  ;;  %v4567_v38 = vpop.f32.mrb[93].mxu1 }
 0x51e   : > { %v5570_v60 = vadd.f32 %v5569_v2, %v5494_v28  ;;  %v6221_v8 = vadd.f32 %v4567_v38, %v8604_v29  ;;  %v4569_v39 = vpop.f32.mrb[94].mxu1  ;;  %v5340_v29 = vpop.permute.xlu1 %5339 }
 0x51f   : > { %v5639_v3 = vadd.f32 %v5638_v22, %v5495_v52  ;;  %vm4728_vm9 = vcmp.gt.f32.partialorder %v6220_v14, 0.0  ;;  %v4856_v17 = vmul.f32 0.2, %v6220_v14  ;;  %v6222_v23 = vadd.f32 %v4569_v39, %v8609_v61  ;;  %v4571_v41 = vpop.f32.mrb[95].mxu1 }
 0x520   : > { %vm4729_vm10 = vcmp.gt.f32.partialorder %v6221_v8, 0.0  ;;  %v4857_v11 = vmul.f32 0.2, %v6221_v8  ;;  %v6223_v49 = vadd.f32 %v4571_v41, %v8609_v61 }
 0x521   : > { %v4984_v24 = vsel %vm4728_vm9, %v6220_v14, %v4856_v17  ;;  %vm4730_vm11 = vcmp.gt.f32.partialorder %v6222_v23, 0.0  ;;  %v4858_v19 = vmul.f32 0.2, %v6222_v23 }
 0x522   : > { %v5496_v48 = vmul.f32 %v5335_v1, %v4984_v24  ;;  %v4985_v63 = vsel %vm4729_vm10, %v6221_v8, %v4857_v11  ;;  %vm4731_vm12 = vcmp.gt.f32.partialorder %v6223_v49, 0.0  ;;  %v4859_v13 = vmul.f32 0.2, %v6223_v49 }
 0x523   : > { %v5497_v5 = vmul.f32 %v5335_v1, %v4985_v63  ;;  %v4986_v21 = vsel %vm4730_vm11, %v6222_v23, %v4858_v19  ;;  %v5355_v23 = vpop.permute.xlu0 %5354 }
 0x524   : > { %v5571_v40 = vadd.f32 %v5570_v60, %v5496_v48  ;;  %v5498_v58 = vmul.f32 %v5340_v29, %v4986_v21  ;;  %v4987_v7 = vsel %vm4731_vm12, %v6223_v49, %v4859_v13  ;;  %v4575_v26 = vpop.f32.mrb[96].mxu1 }
 0x525   : > { %v5640_v43 = vadd.f32 %v5639_v3, %v5497_v5  ;;  %v5499_v25 = vmul.f32 %v5340_v29, %v4987_v7  ;;  %v6224_v42 = vadd.f32 %v4575_v26, %v8611_v15  ;;  %v4577_v61 = vpop.f32.mrb[97].mxu1 }
 0x526   : > { %v5572_v57 = vadd.f32 %v5571_v40, %v5498_v58  ;;  %v6225_v16 = vadd.f32 %v4577_v61, %v8611_v15  ;;  %v4579_v6 = vpop.f32.mrb[98].mxu1  ;;  %v5350_v15 = vpop.permute.xlu1 %5349 }
 0x527   : > { %v5641_v36 = vadd.f32 %v5640_v43, %v5499_v25  ;;  %vm4732_vm13 = vcmp.gt.f32.partialorder %v6224_v42, 0.0  ;;  %v4860_v47 = vmul.f32 0.2, %v6224_v42  ;;  %v6226_v56 = vadd.f32 %v4579_v6, %v8613_v45  ;;  %v4581_v46 = vpop.f32.mrb[99].mxu1 }
 0x528   : > { %vm4733_vm14 = vcmp.gt.f32.partialorder %v6225_v16, 0.0  ;;  %v4861_v53 = vmul.f32 0.2, %v6225_v16  ;;  %v6227_v12 = vadd.f32 %v4581_v46, %v8613_v45 }
 0x529   : > { %v4988_v20 = vsel %vm4732_vm13, %v6224_v42, %v4860_v47  ;;  %vm4734_vm15 = vcmp.gt.f32.partialorder %v6226_v56, 0.0  ;;  %v4862_v33 = vmul.f32 0.2, %v6226_v56 }
 0x52a   : > { %v5500_v44 = vmul.f32 %v5345_v37, %v4988_v20  ;;  %v4989_v50 = vsel %vm4733_vm14, %v6225_v16, %v4861_v53  ;;  %vm4735_vm1 = vcmp.gt.f32.partialorder %v6227_v12, 0.0  ;;  %v4863_v9 = vmul.f32 0.2, %v6227_v12 }
 0x52b   : > { %v5501_v55 = vmul.f32 %v5345_v37, %v4989_v50  ;;  %v4990_v10 = vsel %vm4734_vm15, %v6226_v56, %v4862_v33 }
 0x52c   : > { %v5573_v59 = vadd.f32 %v5572_v57, %v5500_v44  ;;  %v5502_v32 = vmul.f32 %v5350_v15, %v4990_v10  ;;  %v4991_v0 = vsel %vm4735_vm1, %v6227_v12, %v4863_v9  ;;  %v4585_v2 = vpop.f32.mrb[100].mxu1 }
 0x52d   : > { %v5642_v28 = vadd.f32 %v5641_v36, %v5501_v55  ;;  %v5503_v4 = vmul.f32 %v5350_v15, %v4991_v0  ;;  %v6228_v62 = vadd.f32 %v4585_v2, %v8621_v27  ;;  %v4587_v45 = vpop.f32.mrb[101].mxu1  ;;  %v5365_v36 = vpop.permute.xlu0 %5364 }
 0x52e   : > { %v5574_v22 = vadd.f32 %v5573_v59, %v5502_v32  ;;  %v6229_v52 = vadd.f32 %v4587_v45, %v8621_v27  ;;  %v4589_v14 = vpop.f32.mrb[102].mxu1  ;;  %v5360_v27 = vpop.permute.xlu1 %5359 }
 0x52f   : > { %v5643_v38 = vadd.f32 %v5642_v28, %v5503_v4  ;;  %vm4736_vm2 = vcmp.gt.f32.partialorder %v6228_v62, 0.0  ;;  %v4864_v60 = vmul.f32 0.2, %v6228_v62  ;;  %v6230_v8 = vadd.f32 %v4589_v14, %v8623_v51  ;;  %v4591_v39 = vpop.f32.mrb[103].mxu1 }
 0x530   : > { %vm4737_vm3 = vcmp.gt.f32.partialorder %v6229_v52, 0.0  ;;  %v4865_v3 = vmul.f32 0.2, %v6229_v52  ;;  %v6231_v17 = vadd.f32 %v4591_v39, %v8623_v51 }
 0x531   : > { %v4992_v41 = vsel %vm4736_vm2, %v6228_v62, %v4864_v60  ;;  %vm4738_vm4 = vcmp.gt.f32.partialorder %v6230_v8, 0.0  ;;  %v4866_v11 = vmul.f32 0.2, %v6230_v8 }
 0x532   : > { %v5504_v49 = vmul.f32 %v5355_v23, %v4992_v41  ;;  %v4993_v1 = vsel %vm4737_vm3, %v6229_v52, %v4865_v3  ;;  %vm4739_vm5 = vcmp.gt.f32.partialorder %v6231_v17, 0.0  ;;  %v4867_v24 = vmul.f32 0.2, %v6231_v17  ;;  %v5375_v52 = vpop.permute.xlu0 %5374 }
 0x533   : > { %v5505_v19 = vmul.f32 %v5355_v23, %v4993_v1  ;;  %v4994_v48 = vsel %vm4738_vm4, %v6230_v8, %v4866_v11 }
 0x534   : > { %v5575_v63 = vadd.f32 %v5574_v22, %v5504_v49  ;;  %v5506_v13 = vmul.f32 %v5360_v27, %v4994_v48  ;;  %v4995_v29 = vsel %vm4739_vm5, %v6231_v17, %v4867_v24  ;;  %v4595_v5 = vpop.f32.mrb[104].mxu1 }
 0x535   : > { %v5644_v21 = vadd.f32 %v5643_v38, %v5505_v19  ;;  %v5507_v40 = vmul.f32 %v5360_v27, %v4995_v29  ;;  %v6232_v58 = vadd.f32 %v4595_v5, %v8631_v34  ;;  %v4597_v51 = vpop.f32.mrb[105].mxu1 }
 0x536   : > { %v5576_v7 = vadd.f32 %v5575_v63, %v5506_v13  ;;  %v6233_v26 = vadd.f32 %v4597_v51, %v8631_v34  ;;  %v4599_v43 = vpop.f32.mrb[106].mxu1  ;;  %v5370_v34 = vpop.permute.xlu1 %5369 }
 0x537   : > { %v5645_v25 = vadd.f32 %v5644_v21, %v5507_v40  ;;  %vm4740_vm0 = vcmp.gt.f32.partialorder %v6232_v58, 0.0  ;;  %v4868_v42 = vmul.f32 0.2, %v6232_v58  ;;  %v6234_v61 = vadd.f32 %v4599_v43, %v8633_v31  ;;  %v4601_v57 = vpop.f32.mrb[107].mxu1  ;;  %v5385_v51 = vpop.permute.xlu0 %5384 }
 0x538   : > { %vm4741_vm6 = vcmp.gt.f32.partialorder %v6233_v26, 0.0  ;;  %v4869_v16 = vmul.f32 0.2, %v6233_v26  ;;  %v6235_v6 = vadd.f32 %v4601_v57, %v8633_v31 }
 0x539   : > { %v4996_v47 = vsel %vm4740_vm0, %v6232_v58, %v4868_v42  ;;  %vm4742_vm7 = vcmp.gt.f32.partialorder %v6234_v61, 0.0  ;;  %v4870_v56 = vmul.f32 0.2, %v6234_v61 }
 0x53a   : > { %v5508_v46 = vmul.f32 %v5365_v36, %v4996_v47  ;;  %v4997_v53 = vsel %vm4741_vm6, %v6233_v26, %v4869_v16  ;;  %vm4743_vm8 = vcmp.gt.f32.partialorder %v6235_v6, 0.0  ;;  %v4871_v12 = vmul.f32 0.2, %v6235_v6 }
 0x53b   : > { %v5509_v37 = vmul.f32 %v5365_v36, %v4997_v53  ;;  %v4998_v20 = vsel %vm4742_vm7, %v6234_v61, %v4870_v56 }
 0x53c   : > { %v5577_v33 = vadd.f32 %v5576_v7, %v5508_v46  ;;  %v5510_v44 = vmul.f32 %v5370_v34, %v4998_v20  ;;  %v4999_v50 = vsel %vm4743_vm8, %v6235_v6, %v4871_v12  ;;  %v4605_v9 = vpop.f32.mrb[108].mxu1  ;;  %v5664_v46 = vlaneseq }
 0x53d   : > { %v5646_v15 = vadd.f32 %v5645_v25, %v5509_v37  ;;  %v5511_v55 = vmul.f32 %v5370_v34, %v4999_v50  ;;  %v6236_v10 = vadd.f32 %v4605_v9, %v8638_v18  ;;  %v4607_v31 = vpop.f32.mrb[109].mxu1  ;;  %v6858_v50 = vmov 1966171168  }
 0x53e   : > { %v5578_v59 = vadd.f32 %v5577_v33, %v5510_v44  ;;  %v6237_v32 = vadd.f32 %v4607_v31, %v8638_v18  ;;  %v4609_v0 = vpop.f32.mrb[110].mxu1  ;;  %v5380_v18 = vpop.permute.xlu1 %5379  ;;  %v5665_v37 = vshrl.u32 %v5664_v46, 7  ;;  %v5674_v9 = vunpack.c.l.s4 %v6858_v50 }
 0x53f   : > { %v5647_v2 = vadd.f32 %v5646_v15, %v5511_v55  ;;  %vm4744_vm9 = vcmp.gt.f32.partialorder %v6236_v10, 0.0  ;;  %v4872_v28 = vmul.f32 0.2, %v6236_v10  ;;  %v6238_v4 = vadd.f32 %v4609_v0, %v8643_v35  ;;  %v4611_v62 = vpop.f32.mrb[111].mxu1  ;;  %v5662_v31 = vpop.permute.xlu0 %5661 }
 0x540   : > { %vm4745_vm10 = vcmp.gt.f32.partialorder %v6237_v32, 0.0  ;;  %v4873_v45 = vmul.f32 0.2, %v6237_v32  ;;  %v6239_v22 = vadd.f32 %v4611_v62, %v8643_v35  ;;  %v5666_v55 = vsub.s32 0, %v5665_v37 }
 0x541   : > { %v5000_v14 = vsel %vm4744_vm9, %v6236_v10, %v4872_v28  ;;  %vm4746_vm11 = vcmp.gt.f32.partialorder %v6238_v4, 0.0  ;;  %v4874_v38 = vmul.f32 0.2, %v6238_v4  ;;  %v5675_v0 = vunpack.c.0.s8 %v5674_v9 }
 0x542   : > { %v5512_v60 = vmul.f32 %v5375_v52, %v5000_v14  ;;  %v5001_v8 = vsel %vm4745_vm10, %v6237_v32, %v4873_v45  ;;  %vm4747_vm12 = vcmp.gt.f32.partialorder %v6239_v22, 0.0  ;;  %v4875_v39 = vmul.f32 0.2, %v6239_v22 }
 0x543   : > { %v5513_v3 = vmul.f32 %v5375_v52, %v5001_v8  ;;  %v5002_v17 = vsel %vm4746_vm11, %v6238_v4, %v4874_v38  ;;  %v5667_v28 = vrot.slane %v5662_v31, %v5666_v55  ;;  %vm5690_vm2 = vcmp.lt.s32.totalorder %v5664_v46, 256 }
 0x544   : > { %v5579_v23 = vadd.f32 %v5578_v59, %v5512_v60  ;;  %v5514_v41 = vmul.f32 %v5380_v18, %v5002_v17  ;;  %v5003_v11 = vsel %vm4747_vm12, %v6239_v22, %v4875_v39  ;;  %v4615_v49 = vpop.f32.mrb[112].mxu1  ;;  %v5678_v22 = vsub.s32 %v5675_v0, %v5665_v37 }
 0x545   : > { %v5648_v1 = vadd.f32 %v5647_v2, %v5513_v3  ;;  %v5515_v24 = vmul.f32 %v5380_v18, %v5003_v11  ;;  %v6240_v27 = vadd.f32 %v4615_v49, %v8647_v54  ;;  %v4617_v35 = vpop.f32.mrb[113].mxu1 }
 0x546   : > { %v5580_v19 = vadd.f32 %v5579_v23, %v5514_v41  ;;  %v6241_v48 = vadd.f32 %v4617_v35, %v8647_v54  ;;  %v4619_v63 = vpop.f32.mrb[114].mxu1  ;;  %v5390_v54 = vpop.permute.xlu1 %5389 }
 0x547   : > { %v5649_v13 = vadd.f32 %v5648_v1, %v5515_v24  ;;  %vm4748_vm13 = vcmp.gt.f32.partialorder %v6240_v27, 0.0  ;;  %v4876_v29 = vmul.f32 0.2, %v6240_v27  ;;  %v6242_v5 = vadd.f32 %v4619_v63, %v8651_v30  ;;  %v4621_v21 = vpop.f32.mrb[115].mxu1 }
 0x548   : > { %vm4749_vm14 = vcmp.gt.f32.partialorder %v6241_v48, 0.0  ;;  %v4877_v40 = vmul.f32 0.2, %v6241_v48  ;;  %v6243_v58 = vadd.f32 %v4621_v21, %v8651_v30 }
 0x549   : > { %v5004_v7 = vsel %vm4748_vm13, %v6240_v27, %v4876_v29  ;;  %vm4750_vm15 = vcmp.gt.f32.partialorder %v6242_v5, 0.0  ;;  %v4878_v26 = vmul.f32 0.2, %v6242_v5 }
 0x54a   : > { %v5516_v43 = vmul.f32 %v5385_v51, %v5004_v7  ;;  %v5005_v25 = vsel %vm4749_vm14, %v6241_v48, %v4877_v40  ;;  %vm4751_vm1 = vcmp.gt.f32.partialorder %v6243_v58, 0.0  ;;  %v4879_v42 = vmul.f32 0.2, %v6243_v58 }
 0x54b   : > { %v5517_v61 = vmul.f32 %v5385_v51, %v5005_v25  ;;  %v5006_v57 = vsel %vm4750_vm15, %v6242_v5, %v4878_v26 }
 0x54c   : > { %v5581_v16 = vadd.f32 %v5580_v19, %v5516_v43  ;;  %v5518_v6 = vmul.f32 %v5390_v54, %v5006_v57  ;;  %v5007_v36 = vsel %vm4751_vm1, %v6243_v58, %v4879_v42 }
 0x54d   : > { %v5650_v47 = vadd.f32 %v5649_v13, %v5517_v61  ;;  %v5519_v56 = vmul.f32 %v5390_v54, %v5007_v36 }
 0x54e   : > { %v5582_v53 = vadd.f32 %v5581_v16, %v5518_v6 }
 0x54f   : > { %v5651_v12 = vadd.f32 %v5650_v47, %v5519_v56 }
 0x550   : > { %v5583_v30 = vrot.slane %v5582_v53, 4 }
 0x551   : > { %v5652_v34 = vrot.slane %v5651_v12, 4 }
 0x552   : > { %v5584_v20 = vadd.f32 %v5583_v30, %v5582_v53 }
 0x553   : > { %v5653_v33 = vadd.f32 %v5652_v34, %v5651_v12 }
 0x554   : > { %v5585_v44 = vrot.slane %v5584_v20, 2 }
 0x555   : > { %v5654_v15 = vrot.slane %v5653_v33, 2 }
 0x556   : > { %v5586_v10 = vadd.f32 %v5585_v44, %v5584_v20 }
 0x557   : > { %v5655_v59 = vadd.f32 %v5654_v15, %v5653_v33 }
 0x558   : > { %v5587_v32 = vrot.slane %v5586_v10, 1 }
 0x559   : > { %v5656_v2 = vrot.slane %v5655_v59, 1 }
 0x55a   : > { %v5588_v4 = vadd.f32 %v5587_v32, %v5586_v10 }
 0x55b   : > { %v5657_v62 = vadd.f32 %v5656_v2, %v5655_v59 }
 0x55c   : > { %v5668_v45 = vadd.f32 %v5667_v28, %v5588_v4 }
 0x55d   : > { %v5669_v52 = vadd.f32 %v5667_v28, %v5657_v62 }
 0x55f   : > { %v5672_v14 = vcombine.low %v5668_v45, %v5669_v52 }
 0x561   : > { %v5679_v38 = vrot.slane %v5672_v14, %v5678_v22 }
 0x563   : > { %v5686_v60 = vrot.slane %v5679_v38, %v5678_v22 }
 0x565   : > { %5692 = vst.msk [vmem:[%s430_s30] sm:$0x3] %vm5690_vm2, %v5686_v60 }
 0x566   : > { %6806 = shalt.err (!%p6803_p5)
}
 0x567   : > { %s6807_s20 = scalar_lea.hbm %s8822_s18, 32  ;;  %s6811_s29 = scalar_lea.hbm %s8875_s9, 64 }
 0x568   : > { %p6808_p7 = scmp.ne.s32.totalorder %s8822_s18, %s6807_s20  ;;  %p6812_p12 = scmp.lt.u32.totalorder %s8822_s18, %s8875_s9 }
 0x569   : > { %p6813_p13 = scmp.lt.u32.totalorder %s6811_s29, %s6807_s20  ;;  %p6815_p1 = scmp.lt.u32.totalorder %s6807_s20, %s8822_s18 }
 0x56a   : > { %p6809_p10 = pnand %p6808_p7, %p6955_p6 }
 0x56b   : > { %p6814_p0 = por %p6813_p13, %p6812_p12 }
 0x56c   : > { %p6810_p11 = pneg %p6809_p10 }
 0x56d   : > { %p6816_p2 = por %p6815_p1, %p6814_p0 }
 0x56f   : > { %p6817_p3 = pnand %p6816_p2, %p6810_p11 }
 0x571   : > { %6820 = shalt.err (!%p6817_p3)
}
 0x572   : > { %6488 = dma.vmem_to_hbm [thread:$0]  (%p6955_p6), %s8824_s10, 32, %s8822_s18, %s5694_s23  }
 0x573 PF: > { %s5720_s17 = sand.u32 1, %s6843_s11   ;;  %p6491_p4 = pnand %p5793_p9, %p6959_p8 }
 0x574   : > { %s5721_s24 = scalar_lea.sflag [#allocation6], %s5720_s17 }
 0x575   : > { %6838 = dma.done.wait (!%p6491_p4), %s5721_s24, 32  }
 0x576   : > { %6840 = vsyncadd (!%p6491_p4), %s5721_s24, 4294967264  ;;  %p21_p5 = scmp.ge.s32.totalorder %s6936_s16, 4   ;;  %s9032_s11 = smov %s6847_s12 }
 0x577   : > { %s9033_s12 = smov %s6851_s13  ;;  %s9034_s13 = smov %s6949_s19 }
 0x578   : > { %s9035_s14 = smov %s6936_s16  ;;  %23 = sbr.rel (!%p21_p5) target bundleno = 6 (0x6), region = 180 }
 0x57f   :  { %5726 = vsyncpa [#allocation6], 1 }
 0x580   :  { %5728 = vsyncpa [#allocation6 + $0x1], 1 }

</bundles_post_ra>
